<compile_context>
chip_gen: v7x
topology: tpu7x:2x2x1
jax: 0.10.0
libtpu: 0.0.40
codegen_flags: <defaults>
</compile_context>

<pallas_src>
import jax
import jax.numpy as jnp
import numpy as np
from jax.experimental import pallas as pl
from jax.experimental.pallas import tpu as pltpu


def _round_up(x, m):
    return ((x + m - 1) // m) * m


def _pick_time_chunk(T, B, max_chunk=32):
    """Time chunk: (chunk*B) rows per grid step; rows must be 8-aligned unless full."""
    if T <= max_chunk:
        return T
    for tt in range(max_chunk, 0, -1):
        if T % tt == 0 and (tt * B) % 8 == 0:
            return tt
    return T


def _pick_bn_channel_tile(C):
    """Channel tile for BN; when tiling, the channel (lane) dim must be 128-aligned."""
    if C % 128 == 0 and C > 512:
        for ct in (512, 256, 128):
            if C % ct == 0:
                return ct
    return C


# ----------------------------- LSTM layer kernel -----------------------------
#
# Inputs are time-major and flattened to 2-D: x is (T*B, Din), row r = t*B + b, so a
# time chunk is a contiguous block of chunk*B rows.  Weights are pre-transposed and
# per-gate zero-padded to Hp lanes (gate g occupies columns [g*Hp, (g+1)*Hp)).

def lstm_chunk_kernel(x_ref, wih_ref, whh_ref, b_ref,
                      hs_ref, hf_ref, cf_ref,
                      h_sc, c_sc, gx_sc):
    ci = pl.program_id(0)

    @pl.when(ci == 0)
    def _():
        h_sc[...] = jnp.zeros_like(h_sc)
        c_sc[...] = jnp.zeros_like(c_sc)

    rows, hp = hs_ref.shape          # rows = chunk * B
    bsz = h_sc.shape[0]
    tt = rows // bsz                 # timesteps in this chunk (static)

    # Hoisted input projection for the whole chunk: ONE MXU matmul, M = chunk*B.
    # TODO(synk): on v6e/v7x cast matmul inputs to bf16 (keep f32 accumulate) for ~2x
    # MXU throughput; kept f32 here to match the f32 reference within tight tolerance.
    gx_sc[...] = (jnp.dot(x_ref[...], wih_ref[...],
                          preferred_element_type=jnp.float32) + b_ref[...])

    def step(j, carry):
        h, c = carry
        r0 = j * bsz
        # Only the small recurrent matmul stays on the serial critical path.
        g = gx_sc[pl.ds(r0, bsz), :] + jnp.dot(
            h, whh_ref[...], preferred_element_type=jnp.float32)
        # Gate blocks are Hp(=multiple of 128)-wide -> 128-aligned free slices.
        i_g = jax.nn.sigmoid(g[:, 0 * hp:1 * hp])
        f_g = jax.nn.sigmoid(g[:, 1 * hp:2 * hp])
        g_g = jnp.tanh(g[:, 2 * hp:3 * hp])
        o_g = jax.nn.sigmoid(g[:, 3 * hp:4 * hp])
        c_new = f_g * c + i_g * g_g
        h_new = o_g * jnp.tanh(c_new)
        hs_ref[pl.ds(r0, bsz), :] = h_new     # VMEM store; HBM writeback once per chunk
        return h_new, c_new

    h_fin, c_fin = jax.lax.fori_loop(0, tt, step, (h_sc[...], c_sc[...]),
                                     unroll=True)
    h_sc[...] = h_fin
    c_sc[...] = c_fin

    # Final states only need to be written on the last chunk.
    @pl.when(ci == pl.num_programs(0) - 1)
    def _():
        hf_ref[...] = h_fin
        cf_ref[...] = c_fin


def lstm_layer(x_2d, wih_t_pad, whh_t_pad, b_pad, batch, hp, chunk):
    """One nn.LSTM layer. x_2d: (T*B, Din) time-major-flattened -> (T*B, Hp), (B, Hp) x2."""
    TB, Din = x_2d.shape
    T = TB // batch
    nchunks = T // chunk
    rows = chunk * batch

    hs, h_t, c_t = pl.pallas_call(
        lstm_chunk_kernel,
        out_shape=(jax.ShapeDtypeStruct((TB, hp), jnp.float32),
                   jax.ShapeDtypeStruct((batch, hp), jnp.float32),
                   jax.ShapeDtypeStruct((batch, hp), jnp.float32)),
        grid_spec=pltpu.PrefetchScalarGridSpec(
            num_scalar_prefetch=0,
            grid=(nchunks,),
            in_specs=[pl.BlockSpec((rows, Din), lambda c: (c, 0)),
                      # Constant-index weight blocks stay resident across the grid.
                      pl.BlockSpec((Din, 4 * hp), lambda c: (0, 0)),
                      pl.BlockSpec((hp, 4 * hp), lambda c: (0, 0)),
                      pl.BlockSpec((1, 4 * hp), lambda c: (0, 0))],
            out_specs=(pl.BlockSpec((rows, hp), lambda c: (c, 0)),
                       pl.BlockSpec((batch, hp), lambda c: (0, 0)),
                       pl.BlockSpec((batch, hp), lambda c: (0, 0))),
            scratch_shapes=[pltpu.VMEM((batch, hp), jnp.float32),   # h carry
                            pltpu.VMEM((batch, hp), jnp.float32),   # c carry
                            pltpu.VMEM((rows, 4 * hp), jnp.float32)]),  # chunk gates_x
        compiler_params=pltpu.CompilerParams(
            dimension_semantics=("arbitrary",),          # serial recurrence over chunks
            vmem_limit_bytes=64 * 1024 * 1024),
    )(x_2d, wih_t_pad, whh_t_pad, b_pad)
    return hs, h_t, c_t


def _prep_lstm_params(w_ih, w_hh, b_ih, b_hh, hp, din_padded):
    """Transpose + per-gate zero-pad PyTorch LSTM weights to the Hp-padded layout."""
    fourH = w_ih.shape[0]
    H = fourH // 4

    def pad_gate_cols(w_t):                       # (rows, 4H) -> (rows, 4*hp)
        parts = []
        for g in range(4):
            blk = w_t[:, g * H:(g + 1) * H]
            parts.append(jnp.pad(blk, ((0, 0), (0, hp - H))))
        return jnp.concatenate(parts, axis=1)

    wih_t = pad_gate_cols(jnp.transpose(w_ih))                    # (Din, 4*hp)
    wih_t = jnp.pad(wih_t, ((0, din_padded - wih_t.shape[0]), (0, 0)))
    whh_t = pad_gate_cols(jnp.transpose(w_hh))                    # (H, 4*hp)
    whh_t = jnp.pad(whh_t, ((0, hp - H), (0, 0)))                 # (hp, 4*hp)
    b = b_ih + b_hh
    b_pad = jnp.concatenate(
        [jnp.pad(b[g * H:(g + 1) * H], (0, hp - H)) for g in range(4)]).reshape(1, 4 * hp)
    return (wih_t.astype(jnp.float32), whh_t.astype(jnp.float32),
            b_pad.astype(jnp.float32))


# ----------------------------- BatchNorm1d kernel ----------------------------
#
# e is the natural flattening (B, T*H) of the batch-first hidden sequence.  The
# module's raw reshape (B,T,H)->(B,H,T) means channel c = lane_index // T, i.e. each
# channel owns T contiguous lanes.  g_ref is the (lanes, channels) one-hot grouping
# matrix for this tile; gt_ref its transpose.  Per-channel stats (single pass, sum +
# sum-of-squares) and the per-channel -> per-lane broadcast are done with small MXU
# matmuls, so no transposes or lane relayouts are needed anywhere.

def bn_kernel(e_ref, g_ref, gt_ref, gamma_ref, beta_ref, out_ref):
    e = e_ref[...].astype(jnp.float32)                   # (B, Nt)
    g_mat = g_ref[...]                                   # (Nt, Ct)
    bsz, nt = e.shape
    ct = g_mat.shape[1]
    t = nt // ct
    n = float(bsz * t)

    s1 = jnp.sum(jnp.dot(e, g_mat, preferred_element_type=jnp.float32),
                 axis=0, keepdims=True)                  # (1, Ct) sum per channel
    s2 = jnp.sum(jnp.dot(e * e, g_mat, preferred_element_type=jnp.float32),
                 axis=0, keepdims=True)                  # (1, Ct) sum of squares
    mean_c = s1 / n
    var_c = s2 / n - mean_c * mean_c                     # biased (training-mode) variance
    inv_c = jax.lax.rsqrt(var_c + 1e-5)

    gt = gt_ref[...]                                     # (Ct, Nt)
    mean_l = jnp.dot(mean_c, gt, preferred_element_type=jnp.float32)   # (1, Nt)
    inv_l = jnp.dot(inv_c, gt, preferred_element_type=jnp.float32)     # (1, Nt)
    out_ref[...] = ((e - mean_l) * inv_l * gamma_ref[...]
                    + beta_ref[...]).astype(out_ref.dtype)


def batchnorm1d_reshaped(e_bn, gamma, beta, seq_len):
    """BatchNorm1d over the module's raw (B, C, T) view, computed on e_bn = (B, T*H)."""
    B, N = e_bn.shape
    C = N // seq_len
    ct = _pick_bn_channel_tile(C)
    ntiles = C // ct
    nt = ct * seq_len

    # Channel-grouping matrix (lane p -> channel p // T) and lane-expanded affine params.
    grp = (jnp.arange(N)[:, None] // seq_len
           == jnp.arange(C)[None, :]).astype(jnp.float32)        # (N, C)
    grp_t = jnp.transpose(grp)                                    # (C, N)
    gamma_l = jnp.repeat(gamma.astype(jnp.float32), seq_len).reshape(1, N)
    beta_l = jnp.repeat(beta.astype(jnp.float32), seq_len).reshape(1, N)

    return pl.pallas_call(
        bn_kernel,
        out_shape=jax.ShapeDtypeStruct((B, N), jnp.float32),
        grid_spec=pltpu.PrefetchScalarGridSpec(
            num_scalar_prefetch=0,
            grid=(ntiles,),
            in_specs=[pl.BlockSpec((B, nt), lambda i: (0, i)),
                      pl.BlockSpec((nt, ct), lambda i: (i, i)),
                      pl.BlockSpec((ct, nt), lambda i: (i, i)),
                      pl.BlockSpec((1, nt), lambda i: (0, i)),
                      pl.BlockSpec((1, nt), lambda i: (0, i))],
            out_specs=pl.BlockSpec((B, nt), lambda i: (0, i))),
        compiler_params=pltpu.CompilerParams(
            dimension_semantics=("parallel",),            # channel tiles are independent
            vmem_limit_bytes=64 * 1024 * 1024),
    )(e_bn.astype(jnp.float32), grp, grp_t, gamma_l, beta_l)


# ------------------------------ Encoder forward -------------------------------

def encoder_forward(x_bti, params):
    B, T, I = x_bti.shape
    H = params["bn_gamma"].shape[0]
    hp = _round_up(H, 128)                 # per-gate lane padding (exact zeros in pad lanes)
    chunk = _pick_time_chunk(T, B)

    # Time-major flattened input (T*B, I); a time chunk is a contiguous row block.
    x2d = jnp.transpose(x_bti, (1, 0, 2)).reshape(T * B, I).astype(jnp.float32)

    h_list, c_list = [], []
    inp = x2d
    for li, lp in enumerate(params["lstm"]):
        din_padded = I if li == 0 else hp
        wih_t, whh_t, b = _prep_lstm_params(lp["w_ih"], lp["w_hh"],
                                            lp["b_ih"], lp["b_hh"], hp, din_padded)
        hs, h_t, c_t = lstm_layer(inp, wih_t, whh_t, b, B, hp, chunk)
        # TODO(synk): nn.LSTM inter-layer dropout omitted (dropout_ratio = 0.0 here).
        h_list.append(h_t[:, :H])
        c_list.append(c_t[:, :H])
        inp = hs                            # (T*B, hp): lane-dense, fed straight to next layer

    # Single small transpose back to batch-first, then the module's raw reshapes are
    # handled on the natural (B, T*H) flattening (no further transposes).
    enc = jnp.transpose(inp.reshape(T, B, hp)[:, :, :H], (1, 0, 2))   # (B, T, H)
    e = enc.reshape(B, T * H)
    y = batchnorm1d_reshaped(e, params["bn_gamma"], params["bn_beta"], T)
    out = y.reshape(B, T, H)

    return out, jnp.stack(h_list, 0), jnp.stack(c_list, 0)


# ------------------------------- pure-JAX reference ---------------------------

def _lstm_layer_ref(x_tbi, w_ih, w_hh, b_ih, b_hh):
    H = w_hh.shape[1]
    B = x_tbi.shape[1]

    def step(carry, x_t):
        h, c = carry
        gates = x_t @ w_ih.T + h @ w_hh.T + b_ih + b_hh
        i, f, g, o = jnp.split(gates, 4, axis=1)
        c = jax.nn.sigmoid(f) * c + jax.nn.sigmoid(i) * jnp.tanh(g)
        h = jax.nn.sigmoid(o) * jnp.tanh(c)
        return (h, c), h

    (h, c), hs = jax.lax.scan(step, (jnp.zeros((B, H)), jnp.zeros((B, H))), x_tbi)
    return hs, h, c


def _encoder_ref(x_bti, params):
    B, T, _ = x_bti.shape
    inp = jnp.transpose(x_bti, (1, 0, 2))
    h_list, c_list = [], []
    for layer in params["lstm"]:
        hs, h, c = _lstm_layer_ref(inp, layer["w_ih"], layer["w_hh"],
                                   layer["b_ih"], layer["b_hh"])
        h_list.append(h)
        c_list.append(c)
        inp = hs
    enc = jnp.transpose(inp, (1, 0, 2))
    H = enc.shape[2]
    y = enc.reshape(B, H, T)
    mean = jnp.mean(y, axis=(0, 2), keepdims=True)
    var = jnp.mean((y - mean) ** 2, axis=(0, 2), keepdims=True)
    y = (y - mean) * jax.lax.rsqrt(var + 1e-5)
    y = y * params["bn_gamma"].reshape(1, H, 1) + params["bn_beta"].reshape(1, H, 1)
    out = y.reshape(B, T, H)
    return out, jnp.stack(h_list, 0), jnp.stack(c_list, 0)


# ------------------------------------ main -------------------------------------

if __name__ == "__main__":
    INPUT_SIZE = 16
    HIDDEN = 32
    NUM_LAYERS = 2
    BATCH = 2
    SEQ = 8

    key = jax.random.PRNGKey(0)
    k = 1.0 / np.sqrt(HIDDEN)
    params = {"lstm": []}
    for layer in range(NUM_LAYERS):
        in_dim = INPUT_SIZE if layer == 0 else HIDDEN
        key, k1, k2, k3, k4 = jax.random.split(key, 5)
        params["lstm"].append({
            "w_ih": jax.random.uniform(k1, (4 * HIDDEN, in_dim), jnp.float32, -k, k),
            "w_hh": jax.random.uniform(k2, (4 * HIDDEN, HIDDEN), jnp.float32, -k, k),
            "b_ih": jax.random.uniform(k3, (4 * HIDDEN,), jnp.float32, -k, k),
            "b_hh": jax.random.uniform(k4, (4 * HIDDEN,), jnp.float32, -k, k),
        })
    key, kg, kb, kx = jax.random.split(key, 4)
    params["bn_gamma"] = jax.random.uniform(kg, (HIDDEN,), jnp.float32, 0.5, 1.5)
    params["bn_beta"] = jax.random.uniform(kb, (HIDDEN,), jnp.float32, -0.5, 0.5)

    x = jax.random.normal(kx, (BATCH, SEQ, INPUT_SIZE), jnp.float32)

    fwd = jax.jit(encoder_forward)
    out, h_t, c_t = fwd(x, params)
    jax.block_until_ready((out, h_t, c_t))

    ref_out, ref_h, ref_c = _encoder_ref(x, params)
    np.testing.assert_allclose(np.asarray(out), np.asarray(ref_out), rtol=1e-3, atol=1e-3)
    np.testing.assert_allclose(np.asarray(h_t), np.asarray(ref_h), rtol=1e-3, atol=1e-3)
    np.testing.assert_allclose(np.asarray(c_t), np.asarray(ref_c), rtol=1e-3, atol=1e-3)

    assert out.shape == (BATCH, SEQ, HIDDEN)
    assert h_t.shape == (NUM_LAYERS, BATCH, HIDDEN)
    assert c_t.shape == (NUM_LAYERS, BATCH, HIDDEN)
    print("KERNEL_OK")
</pallas_src>

<mosaic_0001>
module attributes {stable_mosaic.version = 11 : i64} {
  func.func @lstm_chunk_kernel(%arg0: i32, %arg1: memref<16x16xf32, #tpu.memory_space<vmem>>, %arg2: memref<16x512xf32, #tpu.memory_space<vmem>>, %arg3: memref<128x512xf32, #tpu.memory_space<vmem>>, %arg4: memref<1x512xf32, #tpu.memory_space<vmem>>, %arg5: memref<16x128xf32, #tpu.memory_space<vmem>>, %arg6: memref<2x128xf32, #tpu.memory_space<vmem>>, %arg7: memref<2x128xf32, #tpu.memory_space<vmem>>, %arg8: memref<2x128xf32, #tpu.memory_space<vmem>>, %arg9: memref<2x128xf32, #tpu.memory_space<vmem>>, %arg10: memref<16x512xf32, #tpu.memory_space<vmem>>) attributes {dimension_semantics = [#tpu.dimension_semantics<arbitrary>], iteration_bounds = array<i64: 1>, scalar_prefetch = 0 : i64, scratch_operands = 3 : i64, tpu.core_type = #tpu.core_type<tc>, window_params = [{transform_indices = @transform_0, window_bounds = array<i64: 16, 16>}, {pipeline_mode = #tpu.pipeline_mode<synchronous>, transform_indices = @transform_1, window_bounds = array<i64: 16, 512>}, {pipeline_mode = #tpu.pipeline_mode<synchronous>, transform_indices = @transform_2, window_bounds = array<i64: 128, 512>}, {pipeline_mode = #tpu.pipeline_mode<synchronous>, transform_indices = @transform_3, window_bounds = array<i64: 1, 512>}, {transform_indices = @transform_4, window_bounds = array<i64: 16, 128>}, {pipeline_mode = #tpu.pipeline_mode<synchronous>, transform_indices = @transform_5, window_bounds = array<i64: 2, 128>}, {pipeline_mode = #tpu.pipeline_mode<synchronous>, transform_indices = @transform_6, window_bounds = array<i64: 2, 128>}]} {
    %c0_i32 = arith.constant 0 : i32
    %0 = arith.cmpi eq, %arg0, %c0_i32 : i32
    %1 = arith.extui %0 : i1 to i32
    %c0_i32_0 = arith.constant 0 : i32
    %2 = arith.cmpi ne, %1, %c0_i32_0 : i32
    scf.if %2 {
      %cst_91 = arith.constant 0.000000e+00 : f32
      %281 = vector.broadcast %cst_91 : f32 to vector<2x128xf32>
      %c0_92 = arith.constant 0 : index
      %c0_93 = arith.constant 0 : index
      %282 = vector.load %arg8[%c0_92, %c0_93] : memref<2x128xf32, #tpu.memory_space<vmem>>, vector<2x128xf32>
      tpu.vector_store %arg8[%c0_92, %c0_93], %281 {strides = array<i32>} : memref<2x128xf32, #tpu.memory_space<vmem>>, vector<2x128xf32>,
      %cst_94 = arith.constant 0.000000e+00 : f32
      %283 = vector.broadcast %cst_94 : f32 to vector<2x128xf32>
      %c0_95 = arith.constant 0 : index
      %c0_96 = arith.constant 0 : index
      %284 = vector.load %arg9[%c0_95, %c0_96] : memref<2x128xf32, #tpu.memory_space<vmem>>, vector<2x128xf32>
      tpu.vector_store %arg9[%c0_95, %c0_96], %283 {strides = array<i32>} : memref<2x128xf32, #tpu.memory_space<vmem>>, vector<2x128xf32>,
    } else {
    }
    %c0 = arith.constant 0 : index
    %c0_1 = arith.constant 0 : index
    %3 = vector.load %arg1[%c0, %c0_1] : memref<16x16xf32, #tpu.memory_space<vmem>>, vector<16x16xf32>
    %c0_2 = arith.constant 0 : index
    %c0_3 = arith.constant 0 : index
    %4 = vector.load %arg2[%c0_2, %c0_3] : memref<16x512xf32, #tpu.memory_space<vmem>>, vector<16x512xf32>
    %cst = arith.constant dense<0.000000e+00> : vector<16x512xf32>
    %5 = tpu.matmul %3, %4, %cst {dimension_numbers = #tpu.dot_dimension_numbers<[1], [0], [0], [1], [0, 0, 1, 1], [], []>} : vector<16x16xf32>, vector<16x512xf32>, vector<16x512xf32> -> vector<16x512xf32>
    %c0_4 = arith.constant 0 : index
    %c0_5 = arith.constant 0 : index
    %6 = vector.load %arg4[%c0_4, %c0_5] : memref<1x512xf32, #tpu.memory_space<vmem>>, vector<1x512xf32>
    %7 = vector.broadcast %6 : vector<1x512xf32> to vector<16x512xf32>
    %8 = arith.addf %5, %7 : vector<16x512xf32>
    %c0_6 = arith.constant 0 : index
    %c0_7 = arith.constant 0 : index
    %9 = vector.load %arg10[%c0_6, %c0_7] : memref<16x512xf32, #tpu.memory_space<vmem>>, vector<16x512xf32>
    tpu.vector_store %arg10[%c0_6, %c0_7], %8 {strides = array<i32>} : memref<16x512xf32, #tpu.memory_space<vmem>>, vector<16x512xf32>,
    %c0_8 = arith.constant 0 : index
    %c0_9 = arith.constant 0 : index
    %10 = vector.load %arg8[%c0_8, %c0_9] : memref<2x128xf32, #tpu.memory_space<vmem>>, vector<2x128xf32>
    %c0_10 = arith.constant 0 : index
    %c0_11 = arith.constant 0 : index
    %11 = vector.load %arg9[%c0_10, %c0_11] : memref<2x128xf32, #tpu.memory_space<vmem>>, vector<2x128xf32>
    %c0_i32_12 = arith.constant 0 : i32
    %c2_i32 = arith.constant 2 : i32
    %12 = arith.muli %c0_i32_12, %c2_i32 : i32
    %13 = arith.index_cast %12 : i32 to index
    %c0_13 = arith.constant 0 : index
    %14 = vector.load %arg10[%13, %c0_13] : memref<16x512xf32, #tpu.memory_space<vmem>>, vector<2x512xf32>
    %c0_14 = arith.constant 0 : index
    %c0_15 = arith.constant 0 : index
    %15 = vector.load %arg3[%c0_14, %c0_15] : memref<128x512xf32, #tpu.memory_space<vmem>>, vector<128x512xf32>
    %cst_16 = arith.constant dense<0.000000e+00> : vector<2x512xf32>
    %16 = tpu.matmul %10, %15, %cst_16 {dimension_numbers = #tpu.dot_dimension_numbers<[1], [0], [0], [1], [0, 0, 1, 1], [], []>} : vector<2x128xf32>, vector<128x512xf32>, vector<2x512xf32> -> vector<2x512xf32>
    %17 = arith.addf %14, %16 : vector<2x512xf32>
    %18 = vector.extract_strided_slice %17 {offsets = [0, 0], sizes = [2, 128], strides = [1, 1]} : vector<2x512xf32> to vector<2x128xf32>
    %19 = arith.negf %18 : vector<2x128xf32>
    %20 = math.exp %19 : vector<2x128xf32>
    %cst_17 = arith.constant 1.000000e+00 : f32
    %21 = vector.broadcast %cst_17 : f32 to vector<2x128xf32>
    %22 = arith.addf %21, %20 : vector<2x128xf32>
    %23 = arith.divf %21, %22 : vector<2x128xf32>
    %24 = vector.extract_strided_slice %17 {offsets = [0, 128], sizes = [2, 128], strides = [1, 1]} : vector<2x512xf32> to vector<2x128xf32>
    %25 = arith.negf %24 : vector<2x128xf32>
    %26 = math.exp %25 : vector<2x128xf32>
    %cst_18 = arith.constant 1.000000e+00 : f32
    %27 = vector.broadcast %cst_18 : f32 to vector<2x128xf32>
    %28 = arith.addf %27, %26 : vector<2x128xf32>
    %29 = arith.divf %27, %28 : vector<2x128xf32>
    %30 = vector.extract_strided_slice %17 {offsets = [0, 256], sizes = [2, 128], strides = [1, 1]} : vector<2x512xf32> to vector<2x128xf32>
    %31 = math.tanh %30 : vector<2x128xf32>
    %32 = vector.extract_strided_slice %17 {offsets = [0, 384], sizes = [2, 128], strides = [1, 1]} : vector<2x512xf32> to vector<2x128xf32>
    %33 = arith.negf %32 : vector<2x128xf32>
    %34 = math.exp %33 : vector<2x128xf32>
    %cst_19 = arith.constant 1.000000e+00 : f32
    %35 = vector.broadcast %cst_19 : f32 to vector<2x128xf32>
    %36 = arith.addf %35, %34 : vector<2x128xf32>
    %37 = arith.divf %35, %36 : vector<2x128xf32>
    %38 = arith.mulf %29, %11 : vector<2x128xf32>
    %39 = arith.mulf %23, %31 : vector<2x128xf32>
    %40 = arith.addf %38, %39 : vector<2x128xf32>
    %41 = math.tanh %40 : vector<2x128xf32>
    %42 = arith.mulf %37, %41 : vector<2x128xf32>
    %43 = arith.index_cast %12 : i32 to index
    %c0_20 = arith.constant 0 : index
    %44 = vector.load %arg5[%43, %c0_20] : memref<16x128xf32, #tpu.memory_space<vmem>>, vector<2x128xf32>
    tpu.vector_store %arg5[%43, %c0_20], %42 {strides = array<i32>} : memref<16x128xf32, #tpu.memory_space<vmem>>, vector<2x128xf32>,
    %c1_i32 = arith.constant 1 : i32
    %c2_i32_21 = arith.constant 2 : i32
    %45 = arith.muli %c1_i32, %c2_i32_21 : i32
    %46 = arith.index_cast %45 : i32 to index
    %c0_22 = arith.constant 0 : index
    %47 = vector.load %arg10[%46, %c0_22] : memref<16x512xf32, #tpu.memory_space<vmem>>, vector<2x512xf32>
    %c0_23 = arith.constant 0 : index
    %c0_24 = arith.constant 0 : index
    %48 = vector.load %arg3[%c0_23, %c0_24] : memref<128x512xf32, #tpu.memory_space<vmem>>, vector<128x512xf32>
    %cst_25 = arith.constant dense<0.000000e+00> : vector<2x512xf32>
    %49 = tpu.matmul %42, %48, %cst_25 {dimension_numbers = #tpu.dot_dimension_numbers<[1], [0], [0], [1], [0, 0, 1, 1], [], []>} : vector<2x128xf32>, vector<128x512xf32>, vector<2x512xf32> -> vector<2x512xf32>
    %50 = arith.addf %47, %49 : vector<2x512xf32>
    %51 = vector.extract_strided_slice %50 {offsets = [0, 0], sizes = [2, 128], strides = [1, 1]} : vector<2x512xf32> to vector<2x128xf32>
    %52 = arith.negf %51 : vector<2x128xf32>
    %53 = math.exp %52 : vector<2x128xf32>
    %cst_26 = arith.constant 1.000000e+00 : f32
    %54 = vector.broadcast %cst_26 : f32 to vector<2x128xf32>
    %55 = arith.addf %54, %53 : vector<2x128xf32>
    %56 = arith.divf %54, %55 : vector<2x128xf32>
    %57 = vector.extract_strided_slice %50 {offsets = [0, 128], sizes = [2, 128], strides = [1, 1]} : vector<2x512xf32> to vector<2x128xf32>
    %58 = arith.negf %57 : vector<2x128xf32>
    %59 = math.exp %58 : vector<2x128xf32>
    %cst_27 = arith.constant 1.000000e+00 : f32
    %60 = vector.broadcast %cst_27 : f32 to vector<2x128xf32>
    %61 = arith.addf %60, %59 : vector<2x128xf32>
    %62 = arith.divf %60, %61 : vector<2x128xf32>
    %63 = vector.extract_strided_slice %50 {offsets = [0, 256], sizes = [2, 128], strides = [1, 1]} : vector<2x512xf32> to vector<2x128xf32>
    %64 = math.tanh %63 : vector<2x128xf32>
    %65 = vector.extract_strided_slice %50 {offsets = [0, 384], sizes = [2, 128], strides = [1, 1]} : vector<2x512xf32> to vector<2x128xf32>
    %66 = arith.negf %65 : vector<2x128xf32>
    %67 = math.exp %66 : vector<2x128xf32>
    %cst_28 = arith.constant 1.000000e+00 : f32
    %68 = vector.broadcast %cst_28 : f32 to vector<2x128xf32>
    %69 = arith.addf %68, %67 : vector<2x128xf32>
    %70 = arith.divf %68, %69 : vector<2x128xf32>
    %71 = arith.mulf %62, %40 : vector<2x128xf32>
    %72 = arith.mulf %56, %64 : vector<2x128xf32>
    %73 = arith.addf %71, %72 : vector<2x128xf32>
    %74 = math.tanh %73 : vector<2x128xf32>
    %75 = arith.mulf %70, %74 : vector<2x128xf32>
    %76 = arith.index_cast %45 : i32 to index
    %c0_29 = arith.constant 0 : index
    %77 = vector.load %arg5[%76, %c0_29] : memref<16x128xf32, #tpu.memory_space<vmem>>, vector<2x128xf32>
    tpu.vector_store %arg5[%76, %c0_29], %75 {strides = array<i32>} : memref<16x128xf32, #tpu.memory_space<vmem>>, vector<2x128xf32>,
    %c2_i32_30 = arith.constant 2 : i32
    %c2_i32_31 = arith.constant 2 : i32
    %78 = arith.muli %c2_i32_30, %c2_i32_31 : i32
    %79 = arith.index_cast %78 : i32 to index
    %c0_32 = arith.constant 0 : index
    %80 = vector.load %arg10[%79, %c0_32] : memref<16x512xf32, #tpu.memory_space<vmem>>, vector<2x512xf32>
    %c0_33 = arith.constant 0 : index
    %c0_34 = arith.constant 0 : index
    %81 = vector.load %arg3[%c0_33, %c0_34] : memref<128x512xf32, #tpu.memory_space<vmem>>, vector<128x512xf32>
    %cst_35 = arith.constant dense<0.000000e+00> : vector<2x512xf32>
    %82 = tpu.matmul %75, %81, %cst_35 {dimension_numbers = #tpu.dot_dimension_numbers<[1], [0], [0], [1], [0, 0, 1, 1], [], []>} : vector<2x128xf32>, vector<128x512xf32>, vector<2x512xf32> -> vector<2x512xf32>
    %83 = arith.addf %80, %82 : vector<2x512xf32>
    %84 = vector.extract_strided_slice %83 {offsets = [0, 0], sizes = [2, 128], strides = [1, 1]} : vector<2x512xf32> to vector<2x128xf32>
    %85 = arith.negf %84 : vector<2x128xf32>
    %86 = math.exp %85 : vector<2x128xf32>
    %cst_36 = arith.constant 1.000000e+00 : f32
    %87 = vector.broadcast %cst_36 : f32 to vector<2x128xf32>
    %88 = arith.addf %87, %86 : vector<2x128xf32>
    %89 = arith.divf %87, %88 : vector<2x128xf32>
    %90 = vector.extract_strided_slice %83 {offsets = [0, 128], sizes = [2, 128], strides = [1, 1]} : vector<2x512xf32> to vector<2x128xf32>
    %91 = arith.negf %90 : vector<2x128xf32>
    %92 = math.exp %91 : vector<2x128xf32>
    %cst_37 = arith.constant 1.000000e+00 : f32
    %93 = vector.broadcast %cst_37 : f32 to vector<2x128xf32>
    %94 = arith.addf %93, %92 : vector<2x128xf32>
    %95 = arith.divf %93, %94 : vector<2x128xf32>
    %96 = vector.extract_strided_slice %83 {offsets = [0, 256], sizes = [2, 128], strides = [1, 1]} : vector<2x512xf32> to vector<2x128xf32>
    %97 = math.tanh %96 : vector<2x128xf32>
    %98 = vector.extract_strided_slice %83 {offsets = [0, 384], sizes = [2, 128], strides = [1, 1]} : vector<2x512xf32> to vector<2x128xf32>
    %99 = arith.negf %98 : vector<2x128xf32>
    %100 = math.exp %99 : vector<2x128xf32>
    %cst_38 = arith.constant 1.000000e+00 : f32
    %101 = vector.broadcast %cst_38 : f32 to vector<2x128xf32>
    %102 = arith.addf %101, %100 : vector<2x128xf32>
    %103 = arith.divf %101, %102 : vector<2x128xf32>
    %104 = arith.mulf %95, %73 : vector<2x128xf32>
    %105 = arith.mulf %89, %97 : vector<2x128xf32>
    %106 = arith.addf %104, %105 : vector<2x128xf32>
    %107 = math.tanh %106 : vector<2x128xf32>
    %108 = arith.mulf %103, %107 : vector<2x128xf32>
    %109 = arith.index_cast %78 : i32 to index
    %c0_39 = arith.constant 0 : index
    %110 = vector.load %arg5[%109, %c0_39] : memref<16x128xf32, #tpu.memory_space<vmem>>, vector<2x128xf32>
    tpu.vector_store %arg5[%109, %c0_39], %108 {strides = array<i32>} : memref<16x128xf32, #tpu.memory_space<vmem>>, vector<2x128xf32>,
    %c3_i32 = arith.constant 3 : i32
    %c2_i32_40 = arith.constant 2 : i32
    %111 = arith.muli %c3_i32, %c2_i32_40 : i32
    %112 = arith.index_cast %111 : i32 to index
    %c0_41 = arith.constant 0 : index
    %113 = vector.load %arg10[%112, %c0_41] : memref<16x512xf32, #tpu.memory_space<vmem>>, vector<2x512xf32>
    %c0_42 = arith.constant 0 : index
    %c0_43 = arith.constant 0 : index
    %114 = vector.load %arg3[%c0_42, %c0_43] : memref<128x512xf32, #tpu.memory_space<vmem>>, vector<128x512xf32>
    %cst_44 = arith.constant dense<0.000000e+00> : vector<2x512xf32>
    %115 = tpu.matmul %108, %114, %cst_44 {dimension_numbers = #tpu.dot_dimension_numbers<[1], [0], [0], [1], [0, 0, 1, 1], [], []>} : vector<2x128xf32>, vector<128x512xf32>, vector<2x512xf32> -> vector<2x512xf32>
    %116 = arith.addf %113, %115 : vector<2x512xf32>
    %117 = vector.extract_strided_slice %116 {offsets = [0, 0], sizes = [2, 128], strides = [1, 1]} : vector<2x512xf32> to vector<2x128xf32>
    %118 = arith.negf %117 : vector<2x128xf32>
    %119 = math.exp %118 : vector<2x128xf32>
    %cst_45 = arith.constant 1.000000e+00 : f32
    %120 = vector.broadcast %cst_45 : f32 to vector<2x128xf32>
    %121 = arith.addf %120, %119 : vector<2x128xf32>
    %122 = arith.divf %120, %121 : vector<2x128xf32>
    %123 = vector.extract_strided_slice %116 {offsets = [0, 128], sizes = [2, 128], strides = [1, 1]} : vector<2x512xf32> to vector<2x128xf32>
    %124 = arith.negf %123 : vector<2x128xf32>
    %125 = math.exp %124 : vector<2x128xf32>
    %cst_46 = arith.constant 1.000000e+00 : f32
    %126 = vector.broadcast %cst_46 : f32 to vector<2x128xf32>
    %127 = arith.addf %126, %125 : vector<2x128xf32>
    %128 = arith.divf %126, %127 : vector<2x128xf32>
    %129 = vector.extract_strided_slice %116 {offsets = [0, 256], sizes = [2, 128], strides = [1, 1]} : vector<2x512xf32> to vector<2x128xf32>
    %130 = math.tanh %129 : vector<2x128xf32>
    %131 = vector.extract_strided_slice %116 {offsets = [0, 384], sizes = [2, 128], strides = [1, 1]} : vector<2x512xf32> to vector<2x128xf32>
    %132 = arith.negf %131 : vector<2x128xf32>
    %133 = math.exp %132 : vector<2x128xf32>
    %cst_47 = arith.constant 1.000000e+00 : f32
    %134 = vector.broadcast %cst_47 : f32 to vector<2x128xf32>
    %135 = arith.addf %134, %133 : vector<2x128xf32>
    %136 = arith.divf %134, %135 : vector<2x128xf32>
    %137 = arith.mulf %128, %106 : vector<2x128xf32>
    %138 = arith.mulf %122, %130 : vector<2x128xf32>
    %139 = arith.addf %137, %138 : vector<2x128xf32>
    %140 = math.tanh %139 : vector<2x128xf32>
    %141 = arith.mulf %136, %140 : vector<2x128xf32>
    %142 = arith.index_cast %111 : i32 to index
    %c0_48 = arith.constant 0 : index
    %143 = vector.load %arg5[%142, %c0_48] : memref<16x128xf32, #tpu.memory_space<vmem>>, vector<2x128xf32>
    tpu.vector_store %arg5[%142, %c0_48], %141 {strides = array<i32>} : memref<16x128xf32, #tpu.memory_space<vmem>>, vector<2x128xf32>,
    %c4_i32 = arith.constant 4 : i32
    %c2_i32_49 = arith.constant 2 : i32
    %144 = arith.muli %c4_i32, %c2_i32_49 : i32
    %145 = arith.index_cast %144 : i32 to index
    %c0_50 = arith.constant 0 : index
    %146 = vector.load %arg10[%145, %c0_50] : memref<16x512xf32, #tpu.memory_space<vmem>>, vector<2x512xf32>
    %c0_51 = arith.constant 0 : index
    %c0_52 = arith.constant 0 : index
    %147 = vector.load %arg3[%c0_51, %c0_52] : memref<128x512xf32, #tpu.memory_space<vmem>>, vector<128x512xf32>
    %cst_53 = arith.constant dense<0.000000e+00> : vector<2x512xf32>
    %148 = tpu.matmul %141, %147, %cst_53 {dimension_numbers = #tpu.dot_dimension_numbers<[1], [0], [0], [1], [0, 0, 1, 1], [], []>} : vector<2x128xf32>, vector<128x512xf32>, vector<2x512xf32> -> vector<2x512xf32>
    %149 = arith.addf %146, %148 : vector<2x512xf32>
    %150 = vector.extract_strided_slice %149 {offsets = [0, 0], sizes = [2, 128], strides = [1, 1]} : vector<2x512xf32> to vector<2x128xf32>
    %151 = arith.negf %150 : vector<2x128xf32>
    %152 = math.exp %151 : vector<2x128xf32>
    %cst_54 = arith.constant 1.000000e+00 : f32
    %153 = vector.broadcast %cst_54 : f32 to vector<2x128xf32>
    %154 = arith.addf %153, %152 : vector<2x128xf32>
    %155 = arith.divf %153, %154 : vector<2x128xf32>
    %156 = vector.extract_strided_slice %149 {offsets = [0, 128], sizes = [2, 128], strides = [1, 1]} : vector<2x512xf32> to vector<2x128xf32>
    %157 = arith.negf %156 : vector<2x128xf32>
    %158 = math.exp %157 : vector<2x128xf32>
    %cst_55 = arith.constant 1.000000e+00 : f32
    %159 = vector.broadcast %cst_55 : f32 to vector<2x128xf32>
    %160 = arith.addf %159, %158 : vector<2x128xf32>
    %161 = arith.divf %159, %160 : vector<2x128xf32>
    %162 = vector.extract_strided_slice %149 {offsets = [0, 256], sizes = [2, 128], strides = [1, 1]} : vector<2x512xf32> to vector<2x128xf32>
    %163 = math.tanh %162 : vector<2x128xf32>
    %164 = vector.extract_strided_slice %149 {offsets = [0, 384], sizes = [2, 128], strides = [1, 1]} : vector<2x512xf32> to vector<2x128xf32>
    %165 = arith.negf %164 : vector<2x128xf32>
    %166 = math.exp %165 : vector<2x128xf32>
    %cst_56 = arith.constant 1.000000e+00 : f32
    %167 = vector.broadcast %cst_56 : f32 to vector<2x128xf32>
    %168 = arith.addf %167, %166 : vector<2x128xf32>
    %169 = arith.divf %167, %168 : vector<2x128xf32>
    %170 = arith.mulf %161, %139 : vector<2x128xf32>
    %171 = arith.mulf %155, %163 : vector<2x128xf32>
    %172 = arith.addf %170, %171 : vector<2x128xf32>
    %173 = math.tanh %172 : vector<2x128xf32>
    %174 = arith.mulf %169, %173 : vector<2x128xf32>
    %175 = arith.index_cast %144 : i32 to index
    %c0_57 = arith.constant 0 : index
    %176 = vector.load %arg5[%175, %c0_57] : memref<16x128xf32, #tpu.memory_space<vmem>>, vector<2x128xf32>
    tpu.vector_store %arg5[%175, %c0_57], %174 {strides = array<i32>} : memref<16x128xf32, #tpu.memory_space<vmem>>, vector<2x128xf32>,
    %c5_i32 = arith.constant 5 : i32
    %c2_i32_58 = arith.constant 2 : i32
    %177 = arith.muli %c5_i32, %c2_i32_58 : i32
    %178 = arith.index_cast %177 : i32 to index
    %c0_59 = arith.constant 0 : index
    %179 = vector.load %arg10[%178, %c0_59] : memref<16x512xf32, #tpu.memory_space<vmem>>, vector<2x512xf32>
    %c0_60 = arith.constant 0 : index
    %c0_61 = arith.constant 0 : index
    %180 = vector.load %arg3[%c0_60, %c0_61] : memref<128x512xf32, #tpu.memory_space<vmem>>, vector<128x512xf32>
    %cst_62 = arith.constant dense<0.000000e+00> : vector<2x512xf32>
    %181 = tpu.matmul %174, %180, %cst_62 {dimension_numbers = #tpu.dot_dimension_numbers<[1], [0], [0], [1], [0, 0, 1, 1], [], []>} : vector<2x128xf32>, vector<128x512xf32>, vector<2x512xf32> -> vector<2x512xf32>
    %182 = arith.addf %179, %181 : vector<2x512xf32>
    %183 = vector.extract_strided_slice %182 {offsets = [0, 0], sizes = [2, 128], strides = [1, 1]} : vector<2x512xf32> to vector<2x128xf32>
    %184 = arith.negf %183 : vector<2x128xf32>
    %185 = math.exp %184 : vector<2x128xf32>
    %cst_63 = arith.constant 1.000000e+00 : f32
    %186 = vector.broadcast %cst_63 : f32 to vector<2x128xf32>
    %187 = arith.addf %186, %185 : vector<2x128xf32>
    %188 = arith.divf %186, %187 : vector<2x128xf32>
    %189 = vector.extract_strided_slice %182 {offsets = [0, 128], sizes = [2, 128], strides = [1, 1]} : vector<2x512xf32> to vector<2x128xf32>
    %190 = arith.negf %189 : vector<2x128xf32>
    %191 = math.exp %190 : vector<2x128xf32>
    %cst_64 = arith.constant 1.000000e+00 : f32
    %192 = vector.broadcast %cst_64 : f32 to vector<2x128xf32>
    %193 = arith.addf %192, %191 : vector<2x128xf32>
    %194 = arith.divf %192, %193 : vector<2x128xf32>
    %195 = vector.extract_strided_slice %182 {offsets = [0, 256], sizes = [2, 128], strides = [1, 1]} : vector<2x512xf32> to vector<2x128xf32>
    %196 = math.tanh %195 : vector<2x128xf32>
    %197 = vector.extract_strided_slice %182 {offsets = [0, 384], sizes = [2, 128], strides = [1, 1]} : vector<2x512xf32> to vector<2x128xf32>
    %198 = arith.negf %197 : vector<2x128xf32>
    %199 = math.exp %198 : vector<2x128xf32>
    %cst_65 = arith.constant 1.000000e+00 : f32
    %200 = vector.broadcast %cst_65 : f32 to vector<2x128xf32>
    %201 = arith.addf %200, %199 : vector<2x128xf32>
    %202 = arith.divf %200, %201 : vector<2x128xf32>
    %203 = arith.mulf %194, %172 : vector<2x128xf32>
    %204 = arith.mulf %188, %196 : vector<2x128xf32>
    %205 = arith.addf %203, %204 : vector<2x128xf32>
    %206 = math.tanh %205 : vector<2x128xf32>
    %207 = arith.mulf %202, %206 : vector<2x128xf32>
    %208 = arith.index_cast %177 : i32 to index
    %c0_66 = arith.constant 0 : index
    %209 = vector.load %arg5[%208, %c0_66] : memref<16x128xf32, #tpu.memory_space<vmem>>, vector<2x128xf32>
    tpu.vector_store %arg5[%208, %c0_66], %207 {strides = array<i32>} : memref<16x128xf32, #tpu.memory_space<vmem>>, vector<2x128xf32>,
    %c6_i32 = arith.constant 6 : i32
    %c2_i32_67 = arith.constant 2 : i32
    %210 = arith.muli %c6_i32, %c2_i32_67 : i32
    %211 = arith.index_cast %210 : i32 to index
    %c0_68 = arith.constant 0 : index
    %212 = vector.load %arg10[%211, %c0_68] : memref<16x512xf32, #tpu.memory_space<vmem>>, vector<2x512xf32>
    %c0_69 = arith.constant 0 : index
    %c0_70 = arith.constant 0 : index
    %213 = vector.load %arg3[%c0_69, %c0_70] : memref<128x512xf32, #tpu.memory_space<vmem>>, vector<128x512xf32>
    %cst_71 = arith.constant dense<0.000000e+00> : vector<2x512xf32>
    %214 = tpu.matmul %207, %213, %cst_71 {dimension_numbers = #tpu.dot_dimension_numbers<[1], [0], [0], [1], [0, 0, 1, 1], [], []>} : vector<2x128xf32>, vector<128x512xf32>, vector<2x512xf32> -> vector<2x512xf32>
    %215 = arith.addf %212, %214 : vector<2x512xf32>
    %216 = vector.extract_strided_slice %215 {offsets = [0, 0], sizes = [2, 128], strides = [1, 1]} : vector<2x512xf32> to vector<2x128xf32>
    %217 = arith.negf %216 : vector<2x128xf32>
    %218 = math.exp %217 : vector<2x128xf32>
    %cst_72 = arith.constant 1.000000e+00 : f32
    %219 = vector.broadcast %cst_72 : f32 to vector<2x128xf32>
    %220 = arith.addf %219, %218 : vector<2x128xf32>
    %221 = arith.divf %219, %220 : vector<2x128xf32>
    %222 = vector.extract_strided_slice %215 {offsets = [0, 128], sizes = [2, 128], strides = [1, 1]} : vector<2x512xf32> to vector<2x128xf32>
    %223 = arith.negf %222 : vector<2x128xf32>
    %224 = math.exp %223 : vector<2x128xf32>
    %cst_73 = arith.constant 1.000000e+00 : f32
    %225 = vector.broadcast %cst_73 : f32 to vector<2x128xf32>
    %226 = arith.addf %225, %224 : vector<2x128xf32>
    %227 = arith.divf %225, %226 : vector<2x128xf32>
    %228 = vector.extract_strided_slice %215 {offsets = [0, 256], sizes = [2, 128], strides = [1, 1]} : vector<2x512xf32> to vector<2x128xf32>
    %229 = math.tanh %228 : vector<2x128xf32>
    %230 = vector.extract_strided_slice %215 {offsets = [0, 384], sizes = [2, 128], strides = [1, 1]} : vector<2x512xf32> to vector<2x128xf32>
    %231 = arith.negf %230 : vector<2x128xf32>
    %232 = math.exp %231 : vector<2x128xf32>
    %cst_74 = arith.constant 1.000000e+00 : f32
    %233 = vector.broadcast %cst_74 : f32 to vector<2x128xf32>
    %234 = arith.addf %233, %232 : vector<2x128xf32>
    %235 = arith.divf %233, %234 : vector<2x128xf32>
    %236 = arith.mulf %227, %205 : vector<2x128xf32>
    %237 = arith.mulf %221, %229 : vector<2x128xf32>
    %238 = arith.addf %236, %237 : vector<2x128xf32>
    %239 = math.tanh %238 : vector<2x128xf32>
    %240 = arith.mulf %235, %239 : vector<2x128xf32>
    %241 = arith.index_cast %210 : i32 to index
    %c0_75 = arith.constant 0 : index
    %242 = vector.load %arg5[%241, %c0_75] : memref<16x128xf32, #tpu.memory_space<vmem>>, vector<2x128xf32>
    tpu.vector_store %arg5[%241, %c0_75], %240 {strides = array<i32>} : memref<16x128xf32, #tpu.memory_space<vmem>>, vector<2x128xf32>,
    %c7_i32 = arith.constant 7 : i32
    %c2_i32_76 = arith.constant 2 : i32
    %243 = arith.muli %c7_i32, %c2_i32_76 : i32
    %244 = arith.index_cast %243 : i32 to index
    %c0_77 = arith.constant 0 : index
    %245 = vector.load %arg10[%244, %c0_77] : memref<16x512xf32, #tpu.memory_space<vmem>>, vector<2x512xf32>
    %c0_78 = arith.constant 0 : index
    %c0_79 = arith.constant 0 : index
    %246 = vector.load %arg3[%c0_78, %c0_79] : memref<128x512xf32, #tpu.memory_space<vmem>>, vector<128x512xf32>
    %cst_80 = arith.constant dense<0.000000e+00> : vector<2x512xf32>
    %247 = tpu.matmul %240, %246, %cst_80 {dimension_numbers = #tpu.dot_dimension_numbers<[1], [0], [0], [1], [0, 0, 1, 1], [], []>} : vector<2x128xf32>, vector<128x512xf32>, vector<2x512xf32> -> vector<2x512xf32>
    %248 = arith.addf %245, %247 : vector<2x512xf32>
    %249 = vector.extract_strided_slice %248 {offsets = [0, 0], sizes = [2, 128], strides = [1, 1]} : vector<2x512xf32> to vector<2x128xf32>
    %250 = arith.negf %249 : vector<2x128xf32>
    %251 = math.exp %250 : vector<2x128xf32>
    %cst_81 = arith.constant 1.000000e+00 : f32
    %252 = vector.broadcast %cst_81 : f32 to vector<2x128xf32>
    %253 = arith.addf %252, %251 : vector<2x128xf32>
    %254 = arith.divf %252, %253 : vector<2x128xf32>
    %255 = vector.extract_strided_slice %248 {offsets = [0, 128], sizes = [2, 128], strides = [1, 1]} : vector<2x512xf32> to vector<2x128xf32>
    %256 = arith.negf %255 : vector<2x128xf32>
    %257 = math.exp %256 : vector<2x128xf32>
    %cst_82 = arith.constant 1.000000e+00 : f32
    %258 = vector.broadcast %cst_82 : f32 to vector<2x128xf32>
    %259 = arith.addf %258, %257 : vector<2x128xf32>
    %260 = arith.divf %258, %259 : vector<2x128xf32>
    %261 = vector.extract_strided_slice %248 {offsets = [0, 256], sizes = [2, 128], strides = [1, 1]} : vector<2x512xf32> to vector<2x128xf32>
    %262 = math.tanh %261 : vector<2x128xf32>
    %263 = vector.extract_strided_slice %248 {offsets = [0, 384], sizes = [2, 128], strides = [1, 1]} : vector<2x512xf32> to vector<2x128xf32>
    %264 = arith.negf %263 : vector<2x128xf32>
    %265 = math.exp %264 : vector<2x128xf32>
    %cst_83 = arith.constant 1.000000e+00 : f32
    %266 = vector.broadcast %cst_83 : f32 to vector<2x128xf32>
    %267 = arith.addf %266, %265 : vector<2x128xf32>
    %268 = arith.divf %266, %267 : vector<2x128xf32>
    %269 = arith.mulf %260, %238 : vector<2x128xf32>
    %270 = arith.mulf %254, %262 : vector<2x128xf32>
    %271 = arith.addf %269, %270 : vector<2x128xf32>
    %272 = math.tanh %271 : vector<2x128xf32>
    %273 = arith.mulf %268, %272 : vector<2x128xf32>
    %274 = arith.index_cast %243 : i32 to index
    %c0_84 = arith.constant 0 : index
    %275 = vector.load %arg5[%274, %c0_84] : memref<16x128xf32, #tpu.memory_space<vmem>>, vector<2x128xf32>
    tpu.vector_store %arg5[%274, %c0_84], %273 {strides = array<i32>} : memref<16x128xf32, #tpu.memory_space<vmem>>, vector<2x128xf32>,
    %c8_i32 = arith.constant 8 : i32
    %c0_85 = arith.constant 0 : index
    %c0_86 = arith.constant 0 : index
    %276 = vector.load %arg8[%c0_85, %c0_86] : memref<2x128xf32, #tpu.memory_space<vmem>>, vector<2x128xf32>
    tpu.vector_store %arg8[%c0_85, %c0_86], %273 {strides = array<i32>} : memref<2x128xf32, #tpu.memory_space<vmem>>, vector<2x128xf32>,
    %c0_87 = arith.constant 0 : index
    %c0_88 = arith.constant 0 : index
    %277 = vector.load %arg9[%c0_87, %c0_88] : memref<2x128xf32, #tpu.memory_space<vmem>>, vector<2x128xf32>
    tpu.vector_store %arg9[%c0_87, %c0_88], %271 {strides = array<i32>} : memref<2x128xf32, #tpu.memory_space<vmem>>, vector<2x128xf32>,
    %c0_i32_89 = arith.constant 0 : i32
    %278 = arith.cmpi eq, %arg0, %c0_i32_89 : i32
    %279 = arith.extui %278 : i1 to i32
    %c0_i32_90 = arith.constant 0 : i32
    %280 = arith.cmpi ne, %279, %c0_i32_90 : i32
    scf.if %280 {
      %c0_91 = arith.constant 0 : index
      %c0_92 = arith.constant 0 : index
      %281 = vector.load %arg6[%c0_91, %c0_92] : memref<2x128xf32, #tpu.memory_space<vmem>>, vector<2x128xf32>
      tpu.vector_store %arg6[%c0_91, %c0_92], %273 {strides = array<i32>} : memref<2x128xf32, #tpu.memory_space<vmem>>, vector<2x128xf32>,
      %c0_93 = arith.constant 0 : index
      %c0_94 = arith.constant 0 : index
      %282 = vector.load %arg7[%c0_93, %c0_94] : memref<2x128xf32, #tpu.memory_space<vmem>>, vector<2x128xf32>
      tpu.vector_store %arg7[%c0_93, %c0_94], %271 {strides = array<i32>} : memref<2x128xf32, #tpu.memory_space<vmem>>, vector<2x128xf32>,
    } else {
    }
    return
  }
  func.func @transform_0(%arg0: i32) -> (i32, i32) {
    %c0_i32 = arith.constant 0 : i32
    %c0_i32_0 = arith.constant 0 : i32
    return %arg0, %c0_i32 : i32, i32
  }
  func.func @transform_1(%arg0: i32) -> (i32, i32) {
    %c0_i32 = arith.constant 0 : i32
    %c0_i32_0 = arith.constant 0 : i32
    %c0_i32_1 = arith.constant 0 : i32
    return %c0_i32, %c0_i32_0 : i32, i32
  }
  func.func @transform_2(%arg0: i32) -> (i32, i32) {
    %c0_i32 = arith.constant 0 : i32
    %c0_i32_0 = arith.constant 0 : i32
    %c0_i32_1 = arith.constant 0 : i32
    return %c0_i32, %c0_i32_0 : i32, i32
  }
  func.func @transform_3(%arg0: i32) -> (i32, i32) {
    %c0_i32 = arith.constant 0 : i32
    %c0_i32_0 = arith.constant 0 : i32
    %c0_i32_1 = arith.constant 0 : i32
    return %c0_i32, %c0_i32_0 : i32, i32
  }
  func.func @transform_4(%arg0: i32) -> (i32, i32) {
    %c0_i32 = arith.constant 0 : i32
    %c0_i32_0 = arith.constant 0 : i32
    return %arg0, %c0_i32 : i32, i32
  }
  func.func @transform_5(%arg0: i32) -> (i32, i32) {
    %c0_i32 = arith.constant 0 : i32
    %c0_i32_0 = arith.constant 0 : i32
    %c0_i32_1 = arith.constant 0 : i32
    return %c0_i32, %c0_i32_0 : i32, i32
  }
  func.func @transform_6(%arg0: i32) -> (i32, i32) {
    %c0_i32 = arith.constant 0 : i32
    %c0_i32_0 = arith.constant 0 : i32
    %c0_i32_1 = arith.constant 0 : i32
    return %c0_i32, %c0_i32_0 : i32, i32
  }
}

module attributes {stable_mosaic.version = 11 : i64} {
  func.func @lstm_chunk_kernel(%arg0: i32, %arg1: memref<16x128xf32, #tpu.memory_space<vmem>>, %arg2: memref<128x512xf32, #tpu.memory_space<vmem>>, %arg3: memref<128x512xf32, #tpu.memory_space<vmem>>, %arg4: memref<1x512xf32, #tpu.memory_space<vmem>>, %arg5: memref<16x128xf32, #tpu.memory_space<vmem>>, %arg6: memref<2x128xf32, #tpu.memory_space<vmem>>, %arg7: memref<2x128xf32, #tpu.memory_space<vmem>>, %arg8: memref<2x128xf32, #tpu.memory_space<vmem>>, %arg9: memref<2x128xf32, #tpu.memory_space<vmem>>, %arg10: memref<16x512xf32, #tpu.memory_space<vmem>>) attributes {dimension_semantics = [#tpu.dimension_semantics<arbitrary>], iteration_bounds = array<i64: 1>, scalar_prefetch = 0 : i64, scratch_operands = 3 : i64, tpu.core_type = #tpu.core_type<tc>, window_params = [{transform_indices = @transform_0, window_bounds = array<i64: 16, 128>}, {pipeline_mode = #tpu.pipeline_mode<synchronous>, transform_indices = @transform_1, window_bounds = array<i64: 128, 512>}, {pipeline_mode = #tpu.pipeline_mode<synchronous>, transform_indices = @transform_2, window_bounds = array<i64: 128, 512>}, {pipeline_mode = #tpu.pipeline_mode<synchronous>, transform_indices = @transform_3, window_bounds = array<i64: 1, 512>}, {transform_indices = @transform_4, window_bounds = array<i64: 16, 128>}, {pipeline_mode = #tpu.pipeline_mode<synchronous>, transform_indices = @transform_5, window_bounds = array<i64: 2, 128>}, {pipeline_mode = #tpu.pipeline_mode<synchronous>, transform_indices = @transform_6, window_bounds = array<i64: 2, 128>}]} {
    %c0_i32 = arith.constant 0 : i32
    %0 = arith.cmpi eq, %arg0, %c0_i32 : i32
    %1 = arith.extui %0 : i1 to i32
    %c0_i32_0 = arith.constant 0 : i32
    %2 = arith.cmpi ne, %1, %c0_i32_0 : i32
    scf.if %2 {
      %cst_91 = arith.constant 0.000000e+00 : f32
      %281 = vector.broadcast %cst_91 : f32 to vector<2x128xf32>
      %c0_92 = arith.constant 0 : index
      %c0_93 = arith.constant 0 : index
      %282 = vector.load %arg8[%c0_92, %c0_93] : memref<2x128xf32, #tpu.memory_space<vmem>>, vector<2x128xf32>
      tpu.vector_store %arg8[%c0_92, %c0_93], %281 {strides = array<i32>} : memref<2x128xf32, #tpu.memory_space<vmem>>, vector<2x128xf32>,
      %cst_94 = arith.constant 0.000000e+00 : f32
      %283 = vector.broadcast %cst_94 : f32 to vector<2x128xf32>
      %c0_95 = arith.constant 0 : index
      %c0_96 = arith.constant 0 : index
      %284 = vector.load %arg9[%c0_95, %c0_96] : memref<2x128xf32, #tpu.memory_space<vmem>>, vector<2x128xf32>
      tpu.vector_store %arg9[%c0_95, %c0_96], %283 {strides = array<i32>} : memref<2x128xf32, #tpu.memory_space<vmem>>, vector<2x128xf32>,
    } else {
    }
    %c0 = arith.constant 0 : index
    %c0_1 = arith.constant 0 : index
    %3 = vector.load %arg1[%c0, %c0_1] : memref<16x128xf32, #tpu.memory_space<vmem>>, vector<16x128xf32>
    %c0_2 = arith.constant 0 : index
    %c0_3 = arith.constant 0 : index
    %4 = vector.load %arg2[%c0_2, %c0_3] : memref<128x512xf32, #tpu.memory_space<vmem>>, vector<128x512xf32>
    %cst = arith.constant dense<0.000000e+00> : vector<16x512xf32>
    %5 = tpu.matmul %3, %4, %cst {dimension_numbers = #tpu.dot_dimension_numbers<[1], [0], [0], [1], [0, 0, 1, 1], [], []>} : vector<16x128xf32>, vector<128x512xf32>, vector<16x512xf32> -> vector<16x512xf32>
    %c0_4 = arith.constant 0 : index
    %c0_5 = arith.constant 0 : index
    %6 = vector.load %arg4[%c0_4, %c0_5] : memref<1x512xf32, #tpu.memory_space<vmem>>, vector<1x512xf32>
    %7 = vector.broadcast %6 : vector<1x512xf32> to vector<16x512xf32>
    %8 = arith.addf %5, %7 : vector<16x512xf32>
    %c0_6 = arith.constant 0 : index
    %c0_7 = arith.constant 0 : index
    %9 = vector.load %arg10[%c0_6, %c0_7] : memref<16x512xf32, #tpu.memory_space<vmem>>, vector<16x512xf32>
    tpu.vector_store %arg10[%c0_6, %c0_7], %8 {strides = array<i32>} : memref<16x512xf32, #tpu.memory_space<vmem>>, vector<16x512xf32>,
    %c0_8 = arith.constant 0 : index
    %c0_9 = arith.constant 0 : index
    %10 = vector.load %arg8[%c0_8, %c0_9] : memref<2x128xf32, #tpu.memory_space<vmem>>, vector<2x128xf32>
    %c0_10 = arith.constant 0 : index
    %c0_11 = arith.constant 0 : index
    %11 = vector.load %arg9[%c0_10, %c0_11] : memref<2x128xf32, #tpu.memory_space<vmem>>, vector<2x128xf32>
    %c0_i32_12 = arith.constant 0 : i32
    %c2_i32 = arith.constant 2 : i32
    %12 = arith.muli %c0_i32_12, %c2_i32 : i32
    %13 = arith.index_cast %12 : i32 to index
    %c0_13 = arith.constant 0 : index
    %14 = vector.load %arg10[%13, %c0_13] : memref<16x512xf32, #tpu.memory_space<vmem>>, vector<2x512xf32>
    %c0_14 = arith.constant 0 : index
    %c0_15 = arith.constant 0 : index
    %15 = vector.load %arg3[%c0_14, %c0_15] : memref<128x512xf32, #tpu.memory_space<vmem>>, vector<128x512xf32>
    %cst_16 = arith.constant dense<0.000000e+00> : vector<2x512xf32>
    %16 = tpu.matmul %10, %15, %cst_16 {dimension_numbers = #tpu.dot_dimension_numbers<[1], [0], [0], [1], [0, 0, 1, 1], [], []>} : vector<2x128xf32>, vector<128x512xf32>, vector<2x512xf32> -> vector<2x512xf32>
    %17 = arith.addf %14, %16 : vector<2x512xf32>
    %18 = vector.extract_strided_slice %17 {offsets = [0, 0], sizes = [2, 128], strides = [1, 1]} : vector<2x512xf32> to vector<2x128xf32>
    %19 = arith.negf %18 : vector<2x128xf32>
    %20 = math.exp %19 : vector<2x128xf32>
    %cst_17 = arith.constant 1.000000e+00 : f32
    %21 = vector.broadcast %cst_17 : f32 to vector<2x128xf32>
    %22 = arith.addf %21, %20 : vector<2x128xf32>
    %23 = arith.divf %21, %22 : vector<2x128xf32>
    %24 = vector.extract_strided_slice %17 {offsets = [0, 128], sizes = [2, 128], strides = [1, 1]} : vector<2x512xf32> to vector<2x128xf32>
    %25 = arith.negf %24 : vector<2x128xf32>
    %26 = math.exp %25 : vector<2x128xf32>
    %cst_18 = arith.constant 1.000000e+00 : f32
    %27 = vector.broadcast %cst_18 : f32 to vector<2x128xf32>
    %28 = arith.addf %27, %26 : vector<2x128xf32>
    %29 = arith.divf %27, %28 : vector<2x128xf32>
    %30 = vector.extract_strided_slice %17 {offsets = [0, 256], sizes = [2, 128], strides = [1, 1]} : vector<2x512xf32> to vector<2x128xf32>
    %31 = math.tanh %30 : vector<2x128xf32>
    %32 = vector.extract_strided_slice %17 {offsets = [0, 384], sizes = [2, 128], strides = [1, 1]} : vector<2x512xf32> to vector<2x128xf32>
    %33 = arith.negf %32 : vector<2x128xf32>
    %34 = math.exp %33 : vector<2x128xf32>
    %cst_19 = arith.constant 1.000000e+00 : f32
    %35 = vector.broadcast %cst_19 : f32 to vector<2x128xf32>
    %36 = arith.addf %35, %34 : vector<2x128xf32>
    %37 = arith.divf %35, %36 : vector<2x128xf32>
    %38 = arith.mulf %29, %11 : vector<2x128xf32>
    %39 = arith.mulf %23, %31 : vector<2x128xf32>
    %40 = arith.addf %38, %39 : vector<2x128xf32>
    %41 = math.tanh %40 : vector<2x128xf32>
    %42 = arith.mulf %37, %41 : vector<2x128xf32>
    %43 = arith.index_cast %12 : i32 to index
    %c0_20 = arith.constant 0 : index
    %44 = vector.load %arg5[%43, %c0_20] : memref<16x128xf32, #tpu.memory_space<vmem>>, vector<2x128xf32>
    tpu.vector_store %arg5[%43, %c0_20], %42 {strides = array<i32>} : memref<16x128xf32, #tpu.memory_space<vmem>>, vector<2x128xf32>,
    %c1_i32 = arith.constant 1 : i32
    %c2_i32_21 = arith.constant 2 : i32
    %45 = arith.muli %c1_i32, %c2_i32_21 : i32
    %46 = arith.index_cast %45 : i32 to index
    %c0_22 = arith.constant 0 : index
    %47 = vector.load %arg10[%46, %c0_22] : memref<16x512xf32, #tpu.memory_space<vmem>>, vector<2x512xf32>
    %c0_23 = arith.constant 0 : index
    %c0_24 = arith.constant 0 : index
    %48 = vector.load %arg3[%c0_23, %c0_24] : memref<128x512xf32, #tpu.memory_space<vmem>>, vector<128x512xf32>
    %cst_25 = arith.constant dense<0.000000e+00> : vector<2x512xf32>
    %49 = tpu.matmul %42, %48, %cst_25 {dimension_numbers = #tpu.dot_dimension_numbers<[1], [0], [0], [1], [0, 0, 1, 1], [], []>} : vector<2x128xf32>, vector<128x512xf32>, vector<2x512xf32> -> vector<2x512xf32>
    %50 = arith.addf %47, %49 : vector<2x512xf32>
    %51 = vector.extract_strided_slice %50 {offsets = [0, 0], sizes = [2, 128], strides = [1, 1]} : vector<2x512xf32> to vector<2x128xf32>
    %52 = arith.negf %51 : vector<2x128xf32>
    %53 = math.exp %52 : vector<2x128xf32>
    %cst_26 = arith.constant 1.000000e+00 : f32
    %54 = vector.broadcast %cst_26 : f32 to vector<2x128xf32>
    %55 = arith.addf %54, %53 : vector<2x128xf32>
    %56 = arith.divf %54, %55 : vector<2x128xf32>
    %57 = vector.extract_strided_slice %50 {offsets = [0, 128], sizes = [2, 128], strides = [1, 1]} : vector<2x512xf32> to vector<2x128xf32>
    %58 = arith.negf %57 : vector<2x128xf32>
    %59 = math.exp %58 : vector<2x128xf32>
    %cst_27 = arith.constant 1.000000e+00 : f32
    %60 = vector.broadcast %cst_27 : f32 to vector<2x128xf32>
    %61 = arith.addf %60, %59 : vector<2x128xf32>
    %62 = arith.divf %60, %61 : vector<2x128xf32>
    %63 = vector.extract_strided_slice %50 {offsets = [0, 256], sizes = [2, 128], strides = [1, 1]} : vector<2x512xf32> to vector<2x128xf32>
    %64 = math.tanh %63 : vector<2x128xf32>
    %65 = vector.extract_strided_slice %50 {offsets = [0, 384], sizes = [2, 128], strides = [1, 1]} : vector<2x512xf32> to vector<2x128xf32>
    %66 = arith.negf %65 : vector<2x128xf32>
    %67 = math.exp %66 : vector<2x128xf32>
    %cst_28 = arith.constant 1.000000e+00 : f32
    %68 = vector.broadcast %cst_28 : f32 to vector<2x128xf32>
    %69 = arith.addf %68, %67 : vector<2x128xf32>
    %70 = arith.divf %68, %69 : vector<2x128xf32>
    %71 = arith.mulf %62, %40 : vector<2x128xf32>
    %72 = arith.mulf %56, %64 : vector<2x128xf32>
    %73 = arith.addf %71, %72 : vector<2x128xf32>
    %74 = math.tanh %73 : vector<2x128xf32>
    %75 = arith.mulf %70, %74 : vector<2x128xf32>
    %76 = arith.index_cast %45 : i32 to index
    %c0_29 = arith.constant 0 : index
    %77 = vector.load %arg5[%76, %c0_29] : memref<16x128xf32, #tpu.memory_space<vmem>>, vector<2x128xf32>
    tpu.vector_store %arg5[%76, %c0_29], %75 {strides = array<i32>} : memref<16x128xf32, #tpu.memory_space<vmem>>, vector<2x128xf32>,
    %c2_i32_30 = arith.constant 2 : i32
    %c2_i32_31 = arith.constant 2 : i32
    %78 = arith.muli %c2_i32_30, %c2_i32_31 : i32
    %79 = arith.index_cast %78 : i32 to index
    %c0_32 = arith.constant 0 : index
    %80 = vector.load %arg10[%79, %c0_32] : memref<16x512xf32, #tpu.memory_space<vmem>>, vector<2x512xf32>
    %c0_33 = arith.constant 0 : index
    %c0_34 = arith.constant 0 : index
    %81 = vector.load %arg3[%c0_33, %c0_34] : memref<128x512xf32, #tpu.memory_space<vmem>>, vector<128x512xf32>
    %cst_35 = arith.constant dense<0.000000e+00> : vector<2x512xf32>
    %82 = tpu.matmul %75, %81, %cst_35 {dimension_numbers = #tpu.dot_dimension_numbers<[1], [0], [0], [1], [0, 0, 1, 1], [], []>} : vector<2x128xf32>, vector<128x512xf32>, vector<2x512xf32> -> vector<2x512xf32>
    %83 = arith.addf %80, %82 : vector<2x512xf32>
    %84 = vector.extract_strided_slice %83 {offsets = [0, 0], sizes = [2, 128], strides = [1, 1]} : vector<2x512xf32> to vector<2x128xf32>
    %85 = arith.negf %84 : vector<2x128xf32>
    %86 = math.exp %85 : vector<2x128xf32>
    %cst_36 = arith.constant 1.000000e+00 : f32
    %87 = vector.broadcast %cst_36 : f32 to vector<2x128xf32>
    %88 = arith.addf %87, %86 : vector<2x128xf32>
    %89 = arith.divf %87, %88 : vector<2x128xf32>
    %90 = vector.extract_strided_slice %83 {offsets = [0, 128], sizes = [2, 128], strides = [1, 1]} : vector<2x512xf32> to vector<2x128xf32>
    %91 = arith.negf %90 : vector<2x128xf32>
    %92 = math.exp %91 : vector<2x128xf32>
    %cst_37 = arith.constant 1.000000e+00 : f32
    %93 = vector.broadcast %cst_37 : f32 to vector<2x128xf32>
    %94 = arith.addf %93, %92 : vector<2x128xf32>
    %95 = arith.divf %93, %94 : vector<2x128xf32>
    %96 = vector.extract_strided_slice %83 {offsets = [0, 256], sizes = [2, 128], strides = [1, 1]} : vector<2x512xf32> to vector<2x128xf32>
    %97 = math.tanh %96 : vector<2x128xf32>
    %98 = vector.extract_strided_slice %83 {offsets = [0, 384], sizes = [2, 128], strides = [1, 1]} : vector<2x512xf32> to vector<2x128xf32>
    %99 = arith.negf %98 : vector<2x128xf32>
    %100 = math.exp %99 : vector<2x128xf32>
    %cst_38 = arith.constant 1.000000e+00 : f32
    %101 = vector.broadcast %cst_38 : f32 to vector<2x128xf32>
    %102 = arith.addf %101, %100 : vector<2x128xf32>
    %103 = arith.divf %101, %102 : vector<2x128xf32>
    %104 = arith.mulf %95, %73 : vector<2x128xf32>
    %105 = arith.mulf %89, %97 : vector<2x128xf32>
    %106 = arith.addf %104, %105 : vector<2x128xf32>
    %107 = math.tanh %106 : vector<2x128xf32>
    %108 = arith.mulf %103, %107 : vector<2x128xf32>
    %109 = arith.index_cast %78 : i32 to index
    %c0_39 = arith.constant 0 : index
    %110 = vector.load %arg5[%109, %c0_39] : memref<16x128xf32, #tpu.memory_space<vmem>>, vector<2x128xf32>
    tpu.vector_store %arg5[%109, %c0_39], %108 {strides = array<i32>} : memref<16x128xf32, #tpu.memory_space<vmem>>, vector<2x128xf32>,
    %c3_i32 = arith.constant 3 : i32
    %c2_i32_40 = arith.constant 2 : i32
    %111 = arith.muli %c3_i32, %c2_i32_40 : i32
    %112 = arith.index_cast %111 : i32 to index
    %c0_41 = arith.constant 0 : index
    %113 = vector.load %arg10[%112, %c0_41] : memref<16x512xf32, #tpu.memory_space<vmem>>, vector<2x512xf32>
    %c0_42 = arith.constant 0 : index
    %c0_43 = arith.constant 0 : index
    %114 = vector.load %arg3[%c0_42, %c0_43] : memref<128x512xf32, #tpu.memory_space<vmem>>, vector<128x512xf32>
    %cst_44 = arith.constant dense<0.000000e+00> : vector<2x512xf32>
    %115 = tpu.matmul %108, %114, %cst_44 {dimension_numbers = #tpu.dot_dimension_numbers<[1], [0], [0], [1], [0, 0, 1, 1], [], []>} : vector<2x128xf32>, vector<128x512xf32>, vector<2x512xf32> -> vector<2x512xf32>
    %116 = arith.addf %113, %115 : vector<2x512xf32>
    %117 = vector.extract_strided_slice %116 {offsets = [0, 0], sizes = [2, 128], strides = [1, 1]} : vector<2x512xf32> to vector<2x128xf32>
    %118 = arith.negf %117 : vector<2x128xf32>
    %119 = math.exp %118 : vector<2x128xf32>
    %cst_45 = arith.constant 1.000000e+00 : f32
    %120 = vector.broadcast %cst_45 : f32 to vector<2x128xf32>
    %121 = arith.addf %120, %119 : vector<2x128xf32>
    %122 = arith.divf %120, %121 : vector<2x128xf32>
    %123 = vector.extract_strided_slice %116 {offsets = [0, 128], sizes = [2, 128], strides = [1, 1]} : vector<2x512xf32> to vector<2x128xf32>
    %124 = arith.negf %123 : vector<2x128xf32>
    %125 = math.exp %124 : vector<2x128xf32>
    %cst_46 = arith.constant 1.000000e+00 : f32
    %126 = vector.broadcast %cst_46 : f32 to vector<2x128xf32>
    %127 = arith.addf %126, %125 : vector<2x128xf32>
    %128 = arith.divf %126, %127 : vector<2x128xf32>
    %129 = vector.extract_strided_slice %116 {offsets = [0, 256], sizes = [2, 128], strides = [1, 1]} : vector<2x512xf32> to vector<2x128xf32>
    %130 = math.tanh %129 : vector<2x128xf32>
    %131 = vector.extract_strided_slice %116 {offsets = [0, 384], sizes = [2, 128], strides = [1, 1]} : vector<2x512xf32> to vector<2x128xf32>
    %132 = arith.negf %131 : vector<2x128xf32>
    %133 = math.exp %132 : vector<2x128xf32>
    %cst_47 = arith.constant 1.000000e+00 : f32
    %134 = vector.broadcast %cst_47 : f32 to vector<2x128xf32>
    %135 = arith.addf %134, %133 : vector<2x128xf32>
    %136 = arith.divf %134, %135 : vector<2x128xf32>
    %137 = arith.mulf %128, %106 : vector<2x128xf32>
    %138 = arith.mulf %122, %130 : vector<2x128xf32>
    %139 = arith.addf %137, %138 : vector<2x128xf32>
    %140 = math.tanh %139 : vector<2x128xf32>
    %141 = arith.mulf %136, %140 : vector<2x128xf32>
    %142 = arith.index_cast %111 : i32 to index
    %c0_48 = arith.constant 0 : index
    %143 = vector.load %arg5[%142, %c0_48] : memref<16x128xf32, #tpu.memory_space<vmem>>, vector<2x128xf32>
    tpu.vector_store %arg5[%142, %c0_48], %141 {strides = array<i32>} : memref<16x128xf32, #tpu.memory_space<vmem>>, vector<2x128xf32>,
    %c4_i32 = arith.constant 4 : i32
    %c2_i32_49 = arith.constant 2 : i32
    %144 = arith.muli %c4_i32, %c2_i32_49 : i32
    %145 = arith.index_cast %144 : i32 to index
    %c0_50 = arith.constant 0 : index
    %146 = vector.load %arg10[%145, %c0_50] : memref<16x512xf32, #tpu.memory_space<vmem>>, vector<2x512xf32>
    %c0_51 = arith.constant 0 : index
    %c0_52 = arith.constant 0 : index
    %147 = vector.load %arg3[%c0_51, %c0_52] : memref<128x512xf32, #tpu.memory_space<vmem>>, vector<128x512xf32>
    %cst_53 = arith.constant dense<0.000000e+00> : vector<2x512xf32>
    %148 = tpu.matmul %141, %147, %cst_53 {dimension_numbers = #tpu.dot_dimension_numbers<[1], [0], [0], [1], [0, 0, 1, 1], [], []>} : vector<2x128xf32>, vector<128x512xf32>, vector<2x512xf32> -> vector<2x512xf32>
    %149 = arith.addf %146, %148 : vector<2x512xf32>
    %150 = vector.extract_strided_slice %149 {offsets = [0, 0], sizes = [2, 128], strides = [1, 1]} : vector<2x512xf32> to vector<2x128xf32>
    %151 = arith.negf %150 : vector<2x128xf32>
    %152 = math.exp %151 : vector<2x128xf32>
    %cst_54 = arith.constant 1.000000e+00 : f32
    %153 = vector.broadcast %cst_54 : f32 to vector<2x128xf32>
    %154 = arith.addf %153, %152 : vector<2x128xf32>
    %155 = arith.divf %153, %154 : vector<2x128xf32>
    %156 = vector.extract_strided_slice %149 {offsets = [0, 128], sizes = [2, 128], strides = [1, 1]} : vector<2x512xf32> to vector<2x128xf32>
    %157 = arith.negf %156 : vector<2x128xf32>
    %158 = math.exp %157 : vector<2x128xf32>
    %cst_55 = arith.constant 1.000000e+00 : f32
    %159 = vector.broadcast %cst_55 : f32 to vector<2x128xf32>
    %160 = arith.addf %159, %158 : vector<2x128xf32>
    %161 = arith.divf %159, %160 : vector<2x128xf32>
    %162 = vector.extract_strided_slice %149 {offsets = [0, 256], sizes = [2, 128], strides = [1, 1]} : vector<2x512xf32> to vector<2x128xf32>
    %163 = math.tanh %162 : vector<2x128xf32>
    %164 = vector.extract_strided_slice %149 {offsets = [0, 384], sizes = [2, 128], strides = [1, 1]} : vector<2x512xf32> to vector<2x128xf32>
    %165 = arith.negf %164 : vector<2x128xf32>
    %166 = math.exp %165 : vector<2x128xf32>
    %cst_56 = arith.constant 1.000000e+00 : f32
    %167 = vector.broadcast %cst_56 : f32 to vector<2x128xf32>
    %168 = arith.addf %167, %166 : vector<2x128xf32>
    %169 = arith.divf %167, %168 : vector<2x128xf32>
    %170 = arith.mulf %161, %139 : vector<2x128xf32>
    %171 = arith.mulf %155, %163 : vector<2x128xf32>
    %172 = arith.addf %170, %171 : vector<2x128xf32>
    %173 = math.tanh %172 : vector<2x128xf32>
    %174 = arith.mulf %169, %173 : vector<2x128xf32>
    %175 = arith.index_cast %144 : i32 to index
    %c0_57 = arith.constant 0 : index
    %176 = vector.load %arg5[%175, %c0_57] : memref<16x128xf32, #tpu.memory_space<vmem>>, vector<2x128xf32>
    tpu.vector_store %arg5[%175, %c0_57], %174 {strides = array<i32>} : memref<16x128xf32, #tpu.memory_space<vmem>>, vector<2x128xf32>,
    %c5_i32 = arith.constant 5 : i32
    %c2_i32_58 = arith.constant 2 : i32
    %177 = arith.muli %c5_i32, %c2_i32_58 : i32
    %178 = arith.index_cast %177 : i32 to index
    %c0_59 = arith.constant 0 : index
    %179 = vector.load %arg10[%178, %c0_59] : memref<16x512xf32, #tpu.memory_space<vmem>>, vector<2x512xf32>
    %c0_60 = arith.constant 0 : index
    %c0_61 = arith.constant 0 : index
    %180 = vector.load %arg3[%c0_60, %c0_61] : memref<128x512xf32, #tpu.memory_space<vmem>>, vector<128x512xf32>
    %cst_62 = arith.constant dense<0.000000e+00> : vector<2x512xf32>
    %181 = tpu.matmul %174, %180, %cst_62 {dimension_numbers = #tpu.dot_dimension_numbers<[1], [0], [0], [1], [0, 0, 1, 1], [], []>} : vector<2x128xf32>, vector<128x512xf32>, vector<2x512xf32> -> vector<2x512xf32>
    %182 = arith.addf %179, %181 : vector<2x512xf32>
    %183 = vector.extract_strided_slice %182 {offsets = [0, 0], sizes = [2, 128], strides = [1, 1]} : vector<2x512xf32> to vector<2x128xf32>
    %184 = arith.negf %183 : vector<2x128xf32>
    %185 = math.exp %184 : vector<2x128xf32>
    %cst_63 = arith.constant 1.000000e+00 : f32
    %186 = vector.broadcast %cst_63 : f32 to vector<2x128xf32>
    %187 = arith.addf %186, %185 : vector<2x128xf32>
    %188 = arith.divf %186, %187 : vector<2x128xf32>
    %189 = vector.extract_strided_slice %182 {offsets = [0, 128], sizes = [2, 128], strides = [1, 1]} : vector<2x512xf32> to vector<2x128xf32>
    %190 = arith.negf %189 : vector<2x128xf32>
    %191 = math.exp %190 : vector<2x128xf32>
    %cst_64 = arith.constant 1.000000e+00 : f32
    %192 = vector.broadcast %cst_64 : f32 to vector<2x128xf32>
    %193 = arith.addf %192, %191 : vector<2x128xf32>
    %194 = arith.divf %192, %193 : vector<2x128xf32>
    %195 = vector.extract_strided_slice %182 {offsets = [0, 256], sizes = [2, 128], strides = [1, 1]} : vector<2x512xf32> to vector<2x128xf32>
    %196 = math.tanh %195 : vector<2x128xf32>
    %197 = vector.extract_strided_slice %182 {offsets = [0, 384], sizes = [2, 128], strides = [1, 1]} : vector<2x512xf32> to vector<2x128xf32>
    %198 = arith.negf %197 : vector<2x128xf32>
    %199 = math.exp %198 : vector<2x128xf32>
    %cst_65 = arith.constant 1.000000e+00 : f32
    %200 = vector.broadcast %cst_65 : f32 to vector<2x128xf32>
    %201 = arith.addf %200, %199 : vector<2x128xf32>
    %202 = arith.divf %200, %201 : vector<2x128xf32>
    %203 = arith.mulf %194, %172 : vector<2x128xf32>
    %204 = arith.mulf %188, %196 : vector<2x128xf32>
    %205 = arith.addf %203, %204 : vector<2x128xf32>
    %206 = math.tanh %205 : vector<2x128xf32>
    %207 = arith.mulf %202, %206 : vector<2x128xf32>
    %208 = arith.index_cast %177 : i32 to index
    %c0_66 = arith.constant 0 : index
    %209 = vector.load %arg5[%208, %c0_66] : memref<16x128xf32, #tpu.memory_space<vmem>>, vector<2x128xf32>
    tpu.vector_store %arg5[%208, %c0_66], %207 {strides = array<i32>} : memref<16x128xf32, #tpu.memory_space<vmem>>, vector<2x128xf32>,
    %c6_i32 = arith.constant 6 : i32
    %c2_i32_67 = arith.constant 2 : i32
    %210 = arith.muli %c6_i32, %c2_i32_67 : i32
    %211 = arith.index_cast %210 : i32 to index
    %c0_68 = arith.constant 0 : index
    %212 = vector.load %arg10[%211, %c0_68] : memref<16x512xf32, #tpu.memory_space<vmem>>, vector<2x512xf32>
    %c0_69 = arith.constant 0 : index
    %c0_70 = arith.constant 0 : index
    %213 = vector.load %arg3[%c0_69, %c0_70] : memref<128x512xf32, #tpu.memory_space<vmem>>, vector<128x512xf32>
    %cst_71 = arith.constant dense<0.000000e+00> : vector<2x512xf32>
    %214 = tpu.matmul %207, %213, %cst_71 {dimension_numbers = #tpu.dot_dimension_numbers<[1], [0], [0], [1], [0, 0, 1, 1], [], []>} : vector<2x128xf32>, vector<128x512xf32>, vector<2x512xf32> -> vector<2x512xf32>
    %215 = arith.addf %212, %214 : vector<2x512xf32>
    %216 = vector.extract_strided_slice %215 {offsets = [0, 0], sizes = [2, 128], strides = [1, 1]} : vector<2x512xf32> to vector<2x128xf32>
    %217 = arith.negf %216 : vector<2x128xf32>
    %218 = math.exp %217 : vector<2x128xf32>
    %cst_72 = arith.constant 1.000000e+00 : f32
    %219 = vector.broadcast %cst_72 : f32 to vector<2x128xf32>
    %220 = arith.addf %219, %218 : vector<2x128xf32>
    %221 = arith.divf %219, %220 : vector<2x128xf32>
    %222 = vector.extract_strided_slice %215 {offsets = [0, 128], sizes = [2, 128], strides = [1, 1]} : vector<2x512xf32> to vector<2x128xf32>
    %223 = arith.negf %222 : vector<2x128xf32>
    %224 = math.exp %223 : vector<2x128xf32>
    %cst_73 = arith.constant 1.000000e+00 : f32
    %225 = vector.broadcast %cst_73 : f32 to vector<2x128xf32>
    %226 = arith.addf %225, %224 : vector<2x128xf32>
    %227 = arith.divf %225, %226 : vector<2x128xf32>
    %228 = vector.extract_strided_slice %215 {offsets = [0, 256], sizes = [2, 128], strides = [1, 1]} : vector<2x512xf32> to vector<2x128xf32>
    %229 = math.tanh %228 : vector<2x128xf32>
    %230 = vector.extract_strided_slice %215 {offsets = [0, 384], sizes = [2, 128], strides = [1, 1]} : vector<2x512xf32> to vector<2x128xf32>
    %231 = arith.negf %230 : vector<2x128xf32>
    %232 = math.exp %231 : vector<2x128xf32>
    %cst_74 = arith.constant 1.000000e+00 : f32
    %233 = vector.broadcast %cst_74 : f32 to vector<2x128xf32>
    %234 = arith.addf %233, %232 : vector<2x128xf32>
    %235 = arith.divf %233, %234 : vector<2x128xf32>
    %236 = arith.mulf %227, %205 : vector<2x128xf32>
    %237 = arith.mulf %221, %229 : vector<2x128xf32>
    %238 = arith.addf %236, %237 : vector<2x128xf32>
    %239 = math.tanh %238 : vector<2x128xf32>
    %240 = arith.mulf %235, %239 : vector<2x128xf32>
    %241 = arith.index_cast %210 : i32 to index
    %c0_75 = arith.constant 0 : index
    %242 = vector.load %arg5[%241, %c0_75] : memref<16x128xf32, #tpu.memory_space<vmem>>, vector<2x128xf32>
    tpu.vector_store %arg5[%241, %c0_75], %240 {strides = array<i32>} : memref<16x128xf32, #tpu.memory_space<vmem>>, vector<2x128xf32>,
    %c7_i32 = arith.constant 7 : i32
    %c2_i32_76 = arith.constant 2 : i32
    %243 = arith.muli %c7_i32, %c2_i32_76 : i32
    %244 = arith.index_cast %243 : i32 to index
    %c0_77 = arith.constant 0 : index
    %245 = vector.load %arg10[%244, %c0_77] : memref<16x512xf32, #tpu.memory_space<vmem>>, vector<2x512xf32>
    %c0_78 = arith.constant 0 : index
    %c0_79 = arith.constant 0 : index
    %246 = vector.load %arg3[%c0_78, %c0_79] : memref<128x512xf32, #tpu.memory_space<vmem>>, vector<128x512xf32>
    %cst_80 = arith.constant dense<0.000000e+00> : vector<2x512xf32>
    %247 = tpu.matmul %240, %246, %cst_80 {dimension_numbers = #tpu.dot_dimension_numbers<[1], [0], [0], [1], [0, 0, 1, 1], [], []>} : vector<2x128xf32>, vector<128x512xf32>, vector<2x512xf32> -> vector<2x512xf32>
    %248 = arith.addf %245, %247 : vector<2x512xf32>
    %249 = vector.extract_strided_slice %248 {offsets = [0, 0], sizes = [2, 128], strides = [1, 1]} : vector<2x512xf32> to vector<2x128xf32>
    %250 = arith.negf %249 : vector<2x128xf32>
    %251 = math.exp %250 : vector<2x128xf32>
    %cst_81 = arith.constant 1.000000e+00 : f32
    %252 = vector.broadcast %cst_81 : f32 to vector<2x128xf32>
    %253 = arith.addf %252, %251 : vector<2x128xf32>
    %254 = arith.divf %252, %253 : vector<2x128xf32>
    %255 = vector.extract_strided_slice %248 {offsets = [0, 128], sizes = [2, 128], strides = [1, 1]} : vector<2x512xf32> to vector<2x128xf32>
    %256 = arith.negf %255 : vector<2x128xf32>
    %257 = math.exp %256 : vector<2x128xf32>
    %cst_82 = arith.constant 1.000000e+00 : f32
    %258 = vector.broadcast %cst_82 : f32 to vector<2x128xf32>
    %259 = arith.addf %258, %257 : vector<2x128xf32>
    %260 = arith.divf %258, %259 : vector<2x128xf32>
    %261 = vector.extract_strided_slice %248 {offsets = [0, 256], sizes = [2, 128], strides = [1, 1]} : vector<2x512xf32> to vector<2x128xf32>
    %262 = math.tanh %261 : vector<2x128xf32>
    %263 = vector.extract_strided_slice %248 {offsets = [0, 384], sizes = [2, 128], strides = [1, 1]} : vector<2x512xf32> to vector<2x128xf32>
    %264 = arith.negf %263 : vector<2x128xf32>
    %265 = math.exp %264 : vector<2x128xf32>
    %cst_83 = arith.constant 1.000000e+00 : f32
    %266 = vector.broadcast %cst_83 : f32 to vector<2x128xf32>
    %267 = arith.addf %266, %265 : vector<2x128xf32>
    %268 = arith.divf %266, %267 : vector<2x128xf32>
    %269 = arith.mulf %260, %238 : vector<2x128xf32>
    %270 = arith.mulf %254, %262 : vector<2x128xf32>
    %271 = arith.addf %269, %270 : vector<2x128xf32>
    %272 = math.tanh %271 : vector<2x128xf32>
    %273 = arith.mulf %268, %272 : vector<2x128xf32>
    %274 = arith.index_cast %243 : i32 to index
    %c0_84 = arith.constant 0 : index
    %275 = vector.load %arg5[%274, %c0_84] : memref<16x128xf32, #tpu.memory_space<vmem>>, vector<2x128xf32>
    tpu.vector_store %arg5[%274, %c0_84], %273 {strides = array<i32>} : memref<16x128xf32, #tpu.memory_space<vmem>>, vector<2x128xf32>,
    %c8_i32 = arith.constant 8 : i32
    %c0_85 = arith.constant 0 : index
    %c0_86 = arith.constant 0 : index
    %276 = vector.load %arg8[%c0_85, %c0_86] : memref<2x128xf32, #tpu.memory_space<vmem>>, vector<2x128xf32>
    tpu.vector_store %arg8[%c0_85, %c0_86], %273 {strides = array<i32>} : memref<2x128xf32, #tpu.memory_space<vmem>>, vector<2x128xf32>,
    %c0_87 = arith.constant 0 : index
    %c0_88 = arith.constant 0 : index
    %277 = vector.load %arg9[%c0_87, %c0_88] : memref<2x128xf32, #tpu.memory_space<vmem>>, vector<2x128xf32>
    tpu.vector_store %arg9[%c0_87, %c0_88], %271 {strides = array<i32>} : memref<2x128xf32, #tpu.memory_space<vmem>>, vector<2x128xf32>,
    %c0_i32_89 = arith.constant 0 : i32
    %278 = arith.cmpi eq, %arg0, %c0_i32_89 : i32
    %279 = arith.extui %278 : i1 to i32
    %c0_i32_90 = arith.constant 0 : i32
    %280 = arith.cmpi ne, %279, %c0_i32_90 : i32
    scf.if %280 {
      %c0_91 = arith.constant 0 : index
      %c0_92 = arith.constant 0 : index
      %281 = vector.load %arg6[%c0_91, %c0_92] : memref<2x128xf32, #tpu.memory_space<vmem>>, vector<2x128xf32>
      tpu.vector_store %arg6[%c0_91, %c0_92], %273 {strides = array<i32>} : memref<2x128xf32, #tpu.memory_space<vmem>>, vector<2x128xf32>,
      %c0_93 = arith.constant 0 : index
      %c0_94 = arith.constant 0 : index
      %282 = vector.load %arg7[%c0_93, %c0_94] : memref<2x128xf32, #tpu.memory_space<vmem>>, vector<2x128xf32>
      tpu.vector_store %arg7[%c0_93, %c0_94], %271 {strides = array<i32>} : memref<2x128xf32, #tpu.memory_space<vmem>>, vector<2x128xf32>,
    } else {
    }
    return
  }
  func.func @transform_0(%arg0: i32) -> (i32, i32) {
    %c0_i32 = arith.constant 0 : i32
    %c0_i32_0 = arith.constant 0 : i32
    return %arg0, %c0_i32 : i32, i32
  }
  func.func @transform_1(%arg0: i32) -> (i32, i32) {
    %c0_i32 = arith.constant 0 : i32
    %c0_i32_0 = arith.constant 0 : i32
    %c0_i32_1 = arith.constant 0 : i32
    return %c0_i32, %c0_i32_0 : i32, i32
  }
  func.func @transform_2(%arg0: i32) -> (i32, i32) {
    %c0_i32 = arith.constant 0 : i32
    %c0_i32_0 = arith.constant 0 : i32
    %c0_i32_1 = arith.constant 0 : i32
    return %c0_i32, %c0_i32_0 : i32, i32
  }
  func.func @transform_3(%arg0: i32) -> (i32, i32) {
    %c0_i32 = arith.constant 0 : i32
    %c0_i32_0 = arith.constant 0 : i32
    %c0_i32_1 = arith.constant 0 : i32
    return %c0_i32, %c0_i32_0 : i32, i32
  }
  func.func @transform_4(%arg0: i32) -> (i32, i32) {
    %c0_i32 = arith.constant 0 : i32
    %c0_i32_0 = arith.constant 0 : i32
    return %arg0, %c0_i32 : i32, i32
  }
  func.func @transform_5(%arg0: i32) -> (i32, i32) {
    %c0_i32 = arith.constant 0 : i32
    %c0_i32_0 = arith.constant 0 : i32
    %c0_i32_1 = arith.constant 0 : i32
    return %c0_i32, %c0_i32_0 : i32, i32
  }
  func.func @transform_6(%arg0: i32) -> (i32, i32) {
    %c0_i32 = arith.constant 0 : i32
    %c0_i32_0 = arith.constant 0 : i32
    %c0_i32_1 = arith.constant 0 : i32
    return %c0_i32, %c0_i32_0 : i32, i32
  }
}

module attributes {stable_mosaic.version = 11 : i64} {
  func.func @bn_kernel(%arg0: i32, %arg1: memref<2x256xf32, #tpu.memory_space<vmem>>, %arg2: memref<256x32xf32, #tpu.memory_space<vmem>>, %arg3: memref<32x256xf32, #tpu.memory_space<vmem>>, %arg4: memref<1x256xf32, #tpu.memory_space<vmem>>, %arg5: memref<1x256xf32, #tpu.memory_space<vmem>>, %arg6: memref<2x256xf32, #tpu.memory_space<vmem>>) attributes {dimension_semantics = [#tpu.dimension_semantics<parallel>], iteration_bounds = array<i64: 1>, scalar_prefetch = 0 : i64, scratch_operands = 0 : i64, tpu.core_type = #tpu.core_type<tc>, window_params = [{transform_indices = @transform_0, window_bounds = array<i64: 2, 256>}, {transform_indices = @transform_1, window_bounds = array<i64: 256, 32>}, {transform_indices = @transform_2, window_bounds = array<i64: 32, 256>}, {transform_indices = @transform_3, window_bounds = array<i64: 1, 256>}, {transform_indices = @transform_4, window_bounds = array<i64: 1, 256>}, {transform_indices = @transform_5, window_bounds = array<i64: 2, 256>}]} {
    %c0 = arith.constant 0 : index
    %c0_0 = arith.constant 0 : index
    %0 = vector.load %arg1[%c0, %c0_0] : memref<2x256xf32, #tpu.memory_space<vmem>>, vector<2x256xf32>
    %c0_1 = arith.constant 0 : index
    %c0_2 = arith.constant 0 : index
    %1 = vector.load %arg2[%c0_1, %c0_2] : memref<256x32xf32, #tpu.memory_space<vmem>>, vector<256x32xf32>
    %cst = arith.constant dense<0.000000e+00> : vector<2x32xf32>
    %2 = tpu.matmul %0, %1, %cst {dimension_numbers = #tpu.dot_dimension_numbers<[1], [0], [0], [1], [0, 0, 1, 1], [], []>} : vector<2x256xf32>, vector<256x32xf32>, vector<2x32xf32> -> vector<2x32xf32>
    %cst_3 = arith.constant dense<0.000000e+00> : vector<32xf32>
    %3 = vector.multi_reduction <add>, %2, %cst_3 [0] : vector<2x32xf32> to vector<32xf32>
    %4 = vector.shape_cast %3 : vector<32xf32> to vector<1x32xf32>
    %5 = arith.mulf %0, %0 : vector<2x256xf32>
    %cst_4 = arith.constant dense<0.000000e+00> : vector<2x32xf32>
    %6 = tpu.matmul %5, %1, %cst_4 {dimension_numbers = #tpu.dot_dimension_numbers<[1], [0], [0], [1], [0, 0, 1, 1], [], []>} : vector<2x256xf32>, vector<256x32xf32>, vector<2x32xf32> -> vector<2x32xf32>
    %cst_5 = arith.constant dense<0.000000e+00> : vector<32xf32>
    %7 = vector.multi_reduction <add>, %6, %cst_5 [0] : vector<2x32xf32> to vector<32xf32>
    %8 = vector.shape_cast %7 : vector<32xf32> to vector<1x32xf32>
    %cst_6 = arith.constant 1.600000e+01 : f32
    %9 = vector.broadcast %cst_6 : f32 to vector<1x32xf32>
    %10 = arith.divf %4, %9 : vector<1x32xf32>
    %cst_7 = arith.constant 1.600000e+01 : f32
    %11 = vector.broadcast %cst_7 : f32 to vector<1x32xf32>
    %12 = arith.divf %8, %11 : vector<1x32xf32>
    %13 = arith.mulf %10, %10 : vector<1x32xf32>
    %14 = arith.subf %12, %13 : vector<1x32xf32>
    %cst_8 = arith.constant 9.99999974E-6 : f32
    %15 = vector.broadcast %cst_8 : f32 to vector<1x32xf32>
    %16 = arith.addf %14, %15 : vector<1x32xf32>
    %17 = math.rsqrt %16 : vector<1x32xf32>
    %c0_9 = arith.constant 0 : index
    %c0_10 = arith.constant 0 : index
    %18 = vector.load %arg3[%c0_9, %c0_10] : memref<32x256xf32, #tpu.memory_space<vmem>>, vector<32x256xf32>
    %cst_11 = arith.constant dense<0.000000e+00> : vector<1x256xf32>
    %19 = tpu.matmul %10, %18, %cst_11 {dimension_numbers = #tpu.dot_dimension_numbers<[1], [0], [0], [1], [0, 0, 1, 1], [], []>} : vector<1x32xf32>, vector<32x256xf32>, vector<1x256xf32> -> vector<1x256xf32>
    %cst_12 = arith.constant dense<0.000000e+00> : vector<1x256xf32>
    %20 = tpu.matmul %17, %18, %cst_12 {dimension_numbers = #tpu.dot_dimension_numbers<[1], [0], [0], [1], [0, 0, 1, 1], [], []>} : vector<1x32xf32>, vector<32x256xf32>, vector<1x256xf32> -> vector<1x256xf32>
    %21 = vector.broadcast %19 : vector<1x256xf32> to vector<2x256xf32>
    %22 = arith.subf %0, %21 : vector<2x256xf32>
    %23 = vector.broadcast %20 : vector<1x256xf32> to vector<2x256xf32>
    %24 = arith.mulf %22, %23 : vector<2x256xf32>
    %c0_13 = arith.constant 0 : index
    %c0_14 = arith.constant 0 : index
    %25 = vector.load %arg4[%c0_13, %c0_14] : memref<1x256xf32, #tpu.memory_space<vmem>>, vector<1x256xf32>
    %26 = vector.broadcast %25 : vector<1x256xf32> to vector<2x256xf32>
    %27 = arith.mulf %24, %26 : vector<2x256xf32>
    %c0_15 = arith.constant 0 : index
    %c0_16 = arith.constant 0 : index
    %28 = vector.load %arg5[%c0_15, %c0_16] : memref<1x256xf32, #tpu.memory_space<vmem>>, vector<1x256xf32>
    %29 = vector.broadcast %28 : vector<1x256xf32> to vector<2x256xf32>
    %30 = arith.addf %27, %29 : vector<2x256xf32>
    %c0_17 = arith.constant 0 : index
    %c0_18 = arith.constant 0 : index
    %31 = vector.load %arg6[%c0_17, %c0_18] : memref<2x256xf32, #tpu.memory_space<vmem>>, vector<2x256xf32>
    tpu.vector_store %arg6[%c0_17, %c0_18], %30 {strides = array<i32>} : memref<2x256xf32, #tpu.memory_space<vmem>>, vector<2x256xf32>,
    return
  }
  func.func @transform_0(%arg0: i32) -> (i32, i32) {
    %c0_i32 = arith.constant 0 : i32
    %c0_i32_0 = arith.constant 0 : i32
    return %c0_i32, %arg0 : i32, i32
  }
  func.func @transform_1(%arg0: i32) -> (i32, i32) {
    %c0_i32 = arith.constant 0 : i32
    return %arg0, %arg0 : i32, i32
  }
  func.func @transform_2(%arg0: i32) -> (i32, i32) {
    %c0_i32 = arith.constant 0 : i32
    return %arg0, %arg0 : i32, i32
  }
  func.func @transform_3(%arg0: i32) -> (i32, i32) {
    %c0_i32 = arith.constant 0 : i32
    %c0_i32_0 = arith.constant 0 : i32
    return %c0_i32, %arg0 : i32, i32
  }
  func.func @transform_4(%arg0: i32) -> (i32, i32) {
    %c0_i32 = arith.constant 0 : i32
    %c0_i32_0 = arith.constant 0 : i32
    return %c0_i32, %arg0 : i32, i32
  }
  func.func @transform_5(%arg0: i32) -> (i32, i32) {
    %c0_i32 = arith.constant 0 : i32
    %c0_i32_0 = arith.constant 0 : i32
    return %c0_i32, %arg0 : i32, i32
  }
}

</mosaic_0001>

<bundles_post_ra>
// kernel: encoder_forward.5
= control target key start
LH: loop header
LB: loop body
LE: loop exit
PB: predicated region body
PF: predicated region fallthrough
CT: control target
= control target key end

     0   :  { %10 = vsyncpa [#allocation3], 0  ;;  %s995_s0 = inlined_call_operand.hbm [shape: f32[2,256], index: 0, kind: input, shape index: {}]   ;;  %s996_s1 = inlined_call_operand.hbm [shape: f32[256,32], index: 1, kind: input, shape index: {}]   ;;  %s997_s2 = inlined_call_operand.hbm [shape: f32[32,256], index: 2, kind: input, shape index: {}]   ;;  %s998_s3 = inlined_call_operand.hbm [shape: f32[1,256], index: 3, kind: input, shape index: {}]   ;;  %s999_s4 = inlined_call_operand.hbm [shape: f32[1,256], index: 4, kind: input, shape index: {}]   ;;  %s1000_s5 = inlined_call_operand.hbm [shape: f32[2,256], index: 5, kind: output, shape index: {}]  }
   0x1   :  { %11 = vsyncpa [#allocation6], 0 }
   0x2   :  { %12 = vsyncpa [#allocation9], 0 }
   0x3   :  { %13 = vsyncpa [#allocation4], 0  ;;  %s862_s18 = smov [#allocation5]   ;;  %s722_s22 = scalar_lea.hbm %s996_s1, 4096 }
   0x4   :  { %s29_s19 = sshll.u32 %s862_s18, 4  ;;  %p723_p0 = scmp.ne.s32.totalorder %s996_s1, %s722_s22  ;;  %s30_s19 = int_to_ptr.vmem [resolvable:$true] %s29_s19 }
   0x5   :  { %p726_p1 = scmp.lt.u32.totalorder %s722_s22, %s996_s1 }
   0x7   :  { %p728_p2 = pnand %p726_p1, %p723_p0 }
   0x9   :  { %731 = shalt.err (!%p728_p2)
}
   0xa   :  { %s732_s27 = scalar_lea.vmem %s30_s19, 4096  ;;  %p737_p4 = scmp.lt.s32.totalorder %s30_s19, %s30_s19 }
   0xb   :  { %p733_p3 = scmp.ne.s32.totalorder %s30_s19, %s732_s27  ;;  %p738_p5 = scmp.lt.s32.totalorder %s732_s27, %s732_s27 }
   0xd   :  { %p739_p6 = por %p738_p5, %p737_p4 }
   0xf   :  { %p740_p7 = pnand %p739_p6, %p733_p3 }
  0x11   :  { %743 = shalt.err (!%p740_p7)
}
  0x12   :  { %s863_s28 = smov 128   ;;  %s864_s29 = smov 8  }
  0x13   :  { %35 = dma.hbm_to_vmem [thread:$0]  %s996_s1, 4096, %s30_s19, [#allocation6], %s863_s28, %s863_s28, %s864_s29  }
  0x14   :  { %s865_s7 = smov [#allocation8]   ;;  %s866_s9 = smov [#allocation2]  }
  0x15   :  { %s54_s8 = sshll.u32 %s865_s7, 4  ;;  %s20_s10 = sshll.u32 %s866_s9, 4  ;;  %s55_s8 = int_to_ptr.vmem [resolvable:$true] %s54_s8  ;;  %s21_s10 = int_to_ptr.vmem [resolvable:$true] %s20_s10 }
  0x16   :  { %s744_s13 = scalar_lea.hbm %s998_s3, 32 }
  0x17   :  { %p745_p8 = scmp.ne.s32.totalorder %s998_s3, %s744_s13  ;;  %p748_p9 = scmp.lt.u32.totalorder %s744_s13, %s998_s3 }
  0x19   :  { %p750_p10 = pnand %p748_p9, %p745_p8 }
  0x1b   :  { %753 = shalt.err (!%p750_p10)
}
  0x1c   :  { %s754_s1 = scalar_lea.vmem %s55_s8, 32  ;;  %p759_p12 = scmp.lt.s32.totalorder %s55_s8, %s55_s8 }
  0x1d   :  { %p755_p11 = scmp.ne.s32.totalorder %s55_s8, %s754_s1  ;;  %p760_p13 = scmp.lt.s32.totalorder %s754_s1, %s754_s1 }
  0x1f   :  { %p761_p0 = por %p760_p13, %p759_p12 }
  0x21   :  { %p762_p1 = pnand %p761_p0, %p755_p11 }
  0x23   :  { %765 = shalt.err (!%p762_p1)
}
  0x24   :  { %57 = dma.hbm_to_vmem [thread:$0]  %s998_s3, 32, %s55_s8, [#allocation9]  }
  0x25   :  { %s766_s22 = scalar_lea.hbm %s995_s0, 64 }
  0x26   :  { %p767_p2 = scmp.ne.s32.totalorder %s995_s0, %s766_s22  ;;  %p770_p3 = scmp.lt.u32.totalorder %s766_s22, %s995_s0 }
  0x28   :  { %p772_p4 = pnand %p770_p3, %p767_p2 }
  0x2a   :  { %775 = shalt.err (!%p772_p4)
}
  0x2b   :  { %s776_s27 = scalar_lea.vmem %s21_s10, 64  ;;  %p781_p6 = scmp.lt.s32.totalorder %s21_s10, %s21_s10 }
  0x2c   :  { %p777_p5 = scmp.ne.s32.totalorder %s21_s10, %s776_s27  ;;  %p782_p7 = scmp.lt.s32.totalorder %s776_s27, %s776_s27 }
  0x2e   :  { %p783_p8 = por %p782_p7, %p781_p6 }
  0x30   :  { %p784_p9 = pnand %p783_p8, %p777_p5 }
  0x32   :  { %787 = shalt.err (!%p784_p9)
}
  0x33   :  { %23 = dma.hbm_to_vmem [thread:$0]  %s995_s0, 64, %s21_s10, [#allocation3]  }
  0x34   :  { %s867_s29 = smov [#allocation7]   ;;  %s788_s8 = scalar_lea.hbm %s997_s2, 1024 }
  0x35   :  { %s41_s30 = sshll.u32 %s867_s29, 4  ;;  %p789_p10 = scmp.ne.s32.totalorder %s997_s2, %s788_s8  ;;  %s42_s30 = int_to_ptr.vmem [resolvable:$true] %s41_s30 }
  0x36   :  { %p792_p11 = scmp.lt.u32.totalorder %s788_s8, %s997_s2 }
  0x38   :  { %p794_p12 = pnand %p792_p11, %p789_p10 }
  0x3a   :  { %797 = shalt.err (!%p794_p12)
}
  0x3b   :  { %s798_s14 = scalar_lea.vmem %s42_s30, 1024  ;;  %p803_p0 = scmp.lt.s32.totalorder %s42_s30, %s42_s30 }
  0x3c   :  { %p799_p13 = scmp.ne.s32.totalorder %s42_s30, %s798_s14  ;;  %p804_p1 = scmp.lt.s32.totalorder %s798_s14, %s798_s14 }
  0x3e   :  { %p805_p2 = por %p804_p1, %p803_p0 }
  0x40   :  { %p806_p3 = pnand %p805_p2, %p799_p13 }
  0x42   :  { %809 = shalt.err (!%p806_p3)
}
  0x43   :  { %s868_s0 = smov 256   ;;  %s869_s10 = smov 16  }
  0x44   :  { %47 = dma.hbm_to_vmem [thread:$0]  %s997_s2, 1024, %s42_s30, [#allocation6], %s868_s0, %s868_s0, %s869_s10  }
  0x45   :  { %s870_s17 = smov [#allocation10]   ;;  %s810_s20 = scalar_lea.hbm %s999_s4, 32 }
  0x46   :  { %s64_s1 = sshll.u32 %s870_s17, 4  ;;  %p811_p4 = scmp.ne.s32.totalorder %s999_s4, %s810_s20  ;;  %s65_s1 = int_to_ptr.vmem [resolvable:$true] %s64_s1 }
  0x47   :  { %p814_p5 = scmp.lt.u32.totalorder %s810_s20, %s999_s4 }
  0x49   :  { %p816_p6 = pnand %p814_p5, %p811_p4 }
  0x4b   :  { %819 = shalt.err (!%p816_p6)
}
  0x4c   :  { %s820_s25 = scalar_lea.vmem %s65_s1, 32  ;;  %p825_p8 = scmp.lt.s32.totalorder %s65_s1, %s65_s1 }
  0x4d   :  { %p821_p7 = scmp.ne.s32.totalorder %s65_s1, %s820_s25  ;;  %p826_p9 = scmp.lt.s32.totalorder %s820_s25, %s820_s25 }
  0x4f   :  { %p827_p10 = por %p826_p9, %p825_p8 }
  0x51   :  { %p828_p11 = pnand %p827_p10, %p821_p7 }
  0x53   :  { %831 = shalt.err (!%p828_p11)
}
  0x54   :  { %67 = dma.hbm_to_vmem [thread:$0]  %s999_s4, 32, %s65_s1, [#allocation9]  }
  0x55   :  { %854 = dma.done.wait [#allocation3], 64  }
  0x56   :  { %855 = vsyncadd [#allocation3], 4294967232 }
  0x57   :  { %856 = dma.done.wait [#allocation6], 5120  }
  0x58   :  { %857 = vsyncadd [#allocation6], 4294962176 }
  0x59   :  { %858 = dma.done.wait [#allocation9], 64  }
  0x5a   :  { %859 = vsyncadd [#allocation9], 4294967232  ;;  %v871_v0 = vmov 1983009808   ;;  %v120_v2 = vlaneseq  ;;  %v100_v3 = vld [vmem:[#allocation5 + $0x80] sm:$0xff]  ;;  %v101_v4 = vld [vmem:[#allocation5 + $0x88] sm:$0xff] }
  0x5b   :  { %v118_v1 = vunpack.c.l.s4 %v871_v0  ;;  %v84_v5 = vld [vmem:[#allocation5] sm:$0xff]  ;;  %v628_v6 = vpack.c.bf16 %v101_v4, %v100_v3  ;;  %v85_v7 = vld [vmem:[#allocation5 + $0x8] sm:$0xff]  ;;  %v102_v8 = vld [vmem:[#allocation5 + $0x90] sm:$0xff]  ;;  %vm197_vm0 = vcmask 254976   ;;  %vm309_vm1 = vcmask 261120   ;;  %s873_s4 = smov [#allocation11]  }
  0x5c   :  { %v103_v9 = vld [vmem:[#allocation5 + $0x98] sm:$0xff]  ;;  %v630_v10 = vpack.c.bf16 %v85_v7, %v84_v5  ;;  %v86_v12 = vld [vmem:[#allocation5 + $0x10] sm:$0xff]  ;;  %v104_v14 = vld [vmem:[#allocation5 + $0xa0] sm:$0xff]  ;;  %v964_v17 = vshrl.u32 %v120_v2, 7  ;;  %s545_s27 = sshll.u32 %s873_s4, 4  ;;  %s546_s27 = int_to_ptr.vmem [resolvable:$true] %s545_s27 }
  0x5d   :  { %v632_v11 = vpack.c.bf16 %v103_v9, %v102_v8  ;;  %v87_v13 = vld [vmem:[#allocation5 + $0x18] sm:$0xff]  ;;  %629 = vmatprep.subr.bf16.mxu0 %v628_v6  ;;  %661 = vmatprep.subr.bf16.mxu1 %v628_v6  ;;  %v105_v15 = vld [vmem:[#allocation5 + $0xa8] sm:$0xff]  ;;  %v119_v16 = vunpack.c.0.s8 %v118_v1  ;;  %v88_v20 = vld [vmem:[#allocation5 + $0x20] sm:$0xff]  ;;  %v872_v8 = vmov 0.0   ;;  %s832_s3 = scalar_lea.vmem %s546_s27, 64  ;;  %p837_p13 = scmp.lt.s32.totalorder %s546_s27, %s546_s27 }
  0x5e   :  { %631 = vmatpush3.bf16.msra.mxu0 %v630_v10  ;;  %663 = vmatpush3.bf16.msra.mxu1 %v630_v10  ;;  %v634_v18 = vpack.c.bf16 %v87_v13, %v86_v12  ;;  %v636_v19 = vpack.c.bf16 %v105_v15, %v104_v14  ;;  %v89_v21 = vld [vmem:[#allocation5 + $0x28] sm:$0xff]  ;;  %v106_v22 = vld [vmem:[#allocation5 + $0xb0] sm:$0xff]  ;;  %v107_v23 = vld [vmem:[#allocation5 + $0xb8] sm:$0xff]  ;;  %p833_p12 = scmp.ne.s32.totalorder %s546_s27, %s832_s3  ;;  %p838_p0 = scmp.lt.s32.totalorder %s832_s3, %s832_s3 }
  0x5f   :  { %633 = vmatprep.subr.bf16.mxu0 %v632_v11  ;;  %665 = vmatprep.subr.bf16.mxu1 %v632_v11  ;;  %v967_v24 = vsub.s32 %v119_v16, %v964_v17  ;;  %v638_v25 = vpack.c.bf16 %v89_v21, %v88_v20  ;;  %v640_v26 = vpack.c.bf16 %v107_v23, %v106_v22  ;;  %v90_v27 = vld [vmem:[#allocation5 + $0x30] sm:$0xff]  ;;  %v91_v28 = vld [vmem:[#allocation5 + $0x38] sm:$0xff]  ;;  %v108_v29 = vld [vmem:[#allocation5 + $0xc0] sm:$0xff] }
  0x60   :  { %v109_v30 = vld [vmem:[#allocation5 + $0xc8] sm:$0xff]  ;;  %v969_v31 = vld [vmem:[#allocation2] sm:$0xf]  ;;  %v642_v34 = vpack.c.bf16 %v91_v28, %v90_v27  ;;  %v92_v36 = vld [vmem:[#allocation5 + $0x40] sm:$0xff]  ;;  %p839_p1 = por %p838_p0, %p837_p13 }
  0x61   :  { %v123_v32 = vrot.slane %v969_v31, %v967_v24  ;;  %v205_v33 = vmul.f32 %v969_v31, %v969_v31  ;;  %v644_v35 = vpack.c.bf16 %v109_v30, %v108_v29  ;;  %v93_v37 = vld [vmem:[#allocation5 + $0x48] sm:$0xff]  ;;  %v110_v40 = vld [vmem:[#allocation5 + $0xd0] sm:$0xff]  ;;  %v111_v41 = vld [vmem:[#allocation5 + $0xd8] sm:$0xff] }
  0x62   :  { %635 = vmatpush3.bf16.msra.mxu0 %v634_v18  ;;  %667 = vmatpush3.bf16.msra.mxu1 %v634_v18  ;;  %v646_v43 = vpack.c.bf16 %v93_v37, %v92_v36  ;;  %v648_v44 = vpack.c.bf16 %v111_v41, %v110_v40  ;;  %v94_v45 = vld [vmem:[#allocation5 + $0x50] sm:$0xff]  ;;  %v95_v46 = vld [vmem:[#allocation5 + $0x58] sm:$0xff]  ;;  %v112_v47 = vld [vmem:[#allocation5 + $0xe0] sm:$0xff]  ;;  %p840_p2 = pnand %p839_p1, %p833_p12 }
  0x63   :  { %637 = vmatprep.subr.bf16.mxu0 %v636_v19  ;;  %669 = vmatprep.subr.bf16.mxu1 %v636_v19  ;;  %v124_v38 = vcombine.high %v123_v32, %v123_v32  ;;  %v213_v39 = vrot.slane %v205_v33, %v967_v24  ;;  %v113_v48 = vld [vmem:[#allocation5 + $0xe8] sm:$0xff]  ;;  %v650_v49 = vpack.c.bf16 %v95_v46, %v94_v45  ;;  %v96_v51 = vld [vmem:[#allocation5 + $0x60] sm:$0xff]  ;;  %v114_v53 = vld [vmem:[#allocation5 + $0xf0] sm:$0xff] }
  0x64   :  { %v652_v50 = vpack.c.bf16 %v113_v48, %v112_v47  ;;  %v97_v52 = vld [vmem:[#allocation5 + $0x68] sm:$0xff]  ;;  %v115_v54 = vld [vmem:[#allocation5 + $0xf8] sm:$0xff]  ;;  %v98_v57 = vld [vmem:[#allocation5 + $0x70] sm:$0xff] }
  0x65   :  { %191 = vmatprep.mubr.f32.mxu0 %v124_v38  ;;  %v214_v42 = vcombine.high %v213_v39, %v213_v39  ;;  %v654_v55 = vpack.c.bf16 %v97_v52, %v96_v51  ;;  %v656_v56 = vpack.c.bf16 %v115_v54, %v114_v53  ;;  %v99_v58 = vld [vmem:[#allocation5 + $0x78] sm:$0xff]  ;;  %v302_v60 = vld [vmem:[#allocation7 + $0x8] sm:$0xff]  ;;  %v301_v63 = vld [vmem:[#allocation7] sm:$0xff]  ;;  %v460_v38 = vsub.s32 0, %v964_v17 }
  0x66   :  { %639 = vmatpush3.bf16.msra.mxu0 %v638_v25  ;;  %671 = vmatpush3.bf16.msra.mxu1 %v638_v25  ;;  %v658_v59 = vpack.c.bf16 %v99_v58, %v98_v57  ;;  %v304_v61 = vld [vmem:[#allocation7 + $0x18] sm:$0xff]  ;;  %v303_v0 = vld [vmem:[#allocation7 + $0x10] sm:$0xff]  ;;  %v306_v2 = vld [vmem:[#allocation7 + $0x28] sm:$0xff] }
  0x67   :  { %641 = vmatprep.subr.bf16.mxu0 %v640_v26  ;;  %673 = vmatprep.subr.bf16.mxu1 %v640_v26  ;;  %v692_v62 = vpack.c.bf16 %v304_v61, %v302_v60  ;;  %v694_v1 = vpack.c.bf16 %v303_v0, %v301_v63  ;;  %v308_v3 = vld [vmem:[#allocation7 + $0x38] sm:$0xff]  ;;  %v305_v5 = vld [vmem:[#allocation7 + $0x20] sm:$0xff]  ;;  %v307_v6 = vld [vmem:[#allocation7 + $0x30] sm:$0xff] }
  0x68   :  { %281 = vmatprep.mubr.f32.mxu1 %v214_v42  ;;  %v696_v4 = vpack.c.bf16 %v308_v3, %v306_v2  ;;  %v698_v7 = vpack.c.bf16 %v307_v6, %v305_v5  ;;  %v498_v45 = vld [vmem:[#allocation8] sm:$0x3]  ;;  %v518_v46 = vld [vmem:[#allocation10] sm:$0x3] }
  0x69   :  { %v503_v47 = vrot.slane %v498_v45, %v460_v38 }
  0x6a   :  { %643 = vmatpush3.bf16.msra.mxu0 %v642_v34  ;;  %675 = vmatpush3.bf16.msra.mxu1 %v642_v34 }
  0x6b   :  { %645 = vmatprep.subr.bf16.mxu0 %v644_v35  ;;  %677 = vmatprep.subr.bf16.mxu1 %v644_v35 }
  0x6e   :  { %647 = vmatpush3.bf16.msra.mxu0 %v646_v43  ;;  %679 = vmatpush3.bf16.msra.mxu1 %v646_v43 }
  0x6f   :  { %649 = vmatprep.subr.bf16.mxu0 %v648_v44  ;;  %681 = vmatprep.subr.bf16.mxu1 %v648_v44  ;;  %v506_v44 = vsub.s32 1, %v964_v17 }
  0x71   :  { %v507_v48 = vrot.slane %v498_v45, %v506_v44  ;;  %v527_v51 = vrot.slane %v518_v46, %v506_v44 }
  0x72   :  { %651 = vmatpush3.bf16.msra.mxu0 %v650_v49  ;;  %683 = vmatpush3.bf16.msra.mxu1 %v650_v49 }
  0x73   :  { %653 = vmatprep.subr.bf16.mxu0 %v652_v50  ;;  %685 = vmatprep.subr.bf16.mxu1 %v652_v50  ;;  %v523_v50 = vrot.slane %v518_v46, %v460_v38 }
  0x75   :  { %v528_v58 = vcombine.low %v523_v50, %v527_v51 }
  0x76   :  { %655 = vmatpush3.bf16.msra.mxu0 %v654_v55  ;;  %687 = vmatpush3.bf16.msra.mxu1 %v654_v55 }
  0x77   :  { %657 = vmatprep.subr.bf16.mxu0 %v656_v56  ;;  %689 = vmatprep.subr.bf16.mxu1 %v656_v56  ;;  %v508_v56 = vcombine.low %v503_v47, %v507_v48 }
  0x79   :  { %v515_v17 = vrot.slane %v508_v56, %v967_v24 }
  0x7a   :  { %659 = vmatpush3.bf16.msra.mxu0 %v658_v59  ;;  %691 = vmatpush3.bf16.msra.mxu1 %v658_v59 }
  0x7b   :  { %693 = vmatprep.subr.bf16.mxu0 %v692_v62  ;;  %701 = vmatprep.subr.bf16.mxu1 %v692_v62  ;;  %v535_v62 = vrot.slane %v528_v58, %v967_v24 }
  0x7d   :  { %192 = vmatmul.mubr.f32.vlgmr.msra.gmra.mrb[0].mxu0 %v123_v32  ;;  %282 = vmatmul.mubr.f32.vlgmr.msra.gmra.mrb[0].mxu1 %v213_v39 }
  0x7e   :  { %695 = vmatpush1.bf16.msra.mxu0 %v694_v1  ;;  %703 = vmatpush1.bf16.msra.mxu1 %v694_v1 }
  0x7f   :  { %697 = vmatprep.subr.bf16.mxu0 %v696_v4  ;;  %705 = vmatprep.subr.bf16.mxu1 %v696_v4 }
  0x80   :  { %377 = vmatprep.mubr.f32.mxu0 %v872_v8  ;;  %451 = vmatprep.mubr.f32.mxu1 %v872_v8 }
  0x82   :  { %699 = vmatpush1.bf16.msra.mxu0 %v698_v7  ;;  %707 = vmatpush1.bf16.msra.mxu1 %v698_v7 }
 0x150   :  { %v590_v9 = vpop.f32.mrb[0].mxu0  ;;  %v625_v10 = vpop.f32.mrb[0].mxu1 }
 0x151   :  { %v591_v11 = vpop.f32.mrb[1].mxu0  ;;  %v626_v12 = vpop.f32.mrb[1].mxu1 }
 0x152   :  { %v592_v13 = vadd.f32 %v591_v11, %v590_v9  ;;  %v627_v14 = vadd.f32 %v626_v12, %v625_v10 }
 0x154   :  { %v198_v15 = vsel %vm197_vm0, %v592_v13, 0.0  ;;  %v287_v16 = vsel %vm197_vm0, %v627_v14, 0.0 }
 0x155   :  { %v199_v18 = vrot.slane %v198_v15, 4  ;;  %v288_v19 = vrot.slane %v287_v16, 4 }
 0x157   :  { %v200_v20 = vadd.f32 %v199_v18, %v198_v15  ;;  %v289_v21 = vadd.f32 %v288_v19, %v287_v16 }
 0x159   :  { %v201_v22 = vrot.slane %v200_v20, 2  ;;  %v290_v23 = vrot.slane %v289_v21, 2 }
 0x15b   :  { %v202_v25 = vadd.f32 %v201_v22, %v200_v20  ;;  %v291_v26 = vadd.f32 %v290_v23, %v289_v21 }
 0x15d   :  { %v203_v27 = vrot.slane %v202_v25, 1  ;;  %v292_v28 = vrot.slane %v291_v26, 1 }
 0x15f   :  { %v204_v29 = vadd.f32 %v203_v27, %v202_v25  ;;  %v293_v30 = vadd.f32 %v292_v28, %v291_v26 }
 0x161   :  { %v295_v32 = vmul.f32 0.0625, %v204_v29  ;;  %v296_v34 = vmul.f32 0.0625, %v293_v30 }
 0x163   :  { %v297_v33 = vmul.f32 %v295_v32, %v295_v32  ;;  %556 = vmatmul.mubr.msk.f32.vlgmr.msra.gmra.mrb[2].mxu0 %vm309_vm1, %v295_v32 }
 0x165   :  { %v298_v35 = vsub.f32 %v296_v34, %v297_v33 }
 0x167   :  { %v299_v36 = vadd.f32 1e-05, %v298_v35 }
 0x169   :  { %720 = vrsqrt.f32 %v299_v36 }
 0x173   :  { %v721_v37 = vpop.eup %720 }
 0x174   :  { %557 = vmatmul.mubr.msk.f32.vlgmr.msra.gmra.mrb[2].mxu1 %vm309_vm1, %v721_v37 }
 0x236   :  { %v379_v39 = vpop.f32.mrb[2].mxu0 }
 0x237   :  { %v461_v40 = vrot.slane %v379_v39, %v460_v38  ;;  %v381_v41 = vpop.f32.mrb[3].mxu0 }
 0x238   :  { %v465_v42 = vrot.slane %v381_v41, %v460_v38 }
 0x23a   :  { %v468_v43 = vcombine.low %v461_v40, %v465_v42 }
 0x23c   :  { %v475_v54 = vrot.slane %v468_v43, %v967_v24 }
 0x23e   :  { %v477_v59 = vsub.f32 %v969_v31, %v475_v54 }
 0x247   :  { %v453_v49 = vpop.f32.mrb[2].mxu1 }
 0x248   :  { %v481_v52 = vrot.slane %v453_v49, %v460_v38  ;;  %v455_v53 = vpop.f32.mrb[3].mxu1 }
 0x249   :  { %v485_v55 = vrot.slane %v455_v53, %v460_v38 }
 0x24b   :  { %v488_v57 = vcombine.low %v481_v52, %v485_v55 }
 0x24d   :  { %v495_v60 = vrot.slane %v488_v57, %v967_v24 }
 0x24f   :  { %v497_v61 = vmul.f32 %v495_v60, %v477_v59 }
 0x251   :  { %v517_v63 = vmul.f32 %v515_v17, %v497_v61 }
 0x253   :  { %v537_v0 = vadd.f32 %v535_v62, %v517_v63 }
 0x255   :  { %538 = vst [vmem:[#allocation11] sm:$0xf] %v537_v0 }
 0x256   :  { %843 = shalt.err (!%p840_p2)
}
 0x257   :  { %s844_s30 = scalar_lea.hbm %s1000_s5, 64 }
 0x258   :  { %p845_p3 = scmp.ne.s32.totalorder %s1000_s5, %s844_s30  ;;  %p848_p4 = scmp.lt.u32.totalorder %s844_s30, %s1000_s5 }
 0x25a   :  { %p850_p5 = pnand %p848_p4, %p845_p3 }
 0x25c   :  { %853 = shalt.err (!%p850_p5)
}
 0x25d   :  { %548 = dma.vmem_to_hbm [thread:$0]  %s546_s27, 64, %s1000_s5, [#allocation4]  }
 0x25e   :  { %860 = dma.done.wait [#allocation4], 64  }
 0x25f   :  { %861 = vsyncadd [#allocation4], 4294967232 }
 0x260   :  { %552 = vsyncpa [#allocation3], 1 }
 0x261   :  { %553 = vsyncpa [#allocation6], 1 }
 0x262   :  { %554 = vsyncpa [#allocation9], 1 }
 0x263   :  { %555 = vsyncpa [#allocation4], 1 }

// kernel: encoder_forward.3
= control target key start
LH: loop header
LB: loop body
LE: loop exit
PB: predicated region body
PF: predicated region fallthrough
CT: control target
= control target key end

     0   :  { %12 = vsyncpa [#allocation6], 0  ;;  %s3768_s0 = inlined_call_operand.hbm [shape: f32[16,16], index: 0, kind: input, shape index: {}]   ;;  %s3769_s1 = inlined_call_operand.hbm [shape: f32[16,512], index: 1, kind: input, shape index: {}]   ;;  %s3770_s2 = inlined_call_operand.hbm [shape: f32[128,512], index: 2, kind: input, shape index: {}]   ;;  %s3771_s3 = inlined_call_operand.hbm [shape: f32[1,512], index: 3, kind: input, shape index: {}]   ;;  %s3772_s4 = inlined_call_operand.hbm [shape: f32[16,128], index: 4, kind: output, shape index: {0}]   ;;  %s3773_s5 = inlined_call_operand.hbm [shape: f32[2,128], index: 5, kind: output, shape index: {1}]   ;;  %s3774_s6 = inlined_call_operand.hbm [shape: f32[2,128], index: 6, kind: output, shape index: {2}]  }
   0x1   :  { %13 = vsyncpa [#allocation9], 0 }
   0x2   :  { %14 = vsyncpa [#allocation12], 0 }
   0x3   :  { %15 = vsyncpa [#allocation7], 0 }
   0x4   :  { %16 = vsyncpa [#allocation15], 0  ;;  %s3209_s21 = smov [#allocation8]   ;;  %s3045_s25 = scalar_lea.hbm %s3769_s1, 1024 }
   0x5   :  { %s34_s22 = sshll.u32 %s3209_s21, 4  ;;  %p3046_p0 = scmp.ne.s32.totalorder %s3769_s1, %s3045_s25  ;;  %s35_s22 = int_to_ptr.vmem [resolvable:$true] %s34_s22 }
   0x6   :  { %p3049_p1 = scmp.lt.u32.totalorder %s3045_s25, %s3769_s1 }
   0x8   :  { %p3051_p2 = pnand %p3049_p1, %p3046_p0 }
   0xa   :  { %3054 = shalt.err (!%p3051_p2)
}
   0xb   :  { %s3055_s30 = scalar_lea.vmem %s35_s22, 1024  ;;  %p3060_p4 = scmp.lt.s32.totalorder %s35_s22, %s35_s22 }
   0xc   :  { %p3056_p3 = scmp.ne.s32.totalorder %s35_s22, %s3055_s30  ;;  %p3061_p5 = scmp.lt.s32.totalorder %s3055_s30, %s3055_s30 }
   0xe   :  { %p3062_p6 = por %p3061_p5, %p3060_p4 }
  0x10   :  { %p3063_p7 = pnand %p3062_p6, %p3056_p3 }
  0x12   :  { %3066 = shalt.err (!%p3063_p7)
}
  0x13   :  { %s3210_s7 = smov 512   ;;  %s3211_s8 = smov 32  }
  0x14   :  { %40 = dma.hbm_to_vmem [thread:$0]  %s3769_s1, 1024, %s35_s22, [#allocation9], %s3210_s7, %s3210_s7, %s3211_s8  }
  0x15   :  { %s3212_s11 = smov [#allocation5]   ;;  %s3067_s15 = scalar_lea.hbm %s3768_s0, 256 }
  0x16   :  { %s22_s12 = sshll.u32 %s3212_s11, 4  ;;  %p3068_p8 = scmp.ne.s32.totalorder %s3768_s0, %s3067_s15  ;;  %s23_s12 = int_to_ptr.vmem [resolvable:$true] %s22_s12 }
  0x17   :  { %p3071_p9 = scmp.lt.u32.totalorder %s3067_s15, %s3768_s0 }
  0x19   :  { %p3073_p10 = pnand %p3071_p9, %p3068_p8 }
  0x1b   :  { %3076 = shalt.err (!%p3073_p10)
}
  0x1c   :  { %s3077_s20 = scalar_lea.vmem %s23_s12, 256  ;;  %p3082_p12 = scmp.lt.s32.totalorder %s23_s12, %s23_s12 }
  0x1d   :  { %p3078_p11 = scmp.ne.s32.totalorder %s23_s12, %s3077_s20  ;;  %p3083_p13 = scmp.lt.s32.totalorder %s3077_s20, %s3077_s20 }
  0x1f   :  { %p3084_p0 = por %p3083_p13, %p3082_p12 }
  0x21   :  { %p3085_p1 = pnand %p3084_p0, %p3078_p11 }
  0x23   :  { %3088 = shalt.err (!%p3085_p1)
}
  0x24   :  { %s3213_s1 = smov 128   ;;  %s3214_s21 = smov 8  }
  0x25   :  { %28 = dma.hbm_to_vmem [thread:$0]  %s3768_s0, 256, %s23_s12, [#allocation6], %s3213_s1, %s3213_s1, %s3214_s21  }
  0x26   :  { %s3215_s24 = smov [#allocation10]   ;;  %s3216_s26 = smov [#allocation11]  }
  0x27   :  { %s46_s25 = sshll.u32 %s3215_s24, 4  ;;  %s59_s27 = sshll.u32 %s3216_s26, 4  ;;  %s47_s25 = int_to_ptr.vmem [resolvable:$true] %s46_s25  ;;  %s60_s27 = int_to_ptr.vmem [resolvable:$true] %s59_s27 }
  0x28   :  { %s3089_s30 = scalar_lea.hbm %s3770_s2, 8192 }
  0x29   :  { %p3090_p2 = scmp.ne.s32.totalorder %s3770_s2, %s3089_s30  ;;  %p3093_p3 = scmp.lt.u32.totalorder %s3089_s30, %s3770_s2 }
  0x2b   :  { %p3095_p4 = pnand %p3093_p3, %p3090_p2 }
  0x2d   :  { %3098 = shalt.err (!%p3095_p4)
}
  0x2e   :  { %s3099_s0 = scalar_lea.vmem %s47_s25, 8192  ;;  %p3104_p6 = scmp.lt.s32.totalorder %s47_s25, %s47_s25 }
  0x2f   :  { %p3100_p5 = scmp.ne.s32.totalorder %s47_s25, %s3099_s0  ;;  %p3105_p7 = scmp.lt.s32.totalorder %s3099_s0, %s3099_s0 }
  0x31   :  { %p3106_p8 = por %p3105_p7, %p3104_p6 }
  0x33   :  { %p3107_p9 = pnand %p3106_p8, %p3100_p5 }
  0x35   :  { %3110 = shalt.err (!%p3107_p9)
}
  0x36   :  { %52 = dma.hbm_to_vmem [thread:$0]  %s3770_s2, 8192, %s47_s25, [#allocation9], %s3210_s7, %s3210_s7, %s3211_s8  }
  0x37   :  { %s3111_s17 = scalar_lea.hbm %s3771_s3, 64 }
  0x38   :  { %p3112_p10 = scmp.ne.s32.totalorder %s3771_s3, %s3111_s17  ;;  %p3115_p11 = scmp.lt.u32.totalorder %s3111_s17, %s3771_s3 }
  0x3a   :  { %p3117_p12 = pnand %p3115_p11, %p3112_p10 }
  0x3c   :  { %3120 = shalt.err (!%p3117_p12)
}
  0x3d   :  { %s3121_s23 = scalar_lea.vmem %s60_s27, 64  ;;  %p3126_p0 = scmp.lt.s32.totalorder %s60_s27, %s60_s27 }
  0x3e   :  { %p3122_p13 = scmp.ne.s32.totalorder %s60_s27, %s3121_s23  ;;  %p3127_p1 = scmp.lt.s32.totalorder %s3121_s23, %s3121_s23 }
  0x40   :  { %p3128_p2 = por %p3127_p1, %p3126_p0 }
  0x42   :  { %p3129_p3 = pnand %p3128_p2, %p3122_p13 }
  0x44   :  { %3132 = shalt.err (!%p3129_p3)
}
  0x45   :  { %62 = dma.hbm_to_vmem [thread:$0]  %s3771_s3, 64, %s60_s27, [#allocation12]  }
  0x46   :  { %3199 = dma.done.wait [#allocation6], 256  }
  0x47   :  { %3200 = vsyncadd [#allocation6], 4294967040 }
  0x48   :  { %3201 = dma.done.wait [#allocation9], 9216  }
  0x49   :  { %3202 = vsyncadd [#allocation9], 4294958080 }
  0x4a   :  { %3203 = dma.done.wait [#allocation12], 64  }
  0x4b   :  { %3204 = vsyncadd [#allocation12], 4294967232  ;;  %v3217_v0 = vmov 0.0   ;;  %v84_v1 = vld [vmem:[#allocation8 + $0x8] sm:$0xff]  ;;  %v86_v3 = vld [vmem:[#allocation8 + $0x18] sm:$0xff]  ;;  %vm113_vm0 = vcmask 130048  }
  0x4c   :  { %184 = vmatprep.mubr.f32.mxu0 %v3217_v0  ;;  %79 = vst [vmem:[#allocation2] sm:$0x3] %v3217_v0  ;;  %80 = vst [vmem:[#allocation3] sm:$0x3] %v3217_v0  ;;  %261 = vmatprep.mubr.f32.mxu1 %v3217_v0  ;;  %v88_v2 = vld [vmem:[#allocation8 + $0x28] sm:$0xff]  ;;  %v90_v5 = vld [vmem:[#allocation8 + $0x38] sm:$0xff] }
  0x4d   :  { %v2385_v4 = vpack.c.bf16 %v88_v2, %v84_v1  ;;  %v83_v6 = vld [vmem:[#allocation8] sm:$0xff]  ;;  %v2389_v8 = vpack.c.bf16 %v90_v5, %v86_v3  ;;  %v85_v10 = vld [vmem:[#allocation8 + $0x10] sm:$0xff]  ;;  %v289_v14 = vld [vmem:[#allocation10 + $0x8] sm:$0xff]  ;;  %s3218_s3 = smov [#allocation14]   ;;  %s3219_s24 = smov [#allocation13]  }
  0x4e   :  { %v87_v7 = vld [vmem:[#allocation8 + $0x20] sm:$0xff]  ;;  %v89_v11 = vld [vmem:[#allocation8 + $0x30] sm:$0xff]  ;;  %v293_v15 = vld [vmem:[#allocation10 + $0x28] sm:$0xff]  ;;  %s2329_s8 = sshll.u32 %s3218_s3, 4  ;;  %s2316_s25 = sshll.u32 %s3219_s24, 4  ;;  %s2330_s8 = int_to_ptr.vmem [resolvable:$true] %s2329_s8  ;;  %s3715_s25 = int_to_ptr.vmem [resolvable:$true] %s2316_s25 }
  0x4f   :  { %v2387_v9 = vpack.c.bf16 %v87_v7, %v83_v6  ;;  %v81_v12 = vld [vmem:[#allocation5] sm:$0xff]  ;;  %2386 = vmatprep.subr.bf16.mxu0 %v2385_v4  ;;  %v2391_v13 = vpack.c.bf16 %v89_v11, %v85_v10  ;;  %v291_v16 = vld [vmem:[#allocation10 + $0x18] sm:$0xff]  ;;  %2390 = vmatprep.subr.bf16.mxu1 %v2389_v8  ;;  %v3317_v17 = vpack.c.bf16 %v293_v15, %v289_v14  ;;  %v288_v19 = vld [vmem:[#allocation10] sm:$0xff]  ;;  %s3220_s26 = smov [#allocation16]   ;;  %s3133_s28 = scalar_lea.vmem %s2330_s8, 32 }
  0x50   :  { %v295_v18 = vld [vmem:[#allocation10 + $0x38] sm:$0xff]  ;;  %v292_v20 = vld [vmem:[#allocation10 + $0x20] sm:$0xff]  ;;  %v290_v23 = vld [vmem:[#allocation10 + $0x10] sm:$0xff]  ;;  %s2339_s27 = sshll.u32 %s3220_s26, 4  ;;  %p3134_p4 = scmp.ne.s32.totalorder %s2330_s8, %s3133_s28  ;;  %s3717_s27 = int_to_ptr.vmem [resolvable:$true] %s2339_s27 }
  0x51   :  { %2388 = vmatpush1.bf16.msra.mxu0 %v2387_v9  ;;  %2392 = vmatpush1.bf16.msra.mxu1 %v2391_v13  ;;  %v3319_v21 = vpack.c.bf16 %v295_v18, %v291_v16  ;;  %v3321_v22 = vpack.c.bf16 %v292_v20, %v288_v19  ;;  %v294_v24 = vld [vmem:[#allocation10 + $0x30] sm:$0xff]  ;;  %v297_v25 = vld [vmem:[#allocation10 + $0x48] sm:$0xff]  ;;  %v299_v28 = vld [vmem:[#allocation10 + $0x58] sm:$0xff]  ;;  %p3138_p5 = scmp.lt.s32.totalorder %s2330_s8, %s2330_s8  ;;  %p3139_p6 = scmp.lt.s32.totalorder %s3133_s28, %s3133_s28 }
  0x52   :  { %2394 = vmatprep.subr.bf16.mxu0 %v3317_v17  ;;  %v3324_v26 = vpack.c.bf16 %v294_v24, %v290_v23  ;;  %v301_v27 = vld [vmem:[#allocation10 + $0x68] sm:$0xff]  ;;  %v303_v29 = vld [vmem:[#allocation10 + $0x78] sm:$0xff]  ;;  %v296_v32 = vld [vmem:[#allocation10 + $0x40] sm:$0xff] }
  0x53   :  { %2426 = vmatprep.subr.bf16.mxu1 %v3319_v21  ;;  %v3328_v30 = vpack.c.bf16 %v301_v27, %v297_v25  ;;  %v3330_v31 = vpack.c.bf16 %v303_v29, %v299_v28  ;;  %v300_v33 = vld [vmem:[#allocation10 + $0x60] sm:$0xff]  ;;  %v298_v34 = vld [vmem:[#allocation10 + $0x50] sm:$0xff]  ;;  %v305_v37 = vld [vmem:[#allocation10 + $0x88] sm:$0xff]  ;;  %p3140_p7 = por %p3139_p6, %p3138_p5 }
  0x54   :  { %2357 = vmatmul.mubr.msk.f32.vlgmr.msra.gmra.mrb[0].mxu0 %vm113_vm0, %v81_v12  ;;  %2359 = vmatmul.mubr.msk.f32.vlgmr.msra.gmra.mrb[0].mxu1 %vm113_vm0, %v81_v12  ;;  %v3334_v35 = vpack.c.bf16 %v300_v33, %v296_v32  ;;  %v302_v36 = vld [vmem:[#allocation10 + $0x70] sm:$0xff]  ;;  %v309_v38 = vld [vmem:[#allocation10 + $0xa8] sm:$0xff]  ;;  %v307_v41 = vld [vmem:[#allocation10 + $0x98] sm:$0xff] }
  0x55   :  { %2396 = vmatpush1.bf16.msra.mxu0 %v3321_v22  ;;  %2428 = vmatpush1.bf16.msra.mxu1 %v3324_v26  ;;  %v3338_v39 = vpack.c.bf16 %v302_v36, %v298_v34  ;;  %v3340_v40 = vpack.c.bf16 %v309_v38, %v305_v37  ;;  %v311_v42 = vld [vmem:[#allocation10 + $0xb8] sm:$0xff]  ;;  %v304_v43 = vld [vmem:[#allocation10 + $0x80] sm:$0xff]  ;;  %v306_v46 = vld [vmem:[#allocation10 + $0x90] sm:$0xff]  ;;  %p3141_p8 = pnand %p3140_p7, %p3134_p4 }
  0x56   :  { %2398 = vmatprep.subr.bf16.mxu0 %v3328_v30  ;;  %2430 = vmatprep.subr.bf16.mxu1 %v3330_v31  ;;  %v3343_v44 = vpack.c.bf16 %v311_v42, %v307_v41  ;;  %v308_v45 = vld [vmem:[#allocation10 + $0xa0] sm:$0xff]  ;;  %v310_v47 = vld [vmem:[#allocation10 + $0xb0] sm:$0xff]  ;;  %v313_v48 = vld [vmem:[#allocation10 + $0xc8] sm:$0xff] }
  0x57   :  { %190 = vmatprep.mubr.f32.mxu0 %v3217_v0  ;;  %v317_v49 = vld [vmem:[#allocation10 + $0xe8] sm:$0xff]  ;;  %v315_v50 = vld [vmem:[#allocation10 + $0xd8] sm:$0xff]  ;;  %267 = vmatprep.mubr.f32.mxu1 %v3217_v0  ;;  %v3348_v51 = vpack.c.bf16 %v308_v45, %v304_v43  ;;  %v3352_v53 = vpack.c.bf16 %v310_v47, %v306_v46  ;;  %v312_v55 = vld [vmem:[#allocation10 + $0xc0] sm:$0xff] }
  0x58   :  { %v319_v52 = vld [vmem:[#allocation10 + $0xf8] sm:$0xff]  ;;  %v3354_v54 = vpack.c.bf16 %v317_v49, %v313_v48  ;;  %v316_v56 = vld [vmem:[#allocation10 + $0xe0] sm:$0xff]  ;;  %v314_v57 = vld [vmem:[#allocation10 + $0xd0] sm:$0xff] }
  0x59   :  { %2400 = vmatpush1.bf16.msra.mxu0 %v3334_v35  ;;  %2432 = vmatpush1.bf16.msra.mxu1 %v3338_v39  ;;  %v3357_v58 = vpack.c.bf16 %v319_v52, %v315_v50  ;;  %v318_v59 = vld [vmem:[#allocation10 + $0xf0] sm:$0xff]  ;;  %v321_v60 = vld [vmem:[#allocation10 + $0x108] sm:$0xff]  ;;  %v323_v62 = vld [vmem:[#allocation10 + $0x118] sm:$0xff]  ;;  %v3360_v1 = vpack.c.bf16 %v316_v56, %v312_v55 }
  0x5a   :  { %2402 = vmatprep.subr.bf16.mxu0 %v3340_v40  ;;  %2434 = vmatprep.subr.bf16.mxu1 %v3343_v44  ;;  %v325_v61 = vld [vmem:[#allocation10 + $0x128] sm:$0xff]  ;;  %v327_v63 = vld [vmem:[#allocation10 + $0x138] sm:$0xff]  ;;  %v3364_v2 = vpack.c.bf16 %v318_v59, %v314_v57  ;;  %v320_v4 = vld [vmem:[#allocation10 + $0x100] sm:$0xff] }
  0x5b   :  { %v3366_v3 = vpack.c.bf16 %v325_v61, %v321_v60  ;;  %v324_v5 = vld [vmem:[#allocation10 + $0x120] sm:$0xff]  ;;  %v322_v6 = vld [vmem:[#allocation10 + $0x110] sm:$0xff]  ;;  %v3369_v7 = vpack.c.bf16 %v327_v63, %v323_v62  ;;  %v329_v9 = vld [vmem:[#allocation10 + $0x148] sm:$0xff]  ;;  %v93_v63 = vlaneseq }
  0x5c   :  { %v326_v8 = vld [vmem:[#allocation10 + $0x130] sm:$0xff]  ;;  %v333_v10 = vld [vmem:[#allocation10 + $0x168] sm:$0xff]  ;;  %v331_v11 = vld [vmem:[#allocation10 + $0x158] sm:$0xff]  ;;  %v3372_v13 = vpack.c.bf16 %v324_v5, %v320_v4 }
  0x5d   :  { %2404 = vmatpush1.bf16.msra.mxu0 %v3348_v51  ;;  %2436 = vmatpush1.bf16.msra.mxu1 %v3352_v53  ;;  %v335_v12 = vld [vmem:[#allocation10 + $0x178] sm:$0xff]  ;;  %v328_v14 = vld [vmem:[#allocation10 + $0x140] sm:$0xff]  ;;  %v3376_v15 = vpack.c.bf16 %v326_v8, %v322_v6  ;;  %v3378_v16 = vpack.c.bf16 %v333_v10, %v329_v9  ;;  %v330_v19 = vld [vmem:[#allocation10 + $0x150] sm:$0xff]  ;;  %v94_v4 = vshrl.u32 %v93_v63, 7 }
  0x5e   :  { %2406 = vmatprep.subr.bf16.mxu0 %v3354_v54  ;;  %2438 = vmatprep.subr.bf16.mxu1 %v3357_v58  ;;  %v332_v18 = vld [vmem:[#allocation10 + $0x160] sm:$0xff]  ;;  %v82_v20 = vld [vmem:[#allocation5 + $0x8] sm:$0xff]  ;;  %v3381_v23 = vpack.c.bf16 %v335_v12, %v331_v11  ;;  %v334_v24 = vld [vmem:[#allocation10 + $0x170] sm:$0xff] }
  0x5f   :  { %v337_v25 = vld [vmem:[#allocation10 + $0x188] sm:$0xff]  ;;  %2358 = vmatmul.mubr.msk.f32.gmra.mrb[2].mxu0 %vm113_vm0, %v82_v20  ;;  %v339_v28 = vld [vmem:[#allocation10 + $0x198] sm:$0xff]  ;;  %2360 = vmatmul.mubr.msk.f32.gmra.mrb[2].mxu1 %vm113_vm0, %v82_v20  ;;  %v3387_v32 = vpack.c.bf16 %v332_v18, %v328_v14  ;;  %v3392_v33 = vpack.c.bf16 %v334_v24, %v330_v19  ;;  %v336_v36 = vld [vmem:[#allocation10 + $0x180] sm:$0xff]  ;;  %v95_v5 = vsub.s32 0, %v94_v4  ;;  %v99_v8 = vsub.s32 1, %v94_v4 }
  0x60   :  { %v341_v27 = vld [vmem:[#allocation10 + $0x1a8] sm:$0xff]  ;;  %v343_v29 = vld [vmem:[#allocation10 + $0x1b8] sm:$0xff]  ;;  %416 = vmatprep.mubr.f32.mxu0 %v3217_v0  ;;  %487 = vmatprep.mubr.f32.mxu1 %v3217_v0  ;;  %v340_v37 = vld [vmem:[#allocation10 + $0x1a0] sm:$0xff]  ;;  %v103_v9 = vsub.s32 2, %v94_v4  ;;  %v107_v10 = vsub.s32 3, %v94_v4 }
  0x61   :  { %2408 = vmatpush1.bf16.msra.mxu0 %v3360_v1  ;;  %2440 = vmatpush1.bf16.msra.mxu1 %v3364_v2  ;;  %v3394_v34 = vpack.c.bf16 %v341_v27, %v337_v25  ;;  %v338_v38 = vld [vmem:[#allocation10 + $0x190] sm:$0xff]  ;;  %v3397_v41 = vpack.c.bf16 %v343_v29, %v339_v28  ;;  %v345_v43 = vld [vmem:[#allocation10 + $0x1c8] sm:$0xff]  ;;  %v347_v46 = vld [vmem:[#allocation10 + $0x1d8] sm:$0xff]  ;;  %v3400_v48 = vpack.c.bf16 %v340_v37, %v336_v36 }
  0x62   :  { %2410 = vmatprep.subr.bf16.mxu0 %v3366_v3  ;;  %2442 = vmatprep.subr.bf16.mxu1 %v3369_v7  ;;  %v342_v42 = vld [vmem:[#allocation10 + $0x1b0] sm:$0xff]  ;;  %v349_v45 = vld [vmem:[#allocation10 + $0x1e8] sm:$0xff]  ;;  %v351_v47 = vld [vmem:[#allocation10 + $0x1f8] sm:$0xff] }
  0x63   :  { %v3404_v49 = vpack.c.bf16 %v342_v42, %v338_v38  ;;  %v3406_v50 = vpack.c.bf16 %v349_v45, %v345_v43  ;;  %v344_v52 = vld [vmem:[#allocation10 + $0x1c0] sm:$0xff]  ;;  %v3409_v56 = vpack.c.bf16 %v351_v47, %v347_v46  ;;  %v346_v57 = vld [vmem:[#allocation10 + $0x1d0] sm:$0xff]  ;;  %v282_v62 = vld [vmem:[#allocation2] sm:$0x3] }
  0x64   :  { %v348_v55 = vld [vmem:[#allocation10 + $0x1e0] sm:$0xff]  ;;  %v350_v59 = vld [vmem:[#allocation10 + $0x1f0] sm:$0xff] }
  0x65   :  { %2412 = vmatpush1.bf16.msra.mxu0 %v3372_v13  ;;  %2444 = vmatpush1.bf16.msra.mxu1 %v3376_v15  ;;  %v3412_v60 = vpack.c.bf16 %v348_v55, %v344_v52  ;;  %v3416_v61 = vpack.c.bf16 %v350_v59, %v346_v57  ;;  %v91_v6 = vld [vmem:[#allocation11] sm:$0xf] }
  0x66   :  { %2414 = vmatprep.subr.bf16.mxu0 %v3378_v16  ;;  %2446 = vmatprep.subr.bf16.mxu1 %v3381_v23  ;;  %v96_v11 = vrot.slane %v91_v6, %v95_v5  ;;  %v100_v12 = vrot.slane %v91_v6, %v99_v8  ;;  %v104_v14 = vrot.slane %v91_v6, %v103_v9 }
  0x67   :  { %v108_v18 = vrot.slane %v91_v6, %v107_v10 }
  0x69   :  { %2416 = vmatpush1.bf16.msra.mxu0 %v3387_v32  ;;  %2448 = vmatpush1.bf16.msra.mxu1 %v3392_v33 }
  0x6a   :  { %2418 = vmatprep.subr.bf16.mxu0 %v3394_v34  ;;  %2450 = vmatprep.subr.bf16.mxu1 %v3397_v41 }
  0x6d   :  { %2420 = vmatpush1.bf16.msra.mxu0 %v3400_v48  ;;  %2452 = vmatpush1.bf16.msra.mxu1 %v3404_v49 }
  0x6e   :  { %2422 = vmatprep.subr.bf16.mxu0 %v3406_v50  ;;  %2454 = vmatprep.subr.bf16.mxu1 %v3409_v56 }
  0x71   :  { %2424 = vmatpush1.bf16.msra.mxu0 %v3412_v60  ;;  %2456 = vmatpush1.bf16.msra.mxu1 %v3416_v61 }
  0x72   :  { %2458 = vmatprep.subr.bf16.mxu0 %v3317_v17  ;;  %2490 = vmatprep.subr.bf16.mxu1 %v3319_v21 }
  0x74   :  { %417 = vmatmul.mubr.f32.vlgmr.msra.gmra.mrb[4].mxu0 %v282_v62  ;;  %488 = vmatmul.mubr.f32.vlgmr.msra.gmra.mrb[4].mxu1 %v282_v62 }
  0x75   :  { %2460 = vmatpush1.bf16.msra.mxu0 %v3321_v22  ;;  %2492 = vmatpush1.bf16.msra.mxu1 %v3324_v26 }
  0x76   :  { %2462 = vmatprep.subr.bf16.mxu0 %v3328_v30  ;;  %2494 = vmatprep.subr.bf16.mxu1 %v3330_v31 }
  0x77   :  { %655 = vmatprep.mubr.f32.mxu0 %v3217_v0  ;;  %726 = vmatprep.mubr.f32.mxu1 %v3217_v0 }
  0x79   :  { %2464 = vmatpush1.bf16.msra.mxu0 %v3334_v35  ;;  %2496 = vmatpush1.bf16.msra.mxu1 %v3338_v39 }
  0x7a   :  { %2466 = vmatprep.subr.bf16.mxu0 %v3340_v40  ;;  %2498 = vmatprep.subr.bf16.mxu1 %v3343_v44 }
  0x7d   :  { %2468 = vmatpush1.bf16.msra.mxu0 %v3348_v51  ;;  %2500 = vmatpush1.bf16.msra.mxu1 %v3352_v53 }
  0x7e   :  { %2470 = vmatprep.subr.bf16.mxu0 %v3354_v54  ;;  %2502 = vmatprep.subr.bf16.mxu1 %v3357_v58 }
  0x81   :  { %2472 = vmatpush1.bf16.msra.mxu0 %v3360_v1  ;;  %2504 = vmatpush1.bf16.msra.mxu1 %v3364_v2 }
  0x82   :  { %2474 = vmatprep.subr.bf16.mxu0 %v3366_v3  ;;  %2506 = vmatprep.subr.bf16.mxu1 %v3369_v7 }
  0x85   :  { %2476 = vmatpush1.bf16.msra.mxu0 %v3372_v13  ;;  %2508 = vmatpush1.bf16.msra.mxu1 %v3376_v15 }
  0x86   :  { %2478 = vmatprep.subr.bf16.mxu0 %v3378_v16  ;;  %2510 = vmatprep.subr.bf16.mxu1 %v3381_v23 }
  0x89   :  { %2480 = vmatpush1.bf16.msra.mxu0 %v3387_v32  ;;  %2512 = vmatpush1.bf16.msra.mxu1 %v3392_v33 }
  0x8a   :  { %2482 = vmatprep.subr.bf16.mxu0 %v3394_v34  ;;  %2514 = vmatprep.subr.bf16.mxu1 %v3397_v41 }
  0x8d   :  { %2484 = vmatpush1.bf16.msra.mxu0 %v3400_v48  ;;  %2516 = vmatpush1.bf16.msra.mxu1 %v3404_v49 }
  0x8e   :  { %2486 = vmatprep.subr.bf16.mxu0 %v3406_v50  ;;  %2518 = vmatprep.subr.bf16.mxu1 %v3409_v56 }
  0x91   :  { %2488 = vmatpush1.bf16.msra.mxu0 %v3412_v60  ;;  %2520 = vmatpush1.bf16.msra.mxu1 %v3416_v61 }
  0x92   :  { %2522 = vmatprep.subr.bf16.mxu0 %v3317_v17  ;;  %2554 = vmatprep.subr.bf16.mxu1 %v3319_v21 }
 0x127   :  { %v186_v19 = vpop.f32.mrb[0].mxu0  ;;  %v263_v25 = vpop.f32.mrb[0].mxu1 }
 0x128   :  { %v187_v20 = vadd.f32 %v186_v19, %v96_v11  ;;  %v188_v24 = vpop.f32.mrb[1].mxu0  ;;  %v264_v28 = vadd.f32 %v263_v25, %v104_v14  ;;  %v265_v17 = vpop.f32.mrb[1].mxu1 }
 0x129   :  { %v189_v27 = vadd.f32 %v188_v24, %v100_v12  ;;  %v266_v21 = vadd.f32 %v265_v17, %v108_v18 }
 0x12a   :  { %274 = vst [vmem:[#allocation4] sm:$0xff] %v187_v20  ;;  %276 = vst [vmem:[#allocation4 + $0x10] sm:$0xff] %v264_v28 }
 0x12b   :  { %275 = vst [vmem:[#allocation4 + $0x8] sm:$0xff] %v189_v27  ;;  %277 = vst [vmem:[#allocation4 + $0x18] sm:$0xff] %v266_v21  ;;  %v283_v27 = vld [vmem:[#allocation3] sm:$0x3] }
 0x131   :  { %v284_v47 = vld [vmem:[#allocation4] sm:$0x3]  ;;  %v286_v10 = vld [vmem:[#allocation4 + $0x10] sm:$0x3] }
 0x132   :  { %v192_v29 = vpop.f32.mrb[2].mxu0  ;;  %v269_v38 = vpop.f32.mrb[2].mxu1  ;;  %v285_v59 = vld [vmem:[#allocation4 + $0x8] sm:$0x3]  ;;  %v287_v8 = vld [vmem:[#allocation4 + $0x18] sm:$0x3] }
 0x133   :  { %v193_v36 = vadd.f32 %v192_v29, %v96_v11  ;;  %v194_v37 = vpop.f32.mrb[3].mxu0  ;;  %v270_v43 = vadd.f32 %v269_v38, %v104_v14  ;;  %v271_v45 = vpop.f32.mrb[3].mxu1 }
 0x134   :  { %v195_v42 = vadd.f32 %v194_v37, %v100_v12  ;;  %v272_v46 = vadd.f32 %v271_v45, %v108_v18 }
 0x135   :  { %278 = vst [vmem:[#allocation4 + $0x20] sm:$0xff] %v193_v36  ;;  %280 = vst [vmem:[#allocation4 + $0x30] sm:$0xff] %v270_v43 }
 0x136   :  { %279 = vst [vmem:[#allocation4 + $0x28] sm:$0xff] %v195_v42  ;;  %281 = vst [vmem:[#allocation4 + $0x38] sm:$0xff] %v272_v46 }
 0x147   :  { %v418_v52 = vpop.f32.mrb[4].mxu0  ;;  %v489_v57 = vpop.f32.mrb[4].mxu1 }
 0x148   :  { %v494_v55 = vadd.f32 %v418_v52, %v284_v47  ;;  %v420_v62 = vpop.f32.mrb[5].mxu0  ;;  %v491_v4 = vpop.f32.mrb[5].mxu1  ;;  %v496_v12 = vadd.f32 %v489_v57, %v286_v10 }
 0x149   :  { %v495_v63 = vadd.f32 %v420_v62, %v285_v59  ;;  %v497_v9 = vadd.f32 %v491_v4, %v287_v8  ;;  %v1039_v59 = vld [vmem:[#allocation10 + $0x8] sm:$0xff]  ;;  %v1042_v8 = vld [vmem:[#allocation10 + $0x20] sm:$0xff] }
 0x14a   :  { %v2361_v5 = vmul.f32 -1.442695, %v494_v55  ;;  %v1043_v62 = vld [vmem:[#allocation10 + $0x28] sm:$0xff] }
 0x14b   :  { %v2362_v6 = vmul.f32 -1.442695, %v495_v63  ;;  %v2363_v11 = vmul.f32 -1.442695, %v497_v9  ;;  %v1041_v63 = vld [vmem:[#allocation10 + $0x18] sm:$0xff]  ;;  %v3498_v4 = vpack.c.bf16 %v1043_v62, %v1039_v59 }
 0x14c   :  { %2917 = vpow2.f32 %v2361_v5  ;;  %v1045_v5 = vld [vmem:[#allocation10 + $0x38] sm:$0xff] }
 0x14d   :  { %2919 = vpow2.f32 %v2362_v6  ;;  %v1038_v6 = vld [vmem:[#allocation10] sm:$0xff]  ;;  %v3500_v9 = vpack.c.bf16 %v1045_v5, %v1041_v63  ;;  %v1081_v59 = vld [vmem:[#allocation10 + $0x158] sm:$0xff] }
 0x14e   :  { %2921 = vpow2.f32 %v2363_v11  ;;  %v3502_v10 = vpack.c.bf16 %v1042_v8, %v1038_v6  ;;  %v1040_v11 = vld [vmem:[#allocation10 + $0x10] sm:$0xff]  ;;  %v1085_v62 = vld [vmem:[#allocation10 + $0x178] sm:$0xff]  ;;  %v1078_v6 = vld [vmem:[#allocation10 + $0x140] sm:$0xff] }
 0x14f   :  { %2923 = vtanh.f32 %v496_v12  ;;  %v1044_v12 = vld [vmem:[#allocation10 + $0x30] sm:$0xff]  ;;  %v3559_v5 = vpack.c.bf16 %v1085_v62, %v1081_v59  ;;  %v1082_v8 = vld [vmem:[#allocation10 + $0x160] sm:$0xff]  ;;  %v778_v59 = vld [vmem:[#allocation4 + $0x8] sm:$0x30] }
 0x156   :  { %v2918_v14 = vpop.eup %2917 }
 0x157   :  { %v2920_v18 = vpop.eup %2919  ;;  %v501_v19 = vadd.f32 1.0, %v2918_v14  ;;  %v3505_v14 = vpack.c.bf16 %v1044_v12, %v1040_v11  ;;  %v1080_v11 = vld [vmem:[#allocation10 + $0x150] sm:$0xff]  ;;  %v3562_v12 = vpack.c.bf16 %v1082_v8, %v1078_v6 }
 0x158   :  { %v507_v20 = vadd.f32 1.0, %v2920_v18  ;;  %v2922_v24 = vpop.eup %2921  ;;  %v1047_v18 = vld [vmem:[#allocation10 + $0x48] sm:$0xff] }
 0x159   :  { %2925 = vrcp.f32 %v501_v19  ;;  %v2924_v25 = vpop.eup %2923  ;;  %v514_v29 = vadd.f32 1.0, %v2922_v24  ;;  %v1051_v19 = vld [vmem:[#allocation10 + $0x68] sm:$0xff] }
 0x15a   :  { %2927 = vrcp.f32 %v507_v20  ;;  %v1049_v20 = vld [vmem:[#allocation10 + $0x58] sm:$0xff]  ;;  %v3510_v24 = vpack.c.bf16 %v1051_v19, %v1047_v18  ;;  %v1084_v18 = vld [vmem:[#allocation10 + $0x170] sm:$0xff]  ;;  %v1087_v19 = vld [vmem:[#allocation10 + $0x188] sm:$0xff] }
 0x15b   :  { %2929 = vrcp.f32 %v514_v29  ;;  %v1048_v29 = vld [vmem:[#allocation10 + $0x50] sm:$0xff] }
 0x163   :  { %v2926_v28 = vpop.eup %2925 }
 0x164   :  { %v2928_v17 = vpop.eup %2927  ;;  %v518_v21 = vmul.f32 %v2926_v28, %v2924_v25  ;;  %v1053_v25 = vld [vmem:[#allocation10 + $0x78] sm:$0xff]  ;;  %v1050_v28 = vld [vmem:[#allocation10 + $0x60] sm:$0xff] }
 0x165   :  { %v517_v36 = vmul.f32 %v2928_v17, %v283_v27  ;;  %v2930_v38 = vpop.eup %2929  ;;  %v1046_v27 = vld [vmem:[#allocation10 + $0x40] sm:$0xff]  ;;  %v3512_v17 = vpack.c.bf16 %v1053_v25, %v1049_v20  ;;  %v1091_v20 = vld [vmem:[#allocation10 + $0x1a8] sm:$0xff]  ;;  %v3566_v25 = vpack.c.bf16 %v1084_v18, %v1080_v11 }
 0x166   :  { %v780_v18 = vld [vmem:[#allocation4 + $0x18] sm:$0x30] }
 0x167   :  { %v3457_v37 = vadd.f32 %v518_v21, %v517_v36  ;;  %v3514_v21 = vpack.c.bf16 %v1050_v28, %v1046_v27  ;;  %v1052_v36 = vld [vmem:[#allocation10 + $0x70] sm:$0xff]  ;;  %v3568_v27 = vpack.c.bf16 %v1091_v20, %v1087_v19  ;;  %v1089_v28 = vld [vmem:[#allocation10 + $0x198] sm:$0xff] }
 0x169   :  { %2931 = vtanh.f32 %v3457_v37 }
 0x173   :  { %v2932_v42 = vpop.eup %2931 }
 0x174   :  { %v521_v43 = vmul.f32 %v2932_v42, %v2930_v38  ;;  %v1055_v38 = vld [vmem:[#allocation10 + $0x88] sm:$0xff] }
 0x175   :  { %v1059_v42 = vld [vmem:[#allocation10 + $0xa8] sm:$0xff] }
 0x176   :  { %522 = vst [vmem:[#allocation13] sm:$0x3] %v521_v43  ;;  %656 = vmatmul.mubr.f32.vlgmr.msra.gmra.mrb[6].mxu0 %v521_v43  ;;  %727 = vmatmul.mubr.f32.vlgmr.msra.gmra.mrb[6].mxu1 %v521_v43  ;;  %v1057_v43 = vld [vmem:[#allocation10 + $0x98] sm:$0xff] }
 0x177   :  { %2524 = vmatpush1.bf16.msra.mxu0 %v3321_v22  ;;  %2556 = vmatpush1.bf16.msra.mxu1 %v3324_v26 }
 0x178   :  { %2526 = vmatprep.subr.bf16.mxu0 %v3328_v30  ;;  %2558 = vmatprep.subr.bf16.mxu1 %v3330_v31 }
 0x179   :  { %912 = vmatprep.mubr.f32.mxu0 %v3217_v0  ;;  %983 = vmatprep.mubr.f32.mxu1 %v3217_v0 }
 0x17b   :  { %2528 = vmatpush1.bf16.msra.mxu0 %v3334_v35  ;;  %2560 = vmatpush1.bf16.msra.mxu1 %v3338_v39  ;;  %v523_v39 = vld [vmem:[#allocation4] sm:$0xc] }
 0x17c   :  { %2530 = vmatprep.subr.bf16.mxu0 %v3340_v40  ;;  %2562 = vmatprep.subr.bf16.mxu1 %v3343_v44 }
 0x17f   :  { %2532 = vmatpush1.bf16.msra.mxu0 %v3348_v51  ;;  %2564 = vmatpush1.bf16.msra.mxu1 %v3352_v53  ;;  %v524_v51 = vld [vmem:[#allocation4 + $0x8] sm:$0xc] }
 0x180   :  { %2534 = vmatprep.subr.bf16.mxu0 %v3354_v54  ;;  %2566 = vmatprep.subr.bf16.mxu1 %v3357_v58 }
 0x183   :  { %2536 = vmatpush1.bf16.msra.mxu0 %v3360_v1  ;;  %2568 = vmatpush1.bf16.msra.mxu1 %v3364_v2  ;;  %v526_v2 = vld [vmem:[#allocation4 + $0x18] sm:$0xc] }
 0x184   :  { %2538 = vmatprep.subr.bf16.mxu0 %v3366_v3  ;;  %2570 = vmatprep.subr.bf16.mxu1 %v3369_v7 }
 0x187   :  { %2540 = vmatpush1.bf16.msra.mxu0 %v3372_v13  ;;  %2572 = vmatpush1.bf16.msra.mxu1 %v3376_v15  ;;  %v525_v13 = vld [vmem:[#allocation4 + $0x10] sm:$0xc] }
 0x188   :  { %2542 = vmatprep.subr.bf16.mxu0 %v3378_v16  ;;  %2574 = vmatprep.subr.bf16.mxu1 %v3381_v23 }
 0x18b   :  { %2544 = vmatpush1.bf16.msra.mxu0 %v3387_v32  ;;  %2576 = vmatpush1.bf16.msra.mxu1 %v3392_v33 }
 0x18c   :  { %2546 = vmatprep.subr.bf16.mxu0 %v3394_v34  ;;  %2578 = vmatprep.subr.bf16.mxu1 %v3397_v41 }
 0x18f   :  { %2548 = vmatpush1.bf16.msra.mxu0 %v3400_v48  ;;  %2580 = vmatpush1.bf16.msra.mxu1 %v3404_v49 }
 0x190   :  { %2550 = vmatprep.subr.bf16.mxu0 %v3406_v50  ;;  %2582 = vmatprep.subr.bf16.mxu1 %v3409_v56  ;;  %v769_v50 = vrot.slane %v3457_v37, 6  ;;  %v3517_v37 = vpack.c.bf16 %v1052_v36, %v1048_v29  ;;  %v1093_v29 = vld [vmem:[#allocation10 + $0x1b8] sm:$0xff]  ;;  %v1086_v36 = vld [vmem:[#allocation10 + $0x180] sm:$0xff] }
 0x193   :  { %2552 = vmatpush1.bf16.msra.mxu0 %v3412_v60  ;;  %2584 = vmatpush1.bf16.msra.mxu1 %v3416_v61 }
 0x194   :  { %2586 = vmatprep.subr.bf16.mxu0 %v3498_v4  ;;  %2618 = vmatprep.subr.bf16.mxu1 %v3500_v9 }
 0x249   :  { %v657_v22 = vpop.f32.mrb[6].mxu0  ;;  %v728_v26 = vpop.f32.mrb[6].mxu1 }
 0x24a   :  { %v737_v30 = vrot.slane %v657_v22, 6  ;;  %v659_v31 = vpop.f32.mrb[7].mxu0  ;;  %v730_v35 = vpop.f32.mrb[7].mxu1  ;;  %v739_v7 = vrot.slane %v728_v26, 6  ;;  %v3522_v22 = vpack.c.bf16 %v1059_v42, %v1055_v38  ;;  %v1061_v26 = vld [vmem:[#allocation10 + $0xb8] sm:$0xff]  ;;  %v3570_v38 = vpack.c.bf16 %v1093_v29, %v1089_v28  ;;  %v1090_v42 = vld [vmem:[#allocation10 + $0x1a0] sm:$0xff] }
 0x24b   :  { %v738_v40 = vrot.slane %v659_v31, 6  ;;  %v740_v1 = vrot.slane %v730_v35, 6  ;;  %v1058_v31 = vld [vmem:[#allocation10 + $0xa0] sm:$0xff]  ;;  %v3524_v35 = vpack.c.bf16 %v1061_v26, %v1057_v43  ;;  %v1088_v43 = vld [vmem:[#allocation10 + $0x190] sm:$0xff] }
 0x24c   :  { %v745_v44 = vadd.f32 %v737_v30, %v523_v39  ;;  %v747_v16 = vadd.f32 %v739_v7, %v525_v13  ;;  %v1054_v30 = vld [vmem:[#allocation10 + $0x80] sm:$0xff]  ;;  %v1092_v26 = vld [vmem:[#allocation10 + $0x1b0] sm:$0xff] }
 0x24d   :  { %v746_v53 = vadd.f32 %v738_v40, %v524_v51  ;;  %v748_v3 = vadd.f32 %v740_v1, %v526_v2  ;;  %v3526_v39 = vpack.c.bf16 %v1058_v31, %v1054_v30  ;;  %v1056_v40 = vld [vmem:[#allocation10 + $0x90] sm:$0xff]  ;;  %v1069_v2 = vld [vmem:[#allocation10 + $0xf8] sm:$0xff]  ;;  %v1066_v7 = vld [vmem:[#allocation10 + $0xe0] sm:$0xff]  ;;  %v3573_v30 = vpack.c.bf16 %v1090_v42, %v1086_v36 }
 0x24e   :  { %v2364_v54 = vmul.f32 -1.442695, %v745_v44  ;;  %v1060_v44 = vld [vmem:[#allocation10 + $0xb0] sm:$0xff]  ;;  %v1095_v31 = vld [vmem:[#allocation10 + $0x1c8] sm:$0xff]  ;;  %v779_v28 = vld [vmem:[#allocation4 + $0x10] sm:$0x30] }
 0x24f   :  { %v2365_v58 = vmul.f32 -1.442695, %v746_v53  ;;  %v2366_v15 = vmul.f32 -1.442695, %v748_v3  ;;  %v3529_v51 = vpack.c.bf16 %v1060_v44, %v1056_v40  ;;  %v1063_v53 = vld [vmem:[#allocation10 + $0xc8] sm:$0xff]  ;;  %v1062_v3 = vld [vmem:[#allocation10 + $0xc0] sm:$0xff] }
 0x250   :  { %2933 = vpow2.f32 %v2364_v54  ;;  %v1067_v54 = vld [vmem:[#allocation10 + $0xe8] sm:$0xff]  ;;  %v1097_v44 = vld [vmem:[#allocation10 + $0x1d8] sm:$0xff] }
 0x251   :  { %2935 = vpow2.f32 %v2365_v58  ;;  %v1065_v58 = vld [vmem:[#allocation10 + $0xd8] sm:$0xff]  ;;  %v3534_v1 = vpack.c.bf16 %v1067_v54, %v1063_v53  ;;  %v1099_v40 = vld [vmem:[#allocation10 + $0x1e8] sm:$0xff]  ;;  %v3577_v53 = vpack.c.bf16 %v1092_v26, %v1088_v43 }
 0x252   :  { %2937 = vpow2.f32 %v2366_v15  ;;  %v3536_v13 = vpack.c.bf16 %v1069_v2, %v1065_v58  ;;  %v3538_v15 = vpack.c.bf16 %v1066_v7, %v1062_v3  ;;  %v3579_v54 = vpack.c.bf16 %v1099_v40, %v1095_v31  ;;  %v1101_v58 = vld [vmem:[#allocation10 + $0x1f8] sm:$0xff]  ;;  %v1094_v2 = vld [vmem:[#allocation10 + $0x1c0] sm:$0xff] }
 0x253   :  { %2939 = vtanh.f32 %v747_v16  ;;  %v1064_v16 = vld [vmem:[#allocation10 + $0xd0] sm:$0xff]  ;;  %v1098_v3 = vld [vmem:[#allocation10 + $0x1e0] sm:$0xff]  ;;  %v3582_v7 = vpack.c.bf16 %v1101_v58, %v1097_v44 }
 0x25a   :  { %v2934_v23 = vpop.eup %2933 }
 0x25b   :  { %v2936_v32 = vpop.eup %2935  ;;  %v752_v33 = vadd.f32 1.0, %v2934_v23  ;;  %v1068_v23 = vld [vmem:[#allocation10 + $0xf0] sm:$0xff] }
 0x25c   :  { %v758_v34 = vadd.f32 1.0, %v2936_v32  ;;  %v2938_v41 = vpop.eup %2937  ;;  %v3541_v32 = vpack.c.bf16 %v1068_v23, %v1064_v16  ;;  %v1096_v16 = vld [vmem:[#allocation10 + $0x1d0] sm:$0xff] }
 0x25d   :  { %2941 = vrcp.f32 %v752_v33  ;;  %v2940_v48 = vpop.eup %2939  ;;  %v765_v61 = vadd.f32 1.0, %v2938_v41  ;;  %v1071_v33 = vld [vmem:[#allocation10 + $0x108] sm:$0xff]  ;;  %v1073_v41 = vld [vmem:[#allocation10 + $0x118] sm:$0xff]  ;;  %v1100_v23 = vld [vmem:[#allocation10 + $0x1f0] sm:$0xff] }
 0x25e   :  { %2943 = vrcp.f32 %v758_v34  ;;  %v1075_v34 = vld [vmem:[#allocation10 + $0x128] sm:$0xff] }
 0x25f   :  { %2945 = vrcp.f32 %v765_v61 }
 0x267   :  { %v2942_v49 = vpop.eup %2941 }
 0x268   :  { %v2944_v56 = vpop.eup %2943  ;;  %v772_v60 = vmul.f32 %v2942_v49, %v2940_v48  ;;  %v3546_v48 = vpack.c.bf16 %v1075_v34, %v1071_v33  ;;  %v1077_v49 = vld [vmem:[#allocation10 + $0x138] sm:$0xff]  ;;  %v3585_v33 = vpack.c.bf16 %v1098_v3, %v1094_v2  ;;  %v3589_v34 = vpack.c.bf16 %v1100_v23, %v1096_v16 }
 0x269   :  { %v771_v45 = vmul.f32 %v2944_v56, %v769_v50  ;;  %v2946_v47 = vpop.eup %2945  ;;  %v1070_v50 = vld [vmem:[#allocation10 + $0x100] sm:$0xff] }
 0x26a   :  { %v1074_v56 = vld [vmem:[#allocation10 + $0x120] sm:$0xff] }
 0x26b   :  { %v3493_v46 = vadd.f32 %v772_v60, %v771_v45  ;;  %v3548_v60 = vpack.c.bf16 %v1077_v49, %v1073_v41  ;;  %v3550_v61 = vpack.c.bf16 %v1074_v56, %v1070_v50  ;;  %v1072_v45 = vld [vmem:[#allocation10 + $0x110] sm:$0xff] }
 0x26d   :  { %2947 = vtanh.f32 %v3493_v46  ;;  %v1026_v2 = vrot.slane %v3493_v46, 6 }
 0x277   :  { %v2948_v52 = vpop.eup %2947 }
 0x278   :  { %v775_v55 = vmul.f32 %v2948_v52, %v2946_v47  ;;  %v1076_v47 = vld [vmem:[#allocation10 + $0x130] sm:$0xff]  ;;  %v1079_v52 = vld [vmem:[#allocation10 + $0x148] sm:$0xff] }
 0x27a   :  { %776 = vst [vmem:[#allocation13] sm:$0xc] %v775_v55  ;;  %v846_v57 = vrot.slane %v775_v55, 2  ;;  %v3553_v55 = vpack.c.bf16 %v1076_v47, %v1072_v45  ;;  %v777_v47 = vld [vmem:[#allocation4] sm:$0x30] }
 0x27c   :  { %913 = vmatmul.mubr.f32.vlgmr.msra.gmra.mrb[8].mxu0 %v846_v57  ;;  %984 = vmatmul.mubr.f32.vlgmr.msra.gmra.mrb[8].mxu1 %v846_v57  ;;  %v1083_v57 = vld [vmem:[#allocation10 + $0x168] sm:$0xff] }
 0x27d   :  { %1169 = vmatprep.mubr.f32.mxu0 %v3217_v0  ;;  %1240 = vmatprep.mubr.f32.mxu1 %v3217_v0  ;;  %v3557_v63 = vpack.c.bf16 %v1083_v57, %v1079_v52 }
 0x27e   :  { %2588 = vmatpush1.bf16.msra.mxu0 %v3502_v10  ;;  %2620 = vmatpush1.bf16.msra.mxu1 %v3505_v14 }
 0x27f   :  { %2590 = vmatprep.subr.bf16.mxu0 %v3510_v24  ;;  %2622 = vmatprep.subr.bf16.mxu1 %v3512_v17 }
 0x282   :  { %2592 = vmatpush1.bf16.msra.mxu0 %v3514_v21  ;;  %2624 = vmatpush1.bf16.msra.mxu1 %v3517_v37 }
 0x283   :  { %2594 = vmatprep.subr.bf16.mxu0 %v3522_v22  ;;  %2626 = vmatprep.subr.bf16.mxu1 %v3524_v35 }
 0x286   :  { %2596 = vmatpush1.bf16.msra.mxu0 %v3526_v39  ;;  %2628 = vmatpush1.bf16.msra.mxu1 %v3529_v51 }
 0x287   :  { %2598 = vmatprep.subr.bf16.mxu0 %v3534_v1  ;;  %2630 = vmatprep.subr.bf16.mxu1 %v3536_v13 }
 0x28a   :  { %2600 = vmatpush1.bf16.msra.mxu0 %v3538_v15  ;;  %2632 = vmatpush1.bf16.msra.mxu1 %v3541_v32 }
 0x28b   :  { %2602 = vmatprep.subr.bf16.mxu0 %v3546_v48  ;;  %2634 = vmatprep.subr.bf16.mxu1 %v3548_v60 }
 0x28e   :  { %2604 = vmatpush1.bf16.msra.mxu0 %v3550_v61  ;;  %2636 = vmatpush1.bf16.msra.mxu1 %v3553_v55 }
 0x28f   :  { %2606 = vmatprep.subr.bf16.mxu0 %v3557_v63  ;;  %2638 = vmatprep.subr.bf16.mxu1 %v3559_v5 }
 0x292   :  { %2608 = vmatpush1.bf16.msra.mxu0 %v3562_v12  ;;  %2640 = vmatpush1.bf16.msra.mxu1 %v3566_v25 }
 0x293   :  { %2610 = vmatprep.subr.bf16.mxu0 %v3568_v27  ;;  %2642 = vmatprep.subr.bf16.mxu1 %v3570_v38 }
 0x296   :  { %2612 = vmatpush1.bf16.msra.mxu0 %v3573_v30  ;;  %2644 = vmatpush1.bf16.msra.mxu1 %v3577_v53 }
 0x297   :  { %2614 = vmatprep.subr.bf16.mxu0 %v3579_v54  ;;  %2646 = vmatprep.subr.bf16.mxu1 %v3582_v7 }
 0x29a   :  { %2616 = vmatpush1.bf16.msra.mxu0 %v3585_v33  ;;  %2648 = vmatpush1.bf16.msra.mxu1 %v3589_v34 }
 0x29b   :  { %2650 = vmatprep.subr.bf16.mxu0 %v3498_v4  ;;  %2682 = vmatprep.subr.bf16.mxu1 %v3500_v9 }
 0x34f   :  { %v914_v41 = vpop.f32.mrb[8].mxu0  ;;  %v985_v49 = vpop.f32.mrb[8].mxu1 }
 0x350   :  { %v994_v50 = vrot.slane %v914_v41, 4  ;;  %v916_v56 = vpop.f32.mrb[9].mxu0  ;;  %v987_v45 = vpop.f32.mrb[9].mxu1  ;;  %v996_v20 = vrot.slane %v985_v49, 4 }
 0x351   :  { %v995_v52 = vrot.slane %v916_v56, 4  ;;  %v997_v11 = vrot.slane %v987_v45, 4 }
 0x352   :  { %v1002_v57 = vadd.f32 %v994_v50, %v777_v47  ;;  %v1004_v36 = vadd.f32 %v996_v20, %v779_v28 }
 0x353   :  { %v1003_v62 = vadd.f32 %v995_v52, %v778_v59  ;;  %v1005_v19 = vadd.f32 %v997_v11, %v780_v18  ;;  %v1035_v18 = vld [vmem:[#allocation4 + $0x8] sm:$0xc0] }
 0x354   :  { %v2367_v6 = vmul.f32 -1.442695, %v1002_v57 }
 0x355   :  { %v2368_v8 = vmul.f32 -1.442695, %v1003_v62  ;;  %v2369_v29 = vmul.f32 -1.442695, %v1005_v19 }
 0x356   :  { %2949 = vpow2.f32 %v2367_v6  ;;  %v1034_v6 = vld [vmem:[#allocation4] sm:$0xc0] }
 0x357   :  { %2951 = vpow2.f32 %v2368_v8 }
 0x358   :  { %2953 = vpow2.f32 %v2369_v29 }
 0x359   :  { %2955 = vtanh.f32 %v1004_v36  ;;  %v1037_v36 = vld [vmem:[#allocation4 + $0x18] sm:$0xc0] }
 0x360   :  { %v2950_v42 = vpop.eup %2949 }
 0x361   :  { %v2952_v43 = vpop.eup %2951  ;;  %v1009_v26 = vadd.f32 1.0, %v2950_v42 }
 0x362   :  { %v1015_v31 = vadd.f32 1.0, %v2952_v43  ;;  %v2954_v40 = vpop.eup %2953 }
 0x363   :  { %2957 = vrcp.f32 %v1009_v26  ;;  %v2956_v44 = vpop.eup %2955  ;;  %v1022_v23 = vadd.f32 1.0, %v2954_v40  ;;  %v1036_v26 = vld [vmem:[#allocation4 + $0x10] sm:$0xc0] }
 0x364   :  { %2959 = vrcp.f32 %v1015_v31 }
 0x365   :  { %2961 = vrcp.f32 %v1022_v23 }
 0x36d   :  { %v2958_v58 = vpop.eup %2957 }
 0x36e   :  { %v2960_v3 = vpop.eup %2959  ;;  %v1029_v16 = vmul.f32 %v2958_v58, %v2956_v44 }
 0x36f   :  { %v1028_v41 = vmul.f32 %v2960_v3, %v1026_v2  ;;  %v2962_v50 = vpop.eup %2961 }
 0x371   :  { %v3597_v49 = vadd.f32 %v1029_v16, %v1028_v41 }
 0x373   :  { %2963 = vtanh.f32 %v3597_v49 }
 0x37d   :  { %v2964_v56 = vpop.eup %2963 }
 0x37e   :  { %v1032_v45 = vmul.f32 %v2964_v56, %v2962_v50  ;;  %v1283_v50 = vrot.slane %v3597_v49, 6  ;;  %v1291_v49 = vld [vmem:[#allocation4 + $0x20] sm:$0x3] }
 0x380   :  { %1033 = vst [vmem:[#allocation13] sm:$0x30] %v1032_v45  ;;  %v1103_v47 = vrot.slane %v1032_v45, 4 }
 0x382   :  { %1170 = vmatmul.mubr.f32.vlgmr.msra.gmra.mrb[10].mxu0 %v1103_v47  ;;  %1241 = vmatmul.mubr.f32.vlgmr.msra.gmra.mrb[10].mxu1 %v1103_v47 }
 0x383   :  { %2652 = vmatpush1.bf16.msra.mxu0 %v3502_v10  ;;  %2684 = vmatpush1.bf16.msra.mxu1 %v3505_v14 }
 0x384   :  { %2654 = vmatprep.subr.bf16.mxu0 %v3510_v24  ;;  %2686 = vmatprep.subr.bf16.mxu1 %v3512_v17 }
 0x385   :  { %1426 = vmatprep.mubr.f32.mxu0 %v3217_v0  ;;  %1497 = vmatprep.mubr.f32.mxu1 %v3217_v0 }
 0x387   :  { %2656 = vmatpush1.bf16.msra.mxu0 %v3514_v21  ;;  %2688 = vmatpush1.bf16.msra.mxu1 %v3517_v37 }
 0x388   :  { %2658 = vmatprep.subr.bf16.mxu0 %v3522_v22  ;;  %2690 = vmatprep.subr.bf16.mxu1 %v3524_v35 }
 0x38b   :  { %2660 = vmatpush1.bf16.msra.mxu0 %v3526_v39  ;;  %2692 = vmatpush1.bf16.msra.mxu1 %v3529_v51 }
 0x38c   :  { %2662 = vmatprep.subr.bf16.mxu0 %v3534_v1  ;;  %2694 = vmatprep.subr.bf16.mxu1 %v3536_v13 }
 0x38f   :  { %2664 = vmatpush1.bf16.msra.mxu0 %v3538_v15  ;;  %2696 = vmatpush1.bf16.msra.mxu1 %v3541_v32 }
 0x390   :  { %2666 = vmatprep.subr.bf16.mxu0 %v3546_v48  ;;  %2698 = vmatprep.subr.bf16.mxu1 %v3548_v60 }
 0x393   :  { %2668 = vmatpush1.bf16.msra.mxu0 %v3550_v61  ;;  %2700 = vmatpush1.bf16.msra.mxu1 %v3553_v55 }
 0x394   :  { %2670 = vmatprep.subr.bf16.mxu0 %v3557_v63  ;;  %2702 = vmatprep.subr.bf16.mxu1 %v3559_v5 }
 0x397   :  { %2672 = vmatpush1.bf16.msra.mxu0 %v3562_v12  ;;  %2704 = vmatpush1.bf16.msra.mxu1 %v3566_v25 }
 0x398   :  { %2674 = vmatprep.subr.bf16.mxu0 %v3568_v27  ;;  %2706 = vmatprep.subr.bf16.mxu1 %v3570_v38 }
 0x39b   :  { %2676 = vmatpush1.bf16.msra.mxu0 %v3573_v30  ;;  %2708 = vmatpush1.bf16.msra.mxu1 %v3577_v53 }
 0x39c   :  { %2678 = vmatprep.subr.bf16.mxu0 %v3579_v54  ;;  %2710 = vmatprep.subr.bf16.mxu1 %v3582_v7 }
 0x39f   :  { %2680 = vmatpush1.bf16.msra.mxu0 %v3585_v33  ;;  %2712 = vmatpush1.bf16.msra.mxu1 %v3589_v34 }
 0x3a0   :  { %2714 = vmatprep.subr.bf16.mxu0 %v3498_v4  ;;  %2746 = vmatprep.subr.bf16.mxu1 %v3500_v9 }
 0x455   :  { %v1171_v46 = vpop.f32.mrb[10].mxu0  ;;  %v1242_v52 = vpop.f32.mrb[10].mxu1 }
 0x456   :  { %v1251_v57 = vrot.slane %v1171_v46, 2  ;;  %v1173_v59 = vpop.f32.mrb[11].mxu0  ;;  %v1244_v62 = vpop.f32.mrb[11].mxu1  ;;  %v1253_v43 = vrot.slane %v1242_v52, 2 }
 0x457   :  { %v1252_v8 = vrot.slane %v1173_v59, 2  ;;  %v1254_v29 = vrot.slane %v1244_v62, 2 }
 0x458   :  { %v1259_v11 = vadd.f32 %v1251_v57, %v1034_v6  ;;  %v1261_v40 = vadd.f32 %v1253_v43, %v1036_v26  ;;  %v1294_v43 = vld [vmem:[#allocation4 + $0x38] sm:$0x3] }
 0x459   :  { %v1260_v19 = vadd.f32 %v1252_v8, %v1035_v18  ;;  %v1262_v42 = vadd.f32 %v1254_v29, %v1037_v36 }
 0x45a   :  { %v2370_v20 = vmul.f32 -1.442695, %v1259_v11 }
 0x45b   :  { %v2371_v28 = vmul.f32 -1.442695, %v1260_v19  ;;  %v2372_v31 = vmul.f32 -1.442695, %v1262_v42  ;;  %v1292_v19 = vld [vmem:[#allocation4 + $0x28] sm:$0x3] }
 0x45c   :  { %2965 = vpow2.f32 %v2370_v20 }
 0x45d   :  { %2967 = vpow2.f32 %v2371_v28 }
 0x45e   :  { %2969 = vpow2.f32 %v2372_v31  ;;  %v1293_v31 = vld [vmem:[#allocation4 + $0x30] sm:$0x3] }
 0x45f   :  { %2971 = vtanh.f32 %v1261_v40 }
 0x466   :  { %v2966_v44 = vpop.eup %2965 }
 0x467   :  { %v2968_v58 = vpop.eup %2967  ;;  %v1266_v2 = vadd.f32 1.0, %v2966_v44 }
 0x468   :  { %v1272_v3 = vadd.f32 1.0, %v2968_v58  ;;  %v2970_v16 = vpop.eup %2969 }
 0x469   :  { %2973 = vrcp.f32 %v1266_v2  ;;  %v2972_v23 = vpop.eup %2971  ;;  %v1279_v47 = vadd.f32 1.0, %v2970_v16 }
 0x46a   :  { %2975 = vrcp.f32 %v1272_v3 }
 0x46b   :  { %2977 = vrcp.f32 %v1279_v47 }
 0x473   :  { %v2974_v41 = vpop.eup %2973 }
 0x474   :  { %v2976_v56 = vpop.eup %2975  ;;  %v1286_v45 = vmul.f32 %v2974_v41, %v2972_v23 }
 0x475   :  { %v1285_v46 = vmul.f32 %v2976_v56, %v1283_v50  ;;  %v2978_v57 = vpop.eup %2977 }
 0x477   :  { %v3635_v52 = vadd.f32 %v1286_v45, %v1285_v46 }
 0x479   :  { %2979 = vtanh.f32 %v3635_v52  ;;  %v1528_v41 = vrot.slane %v3635_v52, 6 }
 0x483   :  { %v2980_v59 = vpop.eup %2979 }
 0x484   :  { %v1289_v62 = vmul.f32 %v2980_v59, %v2978_v57 }
 0x486   :  { %1290 = vst [vmem:[#allocation13] sm:$0xc0] %v1289_v62  ;;  %v1360_v6 = vrot.slane %v1289_v62, 6 }
 0x488   :  { %1427 = vmatmul.mubr.f32.vlgmr.msra.gmra.mrb[12].mxu0 %v1360_v6  ;;  %1498 = vmatmul.mubr.f32.vlgmr.msra.gmra.mrb[12].mxu1 %v1360_v6 }
 0x489   :  { %2716 = vmatpush1.bf16.msra.mxu0 %v3502_v10  ;;  %2748 = vmatpush1.bf16.msra.mxu1 %v3505_v14 }
 0x48a   :  { %2718 = vmatprep.subr.bf16.mxu0 %v3510_v24  ;;  %2750 = vmatprep.subr.bf16.mxu1 %v3512_v17 }
 0x48b   :  { %1668 = vmatprep.mubr.f32.mxu0 %v3217_v0  ;;  %1739 = vmatprep.mubr.f32.mxu1 %v3217_v0 }
 0x48d   :  { %2720 = vmatpush1.bf16.msra.mxu0 %v3514_v21  ;;  %2752 = vmatpush1.bf16.msra.mxu1 %v3517_v37 }
 0x48e   :  { %2722 = vmatprep.subr.bf16.mxu0 %v3522_v22  ;;  %2754 = vmatprep.subr.bf16.mxu1 %v3524_v35 }
 0x491   :  { %2724 = vmatpush1.bf16.msra.mxu0 %v3526_v39  ;;  %2756 = vmatpush1.bf16.msra.mxu1 %v3529_v51 }
 0x492   :  { %2726 = vmatprep.subr.bf16.mxu0 %v3534_v1  ;;  %2758 = vmatprep.subr.bf16.mxu1 %v3536_v13 }
 0x495   :  { %2728 = vmatpush1.bf16.msra.mxu0 %v3538_v15  ;;  %2760 = vmatpush1.bf16.msra.mxu1 %v3541_v32 }
 0x496   :  { %2730 = vmatprep.subr.bf16.mxu0 %v3546_v48  ;;  %2762 = vmatprep.subr.bf16.mxu1 %v3548_v60 }
 0x499   :  { %2732 = vmatpush1.bf16.msra.mxu0 %v3550_v61  ;;  %2764 = vmatpush1.bf16.msra.mxu1 %v3553_v55 }
 0x49a   :  { %2734 = vmatprep.subr.bf16.mxu0 %v3557_v63  ;;  %2766 = vmatprep.subr.bf16.mxu1 %v3559_v5 }
 0x49d   :  { %2736 = vmatpush1.bf16.msra.mxu0 %v3562_v12  ;;  %2768 = vmatpush1.bf16.msra.mxu1 %v3566_v25 }
 0x49e   :  { %2738 = vmatprep.subr.bf16.mxu0 %v3568_v27  ;;  %2770 = vmatprep.subr.bf16.mxu1 %v3570_v38 }
 0x4a1   :  { %2740 = vmatpush1.bf16.msra.mxu0 %v3573_v30  ;;  %2772 = vmatpush1.bf16.msra.mxu1 %v3577_v53 }
 0x4a2   :  { %2742 = vmatprep.subr.bf16.mxu0 %v3579_v54  ;;  %2774 = vmatprep.subr.bf16.mxu1 %v3582_v7 }
 0x4a5   :  { %2744 = vmatpush1.bf16.msra.mxu0 %v3585_v33  ;;  %2776 = vmatpush1.bf16.msra.mxu1 %v3589_v34 }
 0x4a6   :  { %2778 = vmatprep.subr.bf16.mxu0 %v3498_v4  ;;  %2810 = vmatprep.subr.bf16.mxu1 %v3500_v9 }
 0x55b   :  { %v1428_v8 = vpop.f32.mrb[12].mxu0  ;;  %v1499_v11 = vpop.f32.mrb[12].mxu1 }
 0x55c   :  { %v1504_v18 = vadd.f32 %v1428_v8, %v1291_v49  ;;  %v1430_v20 = vpop.f32.mrb[13].mxu0  ;;  %v1501_v28 = vpop.f32.mrb[13].mxu1  ;;  %v1506_v44 = vadd.f32 %v1499_v11, %v1293_v31 }
 0x55d   :  { %v1505_v29 = vadd.f32 %v1430_v20, %v1292_v19  ;;  %v1507_v26 = vadd.f32 %v1501_v28, %v1294_v43  ;;  %v2052_v19 = vld [vmem:[#allocation10 + $0x8] sm:$0xff]  ;;  %v2054_v28 = vld [vmem:[#allocation10 + $0x18] sm:$0xff]  ;;  %v2055_v43 = vld [vmem:[#allocation10 + $0x20] sm:$0xff] }
 0x55e   :  { %v2373_v36 = vmul.f32 -1.442695, %v1504_v18  ;;  %v2056_v20 = vld [vmem:[#allocation10 + $0x28] sm:$0xff] }
 0x55f   :  { %v2374_v42 = vmul.f32 -1.442695, %v1505_v29  ;;  %v2375_v40 = vmul.f32 -1.442695, %v1507_v26  ;;  %v2841_v29 = vpack.c.bf16 %v2056_v20, %v2052_v19  ;;  %v2098_v19 = vld [vmem:[#allocation10 + $0x178] sm:$0xff] }
 0x560   :  { %2981 = vpow2.f32 %v2373_v36  ;;  %v2058_v36 = vld [vmem:[#allocation10 + $0x38] sm:$0xff] }
 0x561   :  { %2983 = vpow2.f32 %v2374_v42  ;;  %v2051_v42 = vld [vmem:[#allocation10] sm:$0xff]  ;;  %v2873_v26 = vpack.c.bf16 %v2058_v36, %v2054_v28 }
 0x562   :  { %2985 = vpow2.f32 %v2375_v40  ;;  %v2843_v31 = vpack.c.bf16 %v2055_v43, %v2051_v42  ;;  %v2053_v40 = vld [vmem:[#allocation10 + $0x10] sm:$0xff]  ;;  %v2095_v36 = vld [vmem:[#allocation10 + $0x160] sm:$0xff] }
 0x563   :  { %2987 = vtanh.f32 %v1506_v44  ;;  %v2057_v44 = vld [vmem:[#allocation10 + $0x30] sm:$0xff] }
 0x564   :  { %v2093_v42 = vld [vmem:[#allocation10 + $0x150] sm:$0xff] }
 0x56a   :  { %v2982_v4 = vpop.eup %2981 }
 0x56b   :  { %v2984_v58 = vpop.eup %2983  ;;  %v1511_v9 = vadd.f32 1.0, %v2982_v4  ;;  %v2875_v4 = vpack.c.bf16 %v2057_v44, %v2053_v40  ;;  %v2104_v40 = vld [vmem:[#allocation10 + $0x1a8] sm:$0xff] }
 0x56c   :  { %v1517_v2 = vadd.f32 1.0, %v2984_v58  ;;  %v2986_v3 = vpop.eup %2985  ;;  %v2060_v58 = vld [vmem:[#allocation10 + $0x48] sm:$0xff] }
 0x56d   :  { %2989 = vrcp.f32 %v1511_v9  ;;  %v2988_v16 = vpop.eup %2987  ;;  %v1524_v45 = vadd.f32 1.0, %v2986_v3  ;;  %v2064_v9 = vld [vmem:[#allocation10 + $0x68] sm:$0xff]  ;;  %v2066_v3 = vld [vmem:[#allocation10 + $0x78] sm:$0xff] }
 0x56e   :  { %2991 = vrcp.f32 %v1517_v2  ;;  %v2062_v2 = vld [vmem:[#allocation10 + $0x58] sm:$0xff] }
 0x56f   :  { %2993 = vrcp.f32 %v1524_v45  ;;  %v2065_v45 = vld [vmem:[#allocation10 + $0x70] sm:$0xff] }
 0x577   :  { %v2990_v23 = vpop.eup %2989 }
 0x578   :  { %v2992_v50 = vpop.eup %2991  ;;  %v1531_v56 = vmul.f32 %v2990_v23, %v2988_v16  ;;  %v2059_v16 = vld [vmem:[#allocation10 + $0x40] sm:$0xff] }
 0x579   :  { %v1530_v47 = vmul.f32 %v2992_v50, %v1528_v41  ;;  %v2994_v57 = vpop.eup %2993  ;;  %v2063_v23 = vld [vmem:[#allocation10 + $0x60] sm:$0xff]  ;;  %v2877_v41 = vpack.c.bf16 %v2066_v3, %v2062_v2 }
 0x57a   :  { %v2847_v50 = vpack.c.bf16 %v2063_v23, %v2059_v16  ;;  %v2099_v2 = vld [vmem:[#allocation10 + $0x180] sm:$0xff]  ;;  %v2101_v16 = vld [vmem:[#allocation10 + $0x190] sm:$0xff] }
 0x57b   :  { %v3673_v46 = vadd.f32 %v1531_v56, %v1530_v47  ;;  %v2061_v56 = vld [vmem:[#allocation10 + $0x50] sm:$0xff]  ;;  %v2103_v3 = vld [vmem:[#allocation10 + $0x1a0] sm:$0xff] }
 0x57c   :  { %v2879_v47 = vpack.c.bf16 %v2065_v45, %v2061_v56  ;;  %v2105_v23 = vld [vmem:[#allocation10 + $0x1b0] sm:$0xff]  ;;  %v2110_v56 = vld [vmem:[#allocation10 + $0x1d8] sm:$0xff]  ;;  %v2867_v45 = vpack.c.bf16 %v2103_v3, %v2099_v2 }
 0x57d   :  { %2995 = vtanh.f32 %v3673_v46 }
 0x587   :  { %v2996_v59 = vpop.eup %2995 }
 0x588   :  { %v1534_v62 = vmul.f32 %v2996_v59, %v2994_v57  ;;  %v2072_v57 = vld [vmem:[#allocation10 + $0xa8] sm:$0xff]  ;;  %v2070_v59 = vld [vmem:[#allocation10 + $0x98] sm:$0xff] }
 0x58a   :  { %1535 = vst [vmem:[#allocation13 + $0x8] sm:$0x3] %v1534_v62  ;;  %1669 = vmatmul.mubr.f32.vlgmr.msra.gmra.mrb[14].mxu0 %v1534_v62  ;;  %1740 = vmatmul.mubr.f32.vlgmr.msra.gmra.mrb[14].mxu1 %v1534_v62 }
 0x58b   :  { %2780 = vmatpush1.bf16.msra.mxu0 %v3502_v10  ;;  %2812 = vmatpush1.bf16.msra.mxu1 %v3505_v14 }
 0x58c   :  { %2782 = vmatprep.subr.bf16.mxu0 %v3510_v24  ;;  %2814 = vmatprep.subr.bf16.mxu1 %v3512_v17 }
 0x58d   :  { %1925 = vmatprep.mubr.f32.mxu0 %v3217_v0  ;;  %1996 = vmatprep.mubr.f32.mxu1 %v3217_v0 }
 0x58f   :  { %2784 = vmatpush1.bf16.msra.mxu0 %v3514_v21  ;;  %2816 = vmatpush1.bf16.msra.mxu1 %v3517_v37  ;;  %v1536_v37 = vld [vmem:[#allocation4 + $0x20] sm:$0xc] }
 0x590   :  { %2786 = vmatprep.subr.bf16.mxu0 %v3522_v22  ;;  %2818 = vmatprep.subr.bf16.mxu1 %v3524_v35 }
 0x593   :  { %2788 = vmatpush1.bf16.msra.mxu0 %v3526_v39  ;;  %2820 = vmatpush1.bf16.msra.mxu1 %v3529_v51  ;;  %v1537_v39 = vld [vmem:[#allocation4 + $0x28] sm:$0xc] }
 0x594   :  { %2790 = vmatprep.subr.bf16.mxu0 %v3534_v1  ;;  %2822 = vmatprep.subr.bf16.mxu1 %v3536_v13 }
 0x597   :  { %2792 = vmatpush1.bf16.msra.mxu0 %v3538_v15  ;;  %2824 = vmatpush1.bf16.msra.mxu1 %v3541_v32  ;;  %v1539_v32 = vld [vmem:[#allocation4 + $0x38] sm:$0xc] }
 0x598   :  { %2794 = vmatprep.subr.bf16.mxu0 %v3546_v48  ;;  %2826 = vmatprep.subr.bf16.mxu1 %v3548_v60 }
 0x59b   :  { %2796 = vmatpush1.bf16.msra.mxu0 %v3550_v61  ;;  %2828 = vmatpush1.bf16.msra.mxu1 %v3553_v55  ;;  %v1538_v61 = vld [vmem:[#allocation4 + $0x30] sm:$0xc] }
 0x59c   :  { %2798 = vmatprep.subr.bf16.mxu0 %v3557_v63  ;;  %2830 = vmatprep.subr.bf16.mxu1 %v3559_v5 }
 0x59f   :  { %2800 = vmatpush1.bf16.msra.mxu0 %v3562_v12  ;;  %2832 = vmatpush1.bf16.msra.mxu1 %v3566_v25 }
 0x5a0   :  { %2802 = vmatprep.subr.bf16.mxu0 %v3568_v27  ;;  %2834 = vmatprep.subr.bf16.mxu1 %v3570_v38 }
 0x5a3   :  { %2804 = vmatpush1.bf16.msra.mxu0 %v3573_v30  ;;  %2836 = vmatpush1.bf16.msra.mxu1 %v3577_v53 }
 0x5a4   :  { %2806 = vmatprep.subr.bf16.mxu0 %v3579_v54  ;;  %2838 = vmatprep.subr.bf16.mxu1 %v3582_v7  ;;  %v1782_v54 = vrot.slane %v3673_v46, 6  ;;  %v2068_v46 = vld [vmem:[#allocation10 + $0x88] sm:$0xff] }
 0x5a5   :  { %v2849_v62 = vpack.c.bf16 %v2072_v57, %v2068_v46  ;;  %v2899_v46 = vpack.c.bf16 %v2105_v23, %v2101_v16  ;;  %v2050_v23 = vld [vmem:[#allocation4 + $0x38] sm:$0xc0] }
 0x5a7   :  { %2808 = vmatpush1.bf16.msra.mxu0 %v3585_v33  ;;  %2840 = vmatpush1.bf16.msra.mxu1 %v3589_v34 }
 0x5a8   :  { %2842 = vmatprep.subr.bf16.mxu0 %v2841_v29  ;;  %2874 = vmatprep.subr.bf16.mxu1 %v2873_v26  ;;  %v2091_v29 = vld [vmem:[#allocation10 + $0x140] sm:$0xff]  ;;  %v2097_v26 = vld [vmem:[#allocation10 + $0x170] sm:$0xff] }
 0x5a9   :  { %v2863_v43 = vpack.c.bf16 %v2095_v36, %v2091_v29  ;;  %v2895_v44 = vpack.c.bf16 %v2097_v26, %v2093_v42 }
 0x65d   :  { %v1670_v10 = vpop.f32.mrb[14].mxu0  ;;  %v1741_v14 = vpop.f32.mrb[14].mxu1 }
 0x65e   :  { %v1750_v24 = vrot.slane %v1670_v10, 6  ;;  %v1672_v17 = vpop.f32.mrb[15].mxu0  ;;  %v1743_v21 = vpop.f32.mrb[15].mxu1  ;;  %v1752_v60 = vrot.slane %v1741_v14, 6  ;;  %v2074_v10 = vld [vmem:[#allocation10 + $0xb8] sm:$0xff]  ;;  %v2067_v14 = vld [vmem:[#allocation10 + $0x80] sm:$0xff] }
 0x65f   :  { %v1751_v22 = vrot.slane %v1672_v17, 6  ;;  %v1753_v15 = vrot.slane %v1743_v21, 6  ;;  %v2881_v17 = vpack.c.bf16 %v2074_v10, %v2070_v59  ;;  %v2107_v59 = vld [vmem:[#allocation10 + $0x1c0] sm:$0xff] }
 0x660   :  { %v1758_v35 = vadd.f32 %v1750_v24, %v1536_v37  ;;  %v1760_v63 = vadd.f32 %v1752_v60, %v1538_v61  ;;  %v2071_v24 = vld [vmem:[#allocation10 + $0xa0] sm:$0xff]  ;;  %v2069_v37 = vld [vmem:[#allocation10 + $0x90] sm:$0xff] }
 0x661   :  { %v1759_v51 = vadd.f32 %v1751_v22, %v1537_v39  ;;  %v1761_v48 = vadd.f32 %v1753_v15, %v1539_v32  ;;  %v2851_v21 = vpack.c.bf16 %v2071_v24, %v2067_v14  ;;  %v2073_v22 = vld [vmem:[#allocation10 + $0xb0] sm:$0xff]  ;;  %v2076_v39 = vld [vmem:[#allocation10 + $0xc8] sm:$0xff]  ;;  %v2082_v15 = vld [vmem:[#allocation10 + $0xf8] sm:$0xff] }
 0x662   :  { %v2376_v1 = vmul.f32 -1.442695, %v1758_v35  ;;  %v2883_v35 = vpack.c.bf16 %v2073_v22, %v2069_v37  ;;  %v2075_v32 = vld [vmem:[#allocation10 + $0xc0] sm:$0xff]  ;;  %v2109_v14 = vld [vmem:[#allocation10 + $0x1d0] sm:$0xff] }
 0x663   :  { %v2377_v13 = vmul.f32 -1.442695, %v1759_v51  ;;  %v2378_v55 = vmul.f32 -1.442695, %v1761_v48  ;;  %v2080_v51 = vld [vmem:[#allocation10 + $0xe8] sm:$0xff]  ;;  %v2079_v48 = vld [vmem:[#allocation10 + $0xe0] sm:$0xff] }
 0x664   :  { %2997 = vpow2.f32 %v2376_v1  ;;  %v2078_v1 = vld [vmem:[#allocation10 + $0xd8] sm:$0xff]  ;;  %v2855_v61 = vpack.c.bf16 %v2079_v48, %v2075_v32  ;;  %v2113_v24 = vld [vmem:[#allocation10 + $0x1f0] sm:$0xff] }
 0x665   :  { %2999 = vpow2.f32 %v2377_v13  ;;  %v2853_v13 = vpack.c.bf16 %v2080_v51, %v2076_v39  ;;  %v2885_v60 = vpack.c.bf16 %v2082_v15, %v2078_v1  ;;  %v1790_v1 = vld [vmem:[#allocation4 + $0x20] sm:$0x30]  ;;  %v1791_v32 = vld [vmem:[#allocation4 + $0x28] sm:$0x30] }
 0x666   :  { %3001 = vpow2.f32 %v2378_v55  ;;  %v2077_v55 = vld [vmem:[#allocation10 + $0xd0] sm:$0xff] }
 0x667   :  { %3003 = vtanh.f32 %v1760_v63  ;;  %v2081_v63 = vld [vmem:[#allocation10 + $0xf0] sm:$0xff] }
 0x66e   :  { %v2998_v5 = vpop.eup %2997 }
 0x66f   :  { %v3000_v12 = vpop.eup %2999  ;;  %v1765_v25 = vadd.f32 1.0, %v2998_v5  ;;  %v2887_v5 = vpack.c.bf16 %v2081_v63, %v2077_v55  ;;  %v1793_v63 = vld [vmem:[#allocation4 + $0x38] sm:$0x30] }
 0x670   :  { %v1771_v27 = vadd.f32 1.0, %v3000_v12  ;;  %v3002_v38 = vpop.eup %3001  ;;  %v2084_v12 = vld [vmem:[#allocation10 + $0x108] sm:$0xff] }
 0x671   :  { %3005 = vrcp.f32 %v1765_v25  ;;  %v3004_v30 = vpop.eup %3003  ;;  %v1778_v34 = vadd.f32 1.0, %v3002_v38  ;;  %v2088_v25 = vld [vmem:[#allocation10 + $0x128] sm:$0xff] }
 0x672   :  { %3007 = vrcp.f32 %v1771_v27  ;;  %v2086_v27 = vld [vmem:[#allocation10 + $0x118] sm:$0xff]  ;;  %v2857_v38 = vpack.c.bf16 %v2088_v25, %v2084_v12  ;;  %v1792_v25 = vld [vmem:[#allocation4 + $0x30] sm:$0x30] }
 0x673   :  { %3009 = vrcp.f32 %v1778_v34  ;;  %v2085_v34 = vld [vmem:[#allocation10 + $0x110] sm:$0xff] }
 0x67b   :  { %v3006_v53 = vpop.eup %3005 }
 0x67c   :  { %v3008_v7 = vpop.eup %3007  ;;  %v1785_v33 = vmul.f32 %v3006_v53, %v3004_v30  ;;  %v2090_v30 = vld [vmem:[#allocation10 + $0x138] sm:$0xff]  ;;  %v2083_v53 = vld [vmem:[#allocation10 + $0x100] sm:$0xff] }
 0x67d   :  { %v1784_v52 = vmul.f32 %v3008_v7, %v1782_v54  ;;  %v3010_v49 = vpop.eup %3009  ;;  %v2087_v54 = vld [vmem:[#allocation10 + $0x120] sm:$0xff]  ;;  %v2889_v7 = vpack.c.bf16 %v2090_v30, %v2086_v27 }
 0x67f   :  { %v3709_v6 = vadd.f32 %v1785_v33, %v1784_v52  ;;  %v2859_v33 = vpack.c.bf16 %v2087_v54, %v2083_v53  ;;  %v2089_v52 = vld [vmem:[#allocation10 + $0x130] sm:$0xff] }
 0x681   :  { %3011 = vtanh.f32 %v3709_v6 }
 0x68b   :  { %v3012_v8 = vpop.eup %3011 }
 0x68c   :  { %v1788_v11 = vmul.f32 %v3012_v8, %v3010_v49  ;;  %v2092_v49 = vld [vmem:[#allocation10 + $0x148] sm:$0xff]  ;;  %v2891_v8 = vpack.c.bf16 %v2089_v52, %v2085_v34 }
 0x68e   :  { %1789 = vst [vmem:[#allocation13 + $0x8] sm:$0xc] %v1788_v11  ;;  %v1859_v18 = vrot.slane %v1788_v11, 2  ;;  %v2096_v11 = vld [vmem:[#allocation10 + $0x168] sm:$0xff] }
 0x68f   :  { %v2861_v20 = vpack.c.bf16 %v2096_v11, %v2092_v49  ;;  %v2039_v49 = vrot.slane %v3709_v6, 6  ;;  %v2047_v6 = vld [vmem:[#allocation4 + $0x20] sm:$0xc0] }
 0x690   :  { %1926 = vmatmul.mubr.f32.vlgmr.msra.gmra.mrb[16].mxu0 %v1859_v18  ;;  %1997 = vmatmul.mubr.f32.vlgmr.msra.gmra.mrb[16].mxu1 %v1859_v18  ;;  %v2094_v18 = vld [vmem:[#allocation10 + $0x158] sm:$0xff] }
 0x691   :  { %2182 = vmatprep.mubr.f32.mxu0 %v3217_v0  ;;  %2253 = vmatprep.mubr.f32.mxu1 %v3217_v0  ;;  %v2845_v0 = vpack.c.bf16 %v2064_v9, %v2060_v58  ;;  %v2893_v28 = vpack.c.bf16 %v2098_v19, %v2094_v18  ;;  %v2102_v58 = vld [vmem:[#allocation10 + $0x198] sm:$0xff] }
 0x692   :  { %2844 = vmatpush1.bf16.msra.mxu0 %v2843_v31  ;;  %2876 = vmatpush1.bf16.msra.mxu1 %v2875_v4  ;;  %v2100_v31 = vld [vmem:[#allocation10 + $0x188] sm:$0xff]  ;;  %v2106_v9 = vld [vmem:[#allocation10 + $0x1b8] sm:$0xff] }
 0x693   :  { %2846 = vmatprep.subr.bf16.mxu0 %v2845_v0  ;;  %2878 = vmatprep.subr.bf16.mxu1 %v2877_v41  ;;  %v2865_v4 = vpack.c.bf16 %v2104_v40, %v2100_v31  ;;  %v2897_v0 = vpack.c.bf16 %v2106_v9, %v2102_v58  ;;  %v2108_v41 = vld [vmem:[#allocation10 + $0x1c8] sm:$0xff]  ;;  %v2048_v9 = vld [vmem:[#allocation4 + $0x28] sm:$0xc0] }
 0x696   :  { %2848 = vmatpush1.bf16.msra.mxu0 %v2847_v50  ;;  %2880 = vmatpush1.bf16.msra.mxu1 %v2879_v47  ;;  %v2112_v50 = vld [vmem:[#allocation10 + $0x1e8] sm:$0xff]  ;;  %v2114_v47 = vld [vmem:[#allocation10 + $0x1f8] sm:$0xff] }
 0x697   :  { %2850 = vmatprep.subr.bf16.mxu0 %v2849_v62  ;;  %2882 = vmatprep.subr.bf16.mxu1 %v2881_v17  ;;  %v2869_v57 = vpack.c.bf16 %v2112_v50, %v2108_v41  ;;  %v2111_v62 = vld [vmem:[#allocation10 + $0x1e0] sm:$0xff]  ;;  %v2901_v10 = vpack.c.bf16 %v2114_v47, %v2110_v56 }
 0x698   :  { %v2871_v17 = vpack.c.bf16 %v2111_v62, %v2107_v59  ;;  %v2049_v56 = vld [vmem:[#allocation4 + $0x30] sm:$0xc0] }
 0x69a   :  { %2852 = vmatpush1.bf16.msra.mxu0 %v2851_v21  ;;  %2884 = vmatpush1.bf16.msra.mxu1 %v2883_v35  ;;  %v2903_v21 = vpack.c.bf16 %v2113_v24, %v2109_v14 }
 0x69b   :  { %2854 = vmatprep.subr.bf16.mxu0 %v2853_v13  ;;  %2886 = vmatprep.subr.bf16.mxu1 %v2885_v60 }
 0x69e   :  { %2856 = vmatpush1.bf16.msra.mxu0 %v2855_v61  ;;  %2888 = vmatpush1.bf16.msra.mxu1 %v2887_v5 }
 0x69f   :  { %2858 = vmatprep.subr.bf16.mxu0 %v2857_v38  ;;  %2890 = vmatprep.subr.bf16.mxu1 %v2889_v7 }
 0x6a2   :  { %2860 = vmatpush1.bf16.msra.mxu0 %v2859_v33  ;;  %2892 = vmatpush1.bf16.msra.mxu1 %v2891_v8 }
 0x6a3   :  { %2862 = vmatprep.subr.bf16.mxu0 %v2861_v20  ;;  %2894 = vmatprep.subr.bf16.mxu1 %v2893_v28 }
 0x6a6   :  { %2864 = vmatpush1.bf16.msra.mxu0 %v2863_v43  ;;  %2896 = vmatpush1.bf16.msra.mxu1 %v2895_v44 }
 0x6a7   :  { %2866 = vmatprep.subr.bf16.mxu0 %v2865_v4  ;;  %2898 = vmatprep.subr.bf16.mxu1 %v2897_v0 }
 0x6aa   :  { %2868 = vmatpush1.bf16.msra.mxu0 %v2867_v45  ;;  %2900 = vmatpush1.bf16.msra.mxu1 %v2899_v46 }
 0x6ab   :  { %2870 = vmatprep.subr.bf16.mxu0 %v2869_v57  ;;  %2902 = vmatprep.subr.bf16.mxu1 %v2901_v10 }
 0x6ae   :  { %2872 = vmatpush1.bf16.msra.mxu0 %v2871_v17  ;;  %2904 = vmatpush1.bf16.msra.mxu1 %v2903_v21 }
 0x763   :  { %v1927_v37 = vpop.f32.mrb[16].mxu0  ;;  %v1998_v22 = vpop.f32.mrb[16].mxu1 }
 0x764   :  { %v2007_v35 = vrot.slane %v1927_v37, 4  ;;  %v1929_v39 = vpop.f32.mrb[17].mxu0  ;;  %v2000_v51 = vpop.f32.mrb[17].mxu1  ;;  %v2009_v12 = vrot.slane %v1998_v22, 4 }
 0x765   :  { %v2008_v13 = vrot.slane %v1929_v39, 4  ;;  %v2010_v55 = vrot.slane %v2000_v51, 4 }
 0x766   :  { %v2015_v15 = vadd.f32 %v2007_v35, %v1790_v1  ;;  %v2017_v38 = vadd.f32 %v2009_v12, %v1792_v25 }
 0x767   :  { %v2016_v48 = vadd.f32 %v2008_v13, %v1791_v32  ;;  %v2018_v5 = vadd.f32 %v2010_v55, %v1793_v63 }
 0x768   :  { %v2379_v60 = vmul.f32 -1.442695, %v2015_v15 }
 0x769   :  { %v2380_v61 = vmul.f32 -1.442695, %v2016_v48  ;;  %v2381_v27 = vmul.f32 -1.442695, %v2018_v5 }
 0x76a   :  { %3013 = vpow2.f32 %v2379_v60 }
 0x76b   :  { %3015 = vpow2.f32 %v2380_v61 }
 0x76c   :  { %3017 = vpow2.f32 %v2381_v27 }
 0x76d   :  { %3019 = vtanh.f32 %v2017_v38 }
 0x774   :  { %v3014_v30 = vpop.eup %3013 }
 0x775   :  { %v3016_v53 = vpop.eup %3015  ;;  %v2022_v54 = vadd.f32 1.0, %v3014_v30 }
 0x776   :  { %v2028_v7 = vadd.f32 1.0, %v3016_v53  ;;  %v3018_v33 = vpop.eup %3017 }
 0x777   :  { %3021 = vrcp.f32 %v2022_v54  ;;  %v3020_v34 = vpop.eup %3019  ;;  %v2035_v18 = vadd.f32 1.0, %v3018_v33 }
 0x778   :  { %3023 = vrcp.f32 %v2028_v7 }
 0x779   :  { %3025 = vrcp.f32 %v2035_v18 }
 0x781   :  { %v3022_v52 = vpop.eup %3021 }
 0x782   :  { %v3024_v8 = vpop.eup %3023  ;;  %v2042_v11 = vmul.f32 %v3022_v52, %v3020_v34 }
 0x783   :  { %v2041_v19 = vmul.f32 %v3024_v8, %v2039_v49  ;;  %v3026_v28 = vpop.eup %3025 }
 0x785   :  { %v2043_v20 = vadd.f32 %v2042_v11, %v2041_v19 }
 0x787   :  { %3027 = vtanh.f32 %v2043_v20  ;;  %v2296_v17 = vrot.slane %v2043_v20, 6 }
 0x791   :  { %v3028_v29 = vpop.eup %3027 }
 0x792   :  { %v2045_v36 = vmul.f32 %v3028_v29, %v3026_v28 }
 0x794   :  { %2046 = vst [vmem:[#allocation13 + $0x8] sm:$0x30] %v2045_v36  ;;  %v2116_v42 = vrot.slane %v2045_v36, 4 }
 0x796   :  { %2183 = vmatmul.mubr.f32.vlgmr.msra.gmra.mrb[18].mxu0 %v2116_v42  ;;  %2254 = vmatmul.mubr.f32.vlgmr.msra.gmra.mrb[18].mxu1 %v2116_v42 }
 0x869   :  { %v2184_v43 = vpop.f32.mrb[18].mxu0  ;;  %v2255_v26 = vpop.f32.mrb[18].mxu1 }
 0x86a   :  { %v2264_v31 = vrot.slane %v2184_v43, 2  ;;  %v2186_v40 = vpop.f32.mrb[19].mxu0  ;;  %v2257_v44 = vpop.f32.mrb[19].mxu1  ;;  %v2266_v50 = vrot.slane %v2255_v26, 2 }
 0x86b   :  { %v2265_v4 = vrot.slane %v2186_v40, 2  ;;  %v2267_v16 = vrot.slane %v2257_v44, 2 }
 0x86c   :  { %v2272_v58 = vadd.f32 %v2264_v31, %v2047_v6  ;;  %v2274_v47 = vadd.f32 %v2266_v50, %v2049_v56 }
 0x86d   :  { %v2273_v2 = vadd.f32 %v2265_v4, %v2048_v9  ;;  %v2275_v41 = vadd.f32 %v2267_v16, %v2050_v23 }
 0x86e   :  { %v2382_v0 = vmul.f32 -1.442695, %v2272_v58 }
 0x86f   :  { %v2383_v3 = vmul.f32 -1.442695, %v2273_v2  ;;  %v2384_v45 = vmul.f32 -1.442695, %v2275_v41 }
 0x870   :  { %3029 = vpow2.f32 %v2382_v0 }
 0x871   :  { %3031 = vpow2.f32 %v2383_v3 }
 0x872   :  { %3033 = vpow2.f32 %v2384_v45 }
 0x873   :  { %3035 = vtanh.f32 %v2274_v47 }
 0x87a   :  { %v3030_v46 = vpop.eup %3029 }
 0x87b   :  { %v3032_v57 = vpop.eup %3031  ;;  %v2279_v59 = vadd.f32 1.0, %v3030_v46 }
 0x87c   :  { %v2285_v62 = vadd.f32 1.0, %v3032_v57  ;;  %v3034_v10 = vpop.eup %3033 }
 0x87d   :  { %3037 = vrcp.f32 %v2279_v59  ;;  %v3036_v14 = vpop.eup %3035  ;;  %v2292_v22 = vadd.f32 1.0, %v3034_v10 }
 0x87e   :  { %3039 = vrcp.f32 %v2285_v62 }
 0x87f   :  { %3041 = vrcp.f32 %v2292_v22 }
 0x887   :  { %v3038_v24 = vpop.eup %3037 }
 0x888   :  { %v3040_v21 = vpop.eup %3039  ;;  %v2299_v37 = vmul.f32 %v3038_v24, %v3036_v14 }
 0x889   :  { %v2298_v35 = vmul.f32 %v3040_v21, %v2296_v17  ;;  %v3042_v51 = vpop.eup %3041 }
 0x88b   :  { %v2300_v39 = vadd.f32 %v2299_v37, %v2298_v35 }
 0x88d   :  { %2305 = vst [vmem:[#allocation3 - $0x6] sm:$0xc0] %v2300_v39  ;;  %2310 = vst [vmem:[#allocation16 - $0x6] sm:$0xc0] %v2300_v39  ;;  %3043 = vtanh.f32 %v2300_v39 }
 0x897   :  { %v3044_v1 = vpop.eup %3043 }
 0x898   :  { %v2302_v13 = vmul.f32 %v3044_v1, %v3042_v51 }
 0x89a   :  { %2303 = vst [vmem:[#allocation13 + $0x8] sm:$0xc0] %v2302_v13  ;;  %2304 = vst [vmem:[#allocation2 - $0x6] sm:$0xc0] %v2302_v13 }
 0x89b   :  { %2309 = vst [vmem:[#allocation14 - $0x6] sm:$0xc0] %v2302_v13 }
 0x89c   :  { %3144 = shalt.err (!%p3141_p8)
}
 0x89d   :  { %s3145_s9 = scalar_lea.hbm %s3773_s5, 32 }
 0x89e   :  { %p3146_p9 = scmp.ne.s32.totalorder %s3773_s5, %s3145_s9  ;;  %p3149_p10 = scmp.lt.u32.totalorder %s3145_s9, %s3773_s5 }
 0x8a0   :  { %p3151_p11 = pnand %p3149_p10, %p3146_p9 }
 0x8a2   :  { %3154 = shalt.err (!%p3151_p11)
}
 0x8a3   :  { %2332 = dma.vmem_to_hbm [thread:$0]  %s2330_s8, 32, %s3773_s5, [#allocation15]  }
 0x8a4   :  { %s3155_s15 = scalar_lea.vmem %s3715_s25, 256  ;;  %p3160_p13 = scmp.lt.s32.totalorder %s3715_s25, %s3715_s25 }
 0x8a5   :  { %p3156_p12 = scmp.ne.s32.totalorder %s3715_s25, %s3155_s15  ;;  %p3161_p0 = scmp.lt.s32.totalorder %s3155_s15, %s3155_s15 }
 0x8a7   :  { %p3162_p1 = por %p3161_p0, %p3160_p13 }
 0x8a9   :  { %p3163_p2 = pnand %p3162_p1, %p3156_p12 }
 0x8ab   :  { %3166 = shalt.err (!%p3163_p2)
}
 0x8ac   :  { %s3167_s18 = scalar_lea.hbm %s3772_s4, 256 }
 0x8ad   :  { %p3168_p3 = scmp.ne.s32.totalorder %s3772_s4, %s3167_s18  ;;  %p3171_p4 = scmp.lt.u32.totalorder %s3167_s18, %s3772_s4 }
 0x8af   :  { %p3173_p5 = pnand %p3171_p4, %p3168_p3 }
 0x8b1   :  { %3176 = shalt.err (!%p3173_p5)
}
 0x8b2   :  { %2322 = dma.vmem_to_hbm [thread:$0]  %s3715_s25, 256, %s3772_s4, [#allocation7], %s3213_s1, %s3213_s1, %s3214_s21  }
 0x8b3   :  { %s3177_s7 = scalar_lea.vmem %s3717_s27, 32  ;;  %p3182_p7 = scmp.lt.s32.totalorder %s3717_s27, %s3717_s27 }
 0x8b4   :  { %p3178_p6 = scmp.ne.s32.totalorder %s3717_s27, %s3177_s7  ;;  %p3183_p8 = scmp.lt.s32.totalorder %s3177_s7, %s3177_s7 }
 0x8b6   :  { %p3184_p9 = por %p3183_p8, %p3182_p7 }
 0x8b8   :  { %p3185_p10 = pnand %p3184_p9, %p3178_p6 }
 0x8ba   :  { %3188 = shalt.err (!%p3185_p10)
}
 0x8bb   :  { %s3189_s24 = scalar_lea.hbm %s3774_s6, 32 }
 0x8bc   :  { %p3190_p11 = scmp.ne.s32.totalorder %s3774_s6, %s3189_s24  ;;  %p3193_p12 = scmp.lt.u32.totalorder %s3189_s24, %s3774_s6 }
 0x8be   :  { %p3195_p13 = pnand %p3193_p12, %p3190_p11 }
 0x8c0   :  { %3198 = shalt.err (!%p3195_p13)
}
 0x8c1   :  { %2342 = dma.vmem_to_hbm [thread:$0]  %s3717_s27, 32, %s3774_s6, [#allocation15]  }
 0x8c2   :  { %3205 = dma.done.wait [#allocation7], 256  }
 0x8c3   :  { %3206 = vsyncadd [#allocation7], 4294967040 }
 0x8c4   :  { %3207 = dma.done.wait [#allocation15], 64  }
 0x8c5   :  { %3208 = vsyncadd [#allocation15], 4294967232 }
 0x8c6   :  { %2352 = vsyncpa [#allocation6], 1 }
 0x8c7   :  { %2353 = vsyncpa [#allocation9], 1 }
 0x8c8   :  { %2354 = vsyncpa [#allocation12], 1 }
 0x8c9   :  { %2355 = vsyncpa [#allocation7], 1 }
 0x8ca   :  { %2356 = vsyncpa [#allocation15], 1 }

// kernel: encoder_forward.4
= control target key start
LH: loop header
LB: loop body
LE: loop exit
PB: predicated region body
PF: predicated region fallthrough
CT: control target
= control target key end

     0   :  { %12 = vsyncpa [#allocation6], 0  ;;  %s3865_s0 = inlined_call_operand.hbm [shape: f32[16,128], index: 0, kind: input, shape index: {}]   ;;  %s3866_s1 = inlined_call_operand.hbm [shape: f32[128,512], index: 1, kind: input, shape index: {}]   ;;  %s3867_s2 = inlined_call_operand.hbm [shape: f32[128,512], index: 2, kind: input, shape index: {}]   ;;  %s3868_s3 = inlined_call_operand.hbm [shape: f32[1,512], index: 3, kind: input, shape index: {}]   ;;  %s3869_s4 = inlined_call_operand.hbm [shape: f32[16,128], index: 4, kind: output, shape index: {0}]   ;;  %s3870_s5 = inlined_call_operand.hbm [shape: f32[2,128], index: 5, kind: output, shape index: {1}]   ;;  %s3871_s6 = inlined_call_operand.hbm [shape: f32[2,128], index: 6, kind: output, shape index: {2}]  }
   0x1   :  { %13 = vsyncpa [#allocation9], 0 }
   0x2   :  { %14 = vsyncpa [#allocation12], 0 }
   0x3   :  { %15 = vsyncpa [#allocation7], 0 }
   0x4   :  { %16 = vsyncpa [#allocation15], 0  ;;  %s3310_s21 = smov [#allocation8]   ;;  %s3146_s25 = scalar_lea.hbm %s3866_s1, 8192 }
   0x5   :  { %s34_s22 = sshll.u32 %s3310_s21, 4  ;;  %p3147_p0 = scmp.ne.s32.totalorder %s3866_s1, %s3146_s25  ;;  %s35_s22 = int_to_ptr.vmem [resolvable:$true] %s34_s22 }
   0x6   :  { %p3150_p1 = scmp.lt.u32.totalorder %s3146_s25, %s3866_s1 }
   0x8   :  { %p3152_p2 = pnand %p3150_p1, %p3147_p0 }
   0xa   :  { %3155 = shalt.err (!%p3152_p2)
}
   0xb   :  { %s3156_s30 = scalar_lea.vmem %s35_s22, 8192  ;;  %p3161_p4 = scmp.lt.s32.totalorder %s35_s22, %s35_s22 }
   0xc   :  { %p3157_p3 = scmp.ne.s32.totalorder %s35_s22, %s3156_s30  ;;  %p3162_p5 = scmp.lt.s32.totalorder %s3156_s30, %s3156_s30 }
   0xe   :  { %p3163_p6 = por %p3162_p5, %p3161_p4 }
  0x10   :  { %p3164_p7 = pnand %p3163_p6, %p3157_p3 }
  0x12   :  { %3167 = shalt.err (!%p3164_p7)
}
  0x13   :  { %s3311_s7 = smov 512   ;;  %s3312_s8 = smov 32  }
  0x14   :  { %40 = dma.hbm_to_vmem [thread:$0]  %s3866_s1, 8192, %s35_s22, [#allocation9], %s3311_s7, %s3311_s7, %s3312_s8  }
  0x15   :  { %s3313_s11 = smov [#allocation5]   ;;  %s3168_s15 = scalar_lea.hbm %s3865_s0, 256 }
  0x16   :  { %s22_s12 = sshll.u32 %s3313_s11, 4  ;;  %p3169_p8 = scmp.ne.s32.totalorder %s3865_s0, %s3168_s15  ;;  %s23_s12 = int_to_ptr.vmem [resolvable:$true] %s22_s12 }
  0x17   :  { %p3172_p9 = scmp.lt.u32.totalorder %s3168_s15, %s3865_s0 }
  0x19   :  { %p3174_p10 = pnand %p3172_p9, %p3169_p8 }
  0x1b   :  { %3177 = shalt.err (!%p3174_p10)
}
  0x1c   :  { %s3178_s20 = scalar_lea.vmem %s23_s12, 256  ;;  %p3183_p12 = scmp.lt.s32.totalorder %s23_s12, %s23_s12 }
  0x1d   :  { %p3179_p11 = scmp.ne.s32.totalorder %s23_s12, %s3178_s20  ;;  %p3184_p13 = scmp.lt.s32.totalorder %s3178_s20, %s3178_s20 }
  0x1f   :  { %p3185_p0 = por %p3184_p13, %p3183_p12 }
  0x21   :  { %p3186_p1 = pnand %p3185_p0, %p3179_p11 }
  0x23   :  { %3189 = shalt.err (!%p3186_p1)
}
  0x24   :  { %s3314_s1 = smov 128   ;;  %s3315_s21 = smov 8  }
  0x25   :  { %28 = dma.hbm_to_vmem [thread:$0]  %s3865_s0, 256, %s23_s12, [#allocation6], %s3314_s1, %s3314_s1, %s3315_s21  }
  0x26   :  { %s3316_s24 = smov [#allocation10]   ;;  %s3317_s26 = smov [#allocation11]  }
  0x27   :  { %s46_s25 = sshll.u32 %s3316_s24, 4  ;;  %s59_s27 = sshll.u32 %s3317_s26, 4  ;;  %s47_s25 = int_to_ptr.vmem [resolvable:$true] %s46_s25  ;;  %s60_s27 = int_to_ptr.vmem [resolvable:$true] %s59_s27 }
  0x28   :  { %s3190_s30 = scalar_lea.hbm %s3867_s2, 8192 }
  0x29   :  { %p3191_p2 = scmp.ne.s32.totalorder %s3867_s2, %s3190_s30  ;;  %p3194_p3 = scmp.lt.u32.totalorder %s3190_s30, %s3867_s2 }
  0x2b   :  { %p3196_p4 = pnand %p3194_p3, %p3191_p2 }
  0x2d   :  { %3199 = shalt.err (!%p3196_p4)
}
  0x2e   :  { %s3200_s0 = scalar_lea.vmem %s47_s25, 8192  ;;  %p3205_p6 = scmp.lt.s32.totalorder %s47_s25, %s47_s25 }
  0x2f   :  { %p3201_p5 = scmp.ne.s32.totalorder %s47_s25, %s3200_s0  ;;  %p3206_p7 = scmp.lt.s32.totalorder %s3200_s0, %s3200_s0 }
  0x31   :  { %p3207_p8 = por %p3206_p7, %p3205_p6 }
  0x33   :  { %p3208_p9 = pnand %p3207_p8, %p3201_p5 }
  0x35   :  { %3211 = shalt.err (!%p3208_p9)
}
  0x36   :  { %52 = dma.hbm_to_vmem [thread:$0]  %s3867_s2, 8192, %s47_s25, [#allocation9], %s3311_s7, %s3311_s7, %s3312_s8  }
  0x37   :  { %s3212_s17 = scalar_lea.hbm %s3868_s3, 64 }
  0x38   :  { %p3213_p10 = scmp.ne.s32.totalorder %s3868_s3, %s3212_s17  ;;  %p3216_p11 = scmp.lt.u32.totalorder %s3212_s17, %s3868_s3 }
  0x3a   :  { %p3218_p12 = pnand %p3216_p11, %p3213_p10 }
  0x3c   :  { %3221 = shalt.err (!%p3218_p12)
}
  0x3d   :  { %s3222_s23 = scalar_lea.vmem %s60_s27, 64  ;;  %p3227_p0 = scmp.lt.s32.totalorder %s60_s27, %s60_s27 }
  0x3e   :  { %p3223_p13 = scmp.ne.s32.totalorder %s60_s27, %s3222_s23  ;;  %p3228_p1 = scmp.lt.s32.totalorder %s3222_s23, %s3222_s23 }
  0x40   :  { %p3229_p2 = por %p3228_p1, %p3227_p0 }
  0x42   :  { %p3230_p3 = pnand %p3229_p2, %p3223_p13 }
  0x44   :  { %3233 = shalt.err (!%p3230_p3)
}
  0x45   :  { %62 = dma.hbm_to_vmem [thread:$0]  %s3868_s3, 64, %s60_s27, [#allocation12]  }
  0x46   :  { %3300 = dma.done.wait [#allocation6], 256  }
  0x47   :  { %3301 = vsyncadd [#allocation6], 4294967040 }
  0x48   :  { %3302 = dma.done.wait [#allocation9], 16384  }
  0x49   :  { %3303 = vsyncadd [#allocation9], 4294950912 }
  0x4a   :  { %3304 = dma.done.wait [#allocation12], 64  }
  0x4b   :  { %3305 = vsyncadd [#allocation12], 4294967232  ;;  %v3318_v0 = vmov 0.0   ;;  %v84_v1 = vld [vmem:[#allocation8 + $0x8] sm:$0xff]  ;;  %v86_v3 = vld [vmem:[#allocation8 + $0x18] sm:$0xff]  ;;  %s3319_s3 = smov [#allocation14]  }
  0x4c   :  { %233 = vmatprep.mubr.f32.mxu0 %v3318_v0  ;;  %79 = vst [vmem:[#allocation2] sm:$0x3] %v3318_v0  ;;  %80 = vst [vmem:[#allocation3] sm:$0x3] %v3318_v0  ;;  %310 = vmatprep.mubr.f32.mxu1 %v3318_v0  ;;  %v88_v2 = vld [vmem:[#allocation8 + $0x28] sm:$0xff]  ;;  %v90_v5 = vld [vmem:[#allocation8 + $0x38] sm:$0xff] }
  0x4d   :  { %v2430_v4 = vpack.c.bf16 %v88_v2, %v84_v1  ;;  %v83_v6 = vld [vmem:[#allocation8] sm:$0xff]  ;;  %v2462_v8 = vpack.c.bf16 %v90_v5, %v86_v3  ;;  %v85_v10 = vld [vmem:[#allocation8 + $0x10] sm:$0xff]  ;;  %v92_v12 = vld [vmem:[#allocation8 + $0x48] sm:$0xff]  ;;  %s2378_s8 = sshll.u32 %s3319_s3, 4  ;;  %s3320_s24 = smov [#allocation13]   ;;  %s2379_s8 = int_to_ptr.vmem [resolvable:$true] %s2378_s8 }
  0x4e   :  { %v87_v7 = vld [vmem:[#allocation8 + $0x20] sm:$0xff]  ;;  %v89_v11 = vld [vmem:[#allocation8 + $0x30] sm:$0xff]  ;;  %v96_v14 = vld [vmem:[#allocation8 + $0x68] sm:$0xff]  ;;  %s2365_s25 = sshll.u32 %s3320_s24, 4  ;;  %s3321_s26 = smov [#allocation16]   ;;  %s3812_s25 = int_to_ptr.vmem [resolvable:$true] %s2365_s25 }
  0x4f   :  { %v2432_v9 = vpack.c.bf16 %v87_v7, %v83_v6  ;;  %2431 = vmatprep.subr.bf16.mxu0 %v2430_v4  ;;  %v2464_v13 = vpack.c.bf16 %v89_v11, %v85_v10  ;;  %v94_v15 = vld [vmem:[#allocation8 + $0x58] sm:$0xff]  ;;  %2463 = vmatprep.subr.bf16.mxu1 %v2462_v8  ;;  %v2434_v17 = vpack.c.bf16 %v96_v14, %v92_v12  ;;  %v91_v19 = vld [vmem:[#allocation8 + $0x40] sm:$0xff]  ;;  %v93_v21 = vld [vmem:[#allocation8 + $0x50] sm:$0xff]  ;;  %s2388_s27 = sshll.u32 %s3321_s26, 4  ;;  %s3234_s28 = scalar_lea.vmem %s2379_s8, 32  ;;  %s3814_s27 = int_to_ptr.vmem [resolvable:$true] %s2388_s27 }
  0x50   :  { %v98_v16 = vld [vmem:[#allocation8 + $0x78] sm:$0xff]  ;;  %v95_v20 = vld [vmem:[#allocation8 + $0x60] sm:$0xff]  ;;  %v97_v23 = vld [vmem:[#allocation8 + $0x70] sm:$0xff]  ;;  %p3235_p4 = scmp.ne.s32.totalorder %s2379_s8, %s3234_s28  ;;  %p3239_p5 = scmp.lt.s32.totalorder %s2379_s8, %s2379_s8 }
  0x51   :  { %2433 = vmatpush1.bf16.msra.mxu0 %v2432_v9  ;;  %v2466_v18 = vpack.c.bf16 %v98_v16, %v94_v15  ;;  %2465 = vmatpush1.bf16.msra.mxu1 %v2464_v13  ;;  %v2436_v22 = vpack.c.bf16 %v95_v20, %v91_v19  ;;  %v100_v24 = vld [vmem:[#allocation8 + $0x88] sm:$0xff]  ;;  %v2468_v26 = vpack.c.bf16 %v97_v23, %v93_v21  ;;  %v102_v28 = vld [vmem:[#allocation8 + $0x98] sm:$0xff]  ;;  %v99_v30 = vld [vmem:[#allocation8 + $0x80] sm:$0xff]  ;;  %p3240_p6 = scmp.lt.s32.totalorder %s3234_s28, %s3234_s28 }
  0x52   :  { %v104_v25 = vld [vmem:[#allocation8 + $0xa8] sm:$0xff]  ;;  %2435 = vmatprep.subr.bf16.mxu0 %v2434_v17  ;;  %v106_v29 = vld [vmem:[#allocation8 + $0xb8] sm:$0xff]  ;;  %v103_v32 = vld [vmem:[#allocation8 + $0xa0] sm:$0xff] }
  0x53   :  { %2467 = vmatprep.subr.bf16.mxu1 %v2466_v18  ;;  %v2438_v27 = vpack.c.bf16 %v104_v25, %v100_v24  ;;  %v2470_v31 = vpack.c.bf16 %v106_v29, %v102_v28  ;;  %v101_v33 = vld [vmem:[#allocation8 + $0x90] sm:$0xff]  ;;  %v2440_v35 = vpack.c.bf16 %v103_v32, %v99_v30  ;;  %v108_v36 = vld [vmem:[#allocation8 + $0xc8] sm:$0xff]  ;;  %v110_v38 = vld [vmem:[#allocation8 + $0xd8] sm:$0xff]  ;;  %p3241_p7 = por %p3240_p6, %p3239_p5 }
  0x54   :  { %v105_v34 = vld [vmem:[#allocation8 + $0xb0] sm:$0xff]  ;;  %v112_v37 = vld [vmem:[#allocation8 + $0xe8] sm:$0xff]  ;;  %v114_v41 = vld [vmem:[#allocation8 + $0xf8] sm:$0xff] }
  0x55   :  { %2437 = vmatpush1.bf16.msra.mxu0 %v2436_v22  ;;  %2469 = vmatpush1.bf16.msra.mxu1 %v2468_v26  ;;  %v2472_v39 = vpack.c.bf16 %v105_v34, %v101_v33  ;;  %v2442_v40 = vpack.c.bf16 %v112_v37, %v108_v36  ;;  %v107_v42 = vld [vmem:[#allocation8 + $0xc0] sm:$0xff]  ;;  %v2474_v44 = vpack.c.bf16 %v114_v41, %v110_v38  ;;  %v109_v45 = vld [vmem:[#allocation8 + $0xd0] sm:$0xff]  ;;  %v116_v47 = vld [vmem:[#allocation8 + $0x108] sm:$0xff]  ;;  %p3242_p8 = pnand %p3241_p7, %p3235_p4 }
  0x56   :  { %2439 = vmatprep.subr.bf16.mxu0 %v2438_v27  ;;  %v111_v43 = vld [vmem:[#allocation8 + $0xe0] sm:$0xff]  ;;  %2471 = vmatprep.subr.bf16.mxu1 %v2470_v31  ;;  %v113_v46 = vld [vmem:[#allocation8 + $0xf0] sm:$0xff]  ;;  %v120_v48 = vld [vmem:[#allocation8 + $0x128] sm:$0xff] }
  0x57   :  { %v118_v49 = vld [vmem:[#allocation8 + $0x118] sm:$0xff]  ;;  %v2444_v51 = vpack.c.bf16 %v111_v43, %v107_v42  ;;  %v2476_v52 = vpack.c.bf16 %v113_v46, %v109_v45  ;;  %v2446_v53 = vpack.c.bf16 %v120_v48, %v116_v47  ;;  %v115_v54 = vld [vmem:[#allocation8 + $0x100] sm:$0xff]  ;;  %v117_v56 = vld [vmem:[#allocation8 + $0x110] sm:$0xff] }
  0x58   :  { %v122_v50 = vld [vmem:[#allocation8 + $0x138] sm:$0xff]  ;;  %v119_v55 = vld [vmem:[#allocation8 + $0x120] sm:$0xff]  ;;  %v121_v58 = vld [vmem:[#allocation8 + $0x130] sm:$0xff] }
  0x59   :  { %2441 = vmatpush1.bf16.msra.mxu0 %v2440_v35  ;;  %2473 = vmatpush1.bf16.msra.mxu1 %v2472_v39  ;;  %v2478_v57 = vpack.c.bf16 %v122_v50, %v118_v49  ;;  %v124_v59 = vld [vmem:[#allocation8 + $0x148] sm:$0xff]  ;;  %v126_v61 = vld [vmem:[#allocation8 + $0x158] sm:$0xff]  ;;  %v2448_v63 = vpack.c.bf16 %v119_v55, %v115_v54  ;;  %v2480_v1 = vpack.c.bf16 %v121_v58, %v117_v56  ;;  %v123_v3 = vld [vmem:[#allocation8 + $0x140] sm:$0xff] }
  0x5a   :  { %2443 = vmatprep.subr.bf16.mxu0 %v2442_v40  ;;  %2475 = vmatprep.subr.bf16.mxu1 %v2474_v44  ;;  %v128_v60 = vld [vmem:[#allocation8 + $0x168] sm:$0xff]  ;;  %v130_v62 = vld [vmem:[#allocation8 + $0x178] sm:$0xff]  ;;  %v127_v4 = vld [vmem:[#allocation8 + $0x160] sm:$0xff] }
  0x5b   :  { %v2450_v2 = vpack.c.bf16 %v128_v60, %v124_v59  ;;  %v125_v5 = vld [vmem:[#allocation8 + $0x150] sm:$0xff]  ;;  %v2482_v6 = vpack.c.bf16 %v130_v62, %v126_v61  ;;  %v132_v8 = vld [vmem:[#allocation8 + $0x188] sm:$0xff]  ;;  %v134_v10 = vld [vmem:[#allocation8 + $0x198] sm:$0xff]  ;;  %v2452_v12 = vpack.c.bf16 %v127_v4, %v123_v3 }
  0x5c   :  { %v129_v7 = vld [vmem:[#allocation8 + $0x170] sm:$0xff]  ;;  %v136_v9 = vld [vmem:[#allocation8 + $0x1a8] sm:$0xff]  ;;  %v138_v11 = vld [vmem:[#allocation8 + $0x1b8] sm:$0xff] }
  0x5d   :  { %2445 = vmatpush1.bf16.msra.mxu0 %v2444_v51  ;;  %2477 = vmatpush1.bf16.msra.mxu1 %v2476_v52  ;;  %v2484_v13 = vpack.c.bf16 %v129_v7, %v125_v5  ;;  %v2454_v14 = vpack.c.bf16 %v136_v9, %v132_v8  ;;  %v131_v15 = vld [vmem:[#allocation8 + $0x180] sm:$0xff]  ;;  %v133_v17 = vld [vmem:[#allocation8 + $0x190] sm:$0xff]  ;;  %v2486_v18 = vpack.c.bf16 %v138_v11, %v134_v10  ;;  %v140_v20 = vld [vmem:[#allocation8 + $0x1c8] sm:$0xff] }
  0x5e   :  { %2447 = vmatprep.subr.bf16.mxu0 %v2446_v53  ;;  %2479 = vmatprep.subr.bf16.mxu1 %v2478_v57  ;;  %v135_v16 = vld [vmem:[#allocation8 + $0x1a0] sm:$0xff]  ;;  %v137_v19 = vld [vmem:[#allocation8 + $0x1b0] sm:$0xff]  ;;  %v144_v21 = vld [vmem:[#allocation8 + $0x1e8] sm:$0xff] }
  0x5f   :  { %v142_v22 = vld [vmem:[#allocation8 + $0x1d8] sm:$0xff]  ;;  %v2456_v24 = vpack.c.bf16 %v135_v16, %v131_v15  ;;  %v2488_v25 = vpack.c.bf16 %v137_v19, %v133_v17  ;;  %v2458_v26 = vpack.c.bf16 %v144_v21, %v140_v20  ;;  %v139_v27 = vld [vmem:[#allocation8 + $0x1c0] sm:$0xff]  ;;  %v141_v29 = vld [vmem:[#allocation8 + $0x1d0] sm:$0xff] }
  0x60   :  { %v146_v23 = vld [vmem:[#allocation8 + $0x1f8] sm:$0xff]  ;;  %v143_v28 = vld [vmem:[#allocation8 + $0x1e0] sm:$0xff]  ;;  %v145_v31 = vld [vmem:[#allocation8 + $0x1f0] sm:$0xff] }
  0x61   :  { %2449 = vmatpush1.bf16.msra.mxu0 %v2448_v63  ;;  %2481 = vmatpush1.bf16.msra.mxu1 %v2480_v1  ;;  %v2490_v30 = vpack.c.bf16 %v146_v23, %v142_v22  ;;  %v338_v32 = vld [vmem:[#allocation10 + $0x8] sm:$0xff]  ;;  %v340_v34 = vld [vmem:[#allocation10 + $0x18] sm:$0xff]  ;;  %v2460_v36 = vpack.c.bf16 %v143_v28, %v139_v27  ;;  %v2492_v37 = vpack.c.bf16 %v145_v31, %v141_v29  ;;  %v337_v39 = vld [vmem:[#allocation10] sm:$0xff] }
  0x62   :  { %2451 = vmatprep.subr.bf16.mxu0 %v2450_v2  ;;  %2483 = vmatprep.subr.bf16.mxu1 %v2482_v6  ;;  %v342_v33 = vld [vmem:[#allocation10 + $0x28] sm:$0xff]  ;;  %v344_v35 = vld [vmem:[#allocation10 + $0x38] sm:$0xff]  ;;  %v341_v40 = vld [vmem:[#allocation10 + $0x20] sm:$0xff] }
  0x63   :  { %v3418_v38 = vpack.c.bf16 %v342_v33, %v338_v32  ;;  %v339_v41 = vld [vmem:[#allocation10 + $0x10] sm:$0xff]  ;;  %v3420_v42 = vpack.c.bf16 %v344_v35, %v340_v34  ;;  %v346_v44 = vld [vmem:[#allocation10 + $0x48] sm:$0xff]  ;;  %v348_v46 = vld [vmem:[#allocation10 + $0x58] sm:$0xff]  ;;  %v3422_v49 = vpack.c.bf16 %v341_v40, %v337_v39 }
  0x64   :  { %v343_v43 = vld [vmem:[#allocation10 + $0x30] sm:$0xff]  ;;  %v350_v45 = vld [vmem:[#allocation10 + $0x68] sm:$0xff]  ;;  %v352_v47 = vld [vmem:[#allocation10 + $0x78] sm:$0xff] }
  0x65   :  { %2453 = vmatpush1.bf16.msra.mxu0 %v2452_v12  ;;  %2485 = vmatpush1.bf16.msra.mxu1 %v2484_v13  ;;  %v81_v48 = vld [vmem:[#allocation5] sm:$0xff]  ;;  %v3425_v50 = vpack.c.bf16 %v343_v43, %v339_v41  ;;  %v3427_v51 = vpack.c.bf16 %v350_v45, %v346_v44  ;;  %v345_v52 = vld [vmem:[#allocation10 + $0x40] sm:$0xff]  ;;  %v3430_v55 = vpack.c.bf16 %v352_v47, %v348_v46  ;;  %v354_v57 = vld [vmem:[#allocation10 + $0x88] sm:$0xff] }
  0x66   :  { %2455 = vmatprep.subr.bf16.mxu0 %v2454_v14  ;;  %2487 = vmatprep.subr.bf16.mxu1 %v2486_v18  ;;  %v349_v53 = vld [vmem:[#allocation10 + $0x60] sm:$0xff]  ;;  %v347_v54 = vld [vmem:[#allocation10 + $0x50] sm:$0xff]  ;;  %v358_v58 = vld [vmem:[#allocation10 + $0xa8] sm:$0xff] }
  0x67   :  { %v351_v56 = vld [vmem:[#allocation10 + $0x70] sm:$0xff]  ;;  %v356_v59 = vld [vmem:[#allocation10 + $0x98] sm:$0xff]  ;;  %v3433_v61 = vpack.c.bf16 %v349_v53, %v345_v52  ;;  %v3439_v63 = vpack.c.bf16 %v358_v58, %v354_v57  ;;  %v353_v1 = vld [vmem:[#allocation10 + $0x80] sm:$0xff] }
  0x68   :  { %v360_v60 = vld [vmem:[#allocation10 + $0xb8] sm:$0xff]  ;;  %v3437_v62 = vpack.c.bf16 %v351_v56, %v347_v54  ;;  %v357_v2 = vld [vmem:[#allocation10 + $0xa0] sm:$0xff]  ;;  %v355_v3 = vld [vmem:[#allocation10 + $0x90] sm:$0xff] }
  0x69   :  { %2457 = vmatpush1.bf16.msra.mxu0 %v2456_v24  ;;  %2489 = vmatpush1.bf16.msra.mxu1 %v2488_v25  ;;  %v3442_v4 = vpack.c.bf16 %v360_v60, %v356_v59  ;;  %v359_v5 = vld [vmem:[#allocation10 + $0xb0] sm:$0xff]  ;;  %v362_v6 = vld [vmem:[#allocation10 + $0xc8] sm:$0xff]  ;;  %v364_v8 = vld [vmem:[#allocation10 + $0xd8] sm:$0xff]  ;;  %v3447_v10 = vpack.c.bf16 %v357_v2, %v353_v1 }
  0x6a   :  { %2459 = vmatprep.subr.bf16.mxu0 %v2458_v26  ;;  %2491 = vmatprep.subr.bf16.mxu1 %v2490_v30  ;;  %v366_v7 = vld [vmem:[#allocation10 + $0xe8] sm:$0xff]  ;;  %v368_v9 = vld [vmem:[#allocation10 + $0xf8] sm:$0xff]  ;;  %v3451_v12 = vpack.c.bf16 %v359_v5, %v355_v3  ;;  %v361_v14 = vld [vmem:[#allocation10 + $0xc0] sm:$0xff] }
  0x6b   :  { %v82_v11 = vld [vmem:[#allocation5 + $0x8] sm:$0xff]  ;;  %v3453_v13 = vpack.c.bf16 %v366_v7, %v362_v6  ;;  %v365_v15 = vld [vmem:[#allocation10 + $0xe0] sm:$0xff]  ;;  %v363_v16 = vld [vmem:[#allocation10 + $0xd0] sm:$0xff]  ;;  %v3456_v17 = vpack.c.bf16 %v368_v9, %v364_v8 }
  0x6c   :  { %v367_v18 = vld [vmem:[#allocation10 + $0xf0] sm:$0xff]  ;;  %v370_v19 = vld [vmem:[#allocation10 + $0x108] sm:$0xff]  ;;  %v372_v21 = vld [vmem:[#allocation10 + $0x118] sm:$0xff]  ;;  %v3460_v23 = vpack.c.bf16 %v365_v15, %v361_v14 }
  0x6d   :  { %2461 = vmatpush1.bf16.msra.mxu0 %v2460_v36  ;;  %2493 = vmatpush1.bf16.msra.mxu1 %v2492_v37  ;;  %v374_v20 = vld [vmem:[#allocation10 + $0x128] sm:$0xff]  ;;  %v376_v22 = vld [vmem:[#allocation10 + $0x138] sm:$0xff]  ;;  %v3465_v24 = vpack.c.bf16 %v367_v18, %v363_v16  ;;  %v369_v26 = vld [vmem:[#allocation10 + $0x100] sm:$0xff] }
  0x6e   :  { %2495 = vmatprep.subr.bf16.mxu0 %v3418_v38  ;;  %2527 = vmatprep.subr.bf16.mxu1 %v3420_v42  ;;  %v3467_v25 = vpack.c.bf16 %v374_v20, %v370_v19  ;;  %v373_v27 = vld [vmem:[#allocation10 + $0x120] sm:$0xff]  ;;  %v371_v28 = vld [vmem:[#allocation10 + $0x110] sm:$0xff]  ;;  %v3470_v29 = vpack.c.bf16 %v376_v22, %v372_v21  ;;  %v378_v31 = vld [vmem:[#allocation10 + $0x148] sm:$0xff]  ;;  %v149_v21 = vlaneseq }
  0x6f   :  { %v375_v30 = vld [vmem:[#allocation10 + $0x130] sm:$0xff]  ;;  %v382_v32 = vld [vmem:[#allocation10 + $0x168] sm:$0xff]  ;;  %v380_v33 = vld [vmem:[#allocation10 + $0x158] sm:$0xff]  ;;  %v3473_v35 = vpack.c.bf16 %v373_v27, %v369_v26 }
  0x70   :  { %234 = vmatmul.mubr.f32.vlgmr.msra.gmra.mrb[0].mxu0 %v81_v48  ;;  %311 = vmatmul.mubr.f32.vlgmr.msra.gmra.mrb[0].mxu1 %v81_v48  ;;  %v384_v34 = vld [vmem:[#allocation10 + $0x178] sm:$0xff]  ;;  %v3477_v36 = vpack.c.bf16 %v375_v30, %v371_v28  ;;  %v3479_v37 = vpack.c.bf16 %v382_v32, %v378_v31  ;;  %v377_v39 = vld [vmem:[#allocation10 + $0x140] sm:$0xff]  ;;  %v379_v41 = vld [vmem:[#allocation10 + $0x150] sm:$0xff]  ;;  %v150_v22 = vshrl.u32 %v149_v21, 7 }
  0x71   :  { %2497 = vmatpush1.bf16.msra.mxu0 %v3422_v49  ;;  %2529 = vmatpush1.bf16.msra.mxu1 %v3425_v50  ;;  %v381_v40 = vld [vmem:[#allocation10 + $0x160] sm:$0xff]  ;;  %v3482_v43 = vpack.c.bf16 %v384_v34, %v380_v33  ;;  %v383_v44 = vld [vmem:[#allocation10 + $0x170] sm:$0xff]  ;;  %v386_v45 = vld [vmem:[#allocation10 + $0x188] sm:$0xff] }
  0x72   :  { %2499 = vmatprep.subr.bf16.mxu0 %v3427_v51  ;;  %2531 = vmatprep.subr.bf16.mxu1 %v3430_v55  ;;  %v390_v46 = vld [vmem:[#allocation10 + $0x1a8] sm:$0xff]  ;;  %v388_v47 = vld [vmem:[#allocation10 + $0x198] sm:$0xff]  ;;  %v3485_v52 = vpack.c.bf16 %v381_v40, %v377_v39  ;;  %v3489_v53 = vpack.c.bf16 %v383_v44, %v379_v41  ;;  %v385_v56 = vld [vmem:[#allocation10 + $0x180] sm:$0xff]  ;;  %v151_v26 = vsub.s32 0, %v150_v22  ;;  %v155_v28 = vsub.s32 1, %v150_v22 }
  0x73   :  { %239 = vmatprep.mubr.f32.mxu0 %v3318_v0  ;;  %316 = vmatprep.mubr.f32.mxu1 %v3318_v0  ;;  %v392_v48 = vld [vmem:[#allocation10 + $0x1b8] sm:$0xff]  ;;  %v3491_v54 = vpack.c.bf16 %v390_v46, %v386_v45  ;;  %v389_v57 = vld [vmem:[#allocation10 + $0x1a0] sm:$0xff]  ;;  %v387_v58 = vld [vmem:[#allocation10 + $0x190] sm:$0xff]  ;;  %v159_v30 = vsub.s32 2, %v150_v22  ;;  %v163_v31 = vsub.s32 3, %v150_v22 }
  0x74   :  { %240 = vmatmul.mubr.f32.gmra.mrb[2].mxu0 %v82_v11  ;;  %317 = vmatmul.mubr.f32.gmra.mrb[2].mxu1 %v82_v11  ;;  %v3494_v59 = vpack.c.bf16 %v392_v48, %v388_v47  ;;  %v391_v60 = vld [vmem:[#allocation10 + $0x1b0] sm:$0xff]  ;;  %v394_v1 = vld [vmem:[#allocation10 + $0x1c8] sm:$0xff]  ;;  %v396_v3 = vld [vmem:[#allocation10 + $0x1d8] sm:$0xff]  ;;  %v3497_v6 = vpack.c.bf16 %v389_v57, %v385_v56 }
  0x75   :  { %2501 = vmatpush1.bf16.msra.mxu0 %v3433_v61  ;;  %2533 = vmatpush1.bf16.msra.mxu1 %v3437_v62  ;;  %v398_v2 = vld [vmem:[#allocation10 + $0x1e8] sm:$0xff]  ;;  %v400_v5 = vld [vmem:[#allocation10 + $0x1f8] sm:$0xff]  ;;  %v3501_v7 = vpack.c.bf16 %v391_v60, %v387_v58  ;;  %v393_v9 = vld [vmem:[#allocation10 + $0x1c0] sm:$0xff] }
  0x76   :  { %2503 = vmatprep.subr.bf16.mxu0 %v3439_v63  ;;  %2535 = vmatprep.subr.bf16.mxu1 %v3442_v4  ;;  %v3503_v8 = vpack.c.bf16 %v398_v2, %v394_v1  ;;  %v397_v11 = vld [vmem:[#allocation10 + $0x1e0] sm:$0xff]  ;;  %v3506_v14 = vpack.c.bf16 %v400_v5, %v396_v3  ;;  %v395_v15 = vld [vmem:[#allocation10 + $0x1d0] sm:$0xff]  ;;  %v331_v20 = vld [vmem:[#allocation2] sm:$0x3] }
  0x77   :  { %465 = vmatprep.mubr.f32.mxu0 %v3318_v0  ;;  %536 = vmatprep.mubr.f32.mxu1 %v3318_v0  ;;  %v399_v16 = vld [vmem:[#allocation10 + $0x1f0] sm:$0xff]  ;;  %v3509_v18 = vpack.c.bf16 %v397_v11, %v393_v9  ;;  %v147_v27 = vld [vmem:[#allocation11] sm:$0xf] }
  0x78   :  { %v3513_v19 = vpack.c.bf16 %v399_v16, %v395_v15  ;;  %v152_v32 = vrot.slane %v147_v27, %v151_v26  ;;  %v156_v33 = vrot.slane %v147_v27, %v155_v28  ;;  %v160_v34 = vrot.slane %v147_v27, %v159_v30 }
  0x79   :  { %2505 = vmatpush1.bf16.msra.mxu0 %v3447_v10  ;;  %2537 = vmatpush1.bf16.msra.mxu1 %v3451_v12  ;;  %v164_v39 = vrot.slane %v147_v27, %v163_v31 }
  0x7a   :  { %2507 = vmatprep.subr.bf16.mxu0 %v3453_v13  ;;  %2539 = vmatprep.subr.bf16.mxu1 %v3456_v17 }
  0x7d   :  { %2509 = vmatpush1.bf16.msra.mxu0 %v3460_v23  ;;  %2541 = vmatpush1.bf16.msra.mxu1 %v3465_v24 }
  0x7e   :  { %2511 = vmatprep.subr.bf16.mxu0 %v3467_v25  ;;  %2543 = vmatprep.subr.bf16.mxu1 %v3470_v29 }
  0x81   :  { %2513 = vmatpush1.bf16.msra.mxu0 %v3473_v35  ;;  %2545 = vmatpush1.bf16.msra.mxu1 %v3477_v36 }
  0x82   :  { %2515 = vmatprep.subr.bf16.mxu0 %v3479_v37  ;;  %2547 = vmatprep.subr.bf16.mxu1 %v3482_v43 }
  0x85   :  { %2517 = vmatpush1.bf16.msra.mxu0 %v3485_v52  ;;  %2549 = vmatpush1.bf16.msra.mxu1 %v3489_v53 }
  0x86   :  { %2519 = vmatprep.subr.bf16.mxu0 %v3491_v54  ;;  %2551 = vmatprep.subr.bf16.mxu1 %v3494_v59 }
  0x89   :  { %2521 = vmatpush1.bf16.msra.mxu0 %v3497_v6  ;;  %2553 = vmatpush1.bf16.msra.mxu1 %v3501_v7 }
  0x8a   :  { %2523 = vmatprep.subr.bf16.mxu0 %v3503_v8  ;;  %2555 = vmatprep.subr.bf16.mxu1 %v3506_v14 }
  0x8d   :  { %2525 = vmatpush1.bf16.msra.mxu0 %v3509_v18  ;;  %2557 = vmatpush1.bf16.msra.mxu1 %v3513_v19 }
  0x8e   :  { %2559 = vmatprep.subr.bf16.mxu0 %v3418_v38  ;;  %2591 = vmatprep.subr.bf16.mxu1 %v3420_v42 }
  0x90   :  { %466 = vmatmul.mubr.f32.vlgmr.msra.gmra.mrb[4].mxu0 %v331_v20  ;;  %537 = vmatmul.mubr.f32.vlgmr.msra.gmra.mrb[4].mxu1 %v331_v20 }
  0x91   :  { %2561 = vmatpush1.bf16.msra.mxu0 %v3422_v49  ;;  %2593 = vmatpush1.bf16.msra.mxu1 %v3425_v50 }
  0x92   :  { %2563 = vmatprep.subr.bf16.mxu0 %v3427_v51  ;;  %2595 = vmatprep.subr.bf16.mxu1 %v3430_v55 }
  0x93   :  { %704 = vmatprep.mubr.f32.mxu0 %v3318_v0  ;;  %775 = vmatprep.mubr.f32.mxu1 %v3318_v0 }
  0x95   :  { %2565 = vmatpush1.bf16.msra.mxu0 %v3433_v61  ;;  %2597 = vmatpush1.bf16.msra.mxu1 %v3437_v62 }
  0x96   :  { %2567 = vmatprep.subr.bf16.mxu0 %v3439_v63  ;;  %2599 = vmatprep.subr.bf16.mxu1 %v3442_v4 }
  0x99   :  { %2569 = vmatpush1.bf16.msra.mxu0 %v3447_v10  ;;  %2601 = vmatpush1.bf16.msra.mxu1 %v3451_v12 }
  0x9a   :  { %2571 = vmatprep.subr.bf16.mxu0 %v3453_v13  ;;  %2603 = vmatprep.subr.bf16.mxu1 %v3456_v17 }
  0x9d   :  { %2573 = vmatpush1.bf16.msra.mxu0 %v3460_v23  ;;  %2605 = vmatpush1.bf16.msra.mxu1 %v3465_v24 }
  0x9e   :  { %2575 = vmatprep.subr.bf16.mxu0 %v3467_v25  ;;  %2607 = vmatprep.subr.bf16.mxu1 %v3470_v29 }
  0xa1   :  { %2577 = vmatpush1.bf16.msra.mxu0 %v3473_v35  ;;  %2609 = vmatpush1.bf16.msra.mxu1 %v3477_v36 }
  0xa2   :  { %2579 = vmatprep.subr.bf16.mxu0 %v3479_v37  ;;  %2611 = vmatprep.subr.bf16.mxu1 %v3482_v43 }
  0xa5   :  { %2581 = vmatpush1.bf16.msra.mxu0 %v3485_v52  ;;  %2613 = vmatpush1.bf16.msra.mxu1 %v3489_v53 }
  0xa6   :  { %2583 = vmatprep.subr.bf16.mxu0 %v3491_v54  ;;  %2615 = vmatprep.subr.bf16.mxu1 %v3494_v59 }
  0xa9   :  { %2585 = vmatpush1.bf16.msra.mxu0 %v3497_v6  ;;  %2617 = vmatpush1.bf16.msra.mxu1 %v3501_v7 }
  0xaa   :  { %2587 = vmatprep.subr.bf16.mxu0 %v3503_v8  ;;  %2619 = vmatprep.subr.bf16.mxu1 %v3506_v14 }
  0xad   :  { %2589 = vmatpush1.bf16.msra.mxu0 %v3509_v18  ;;  %2621 = vmatpush1.bf16.msra.mxu1 %v3513_v19 }
  0xae   :  { %2623 = vmatprep.subr.bf16.mxu0 %v3418_v38  ;;  %2655 = vmatprep.subr.bf16.mxu1 %v3420_v42 }
 0x143   :  { %v235_v40 = vpop.f32.mrb[0].mxu0  ;;  %v312_v45 = vpop.f32.mrb[0].mxu1 }
 0x144   :  { %v236_v41 = vadd.f32 %v235_v40, %v152_v32  ;;  %v237_v44 = vpop.f32.mrb[1].mxu0  ;;  %v313_v47 = vadd.f32 %v312_v45, %v160_v34  ;;  %v314_v38 = vpop.f32.mrb[1].mxu1 }
 0x145   :  { %v238_v46 = vadd.f32 %v237_v44, %v156_v33  ;;  %v315_v42 = vadd.f32 %v314_v38, %v164_v39 }
 0x146   :  { %323 = vst [vmem:[#allocation4] sm:$0xff] %v236_v41  ;;  %325 = vst [vmem:[#allocation4 + $0x10] sm:$0xff] %v313_v47 }
 0x147   :  { %324 = vst [vmem:[#allocation4 + $0x8] sm:$0xff] %v238_v46  ;;  %326 = vst [vmem:[#allocation4 + $0x18] sm:$0xff] %v315_v42  ;;  %v241_v48 = vpop.f32.mrb[2].mxu0  ;;  %v318_v58 = vpop.f32.mrb[2].mxu1  ;;  %v332_v46 = vld [vmem:[#allocation3] sm:$0x3] }
 0x148   :  { %v242_v56 = vadd.f32 %v241_v48, %v152_v32  ;;  %v243_v57 = vpop.f32.mrb[3].mxu0  ;;  %v319_v1 = vadd.f32 %v318_v58, %v160_v34  ;;  %v320_v2 = vpop.f32.mrb[3].mxu1 }
 0x149   :  { %v244_v60 = vadd.f32 %v243_v57, %v156_v33  ;;  %v321_v3 = vadd.f32 %v320_v2, %v164_v39 }
 0x14a   :  { %327 = vst [vmem:[#allocation4 + $0x20] sm:$0xff] %v242_v56  ;;  %329 = vst [vmem:[#allocation4 + $0x30] sm:$0xff] %v319_v1 }
 0x14b   :  { %328 = vst [vmem:[#allocation4 + $0x28] sm:$0xff] %v244_v60  ;;  %330 = vst [vmem:[#allocation4 + $0x38] sm:$0xff] %v321_v3 }
 0x14d   :  { %v333_v5 = vld [vmem:[#allocation4] sm:$0x3]  ;;  %v335_v31 = vld [vmem:[#allocation4 + $0x10] sm:$0x3] }
 0x14e   :  { %v334_v16 = vld [vmem:[#allocation4 + $0x8] sm:$0x3]  ;;  %v336_v28 = vld [vmem:[#allocation4 + $0x18] sm:$0x3] }
 0x163   :  { %v467_v9 = vpop.f32.mrb[4].mxu0  ;;  %v538_v15 = vpop.f32.mrb[4].mxu1 }
 0x164   :  { %v543_v11 = vadd.f32 %v467_v9, %v333_v5  ;;  %v469_v20 = vpop.f32.mrb[5].mxu0  ;;  %v540_v22 = vpop.f32.mrb[5].mxu1  ;;  %v545_v33 = vadd.f32 %v538_v15, %v335_v31 }
 0x165   :  { %v544_v21 = vadd.f32 %v469_v20, %v334_v16  ;;  %v546_v30 = vadd.f32 %v540_v22, %v336_v28  ;;  %v1088_v16 = vld [vmem:[#allocation10 + $0x8] sm:$0xff]  ;;  %v1091_v28 = vld [vmem:[#allocation10 + $0x20] sm:$0xff] }
 0x166   :  { %v2406_v26 = vmul.f32 -1.442695, %v543_v11  ;;  %v1092_v20 = vld [vmem:[#allocation10 + $0x28] sm:$0xff] }
 0x167   :  { %v2407_v27 = vmul.f32 -1.442695, %v544_v21  ;;  %v2408_v32 = vmul.f32 -1.442695, %v546_v30  ;;  %v1090_v21 = vld [vmem:[#allocation10 + $0x18] sm:$0xff]  ;;  %v3595_v22 = vpack.c.bf16 %v1092_v20, %v1088_v16 }
 0x168   :  { %3018 = vpow2.f32 %v2406_v26  ;;  %v1094_v26 = vld [vmem:[#allocation10 + $0x38] sm:$0xff] }
 0x169   :  { %3020 = vpow2.f32 %v2407_v27  ;;  %v1087_v27 = vld [vmem:[#allocation10] sm:$0xff]  ;;  %v3597_v30 = vpack.c.bf16 %v1094_v26, %v1090_v21  ;;  %v1130_v16 = vld [vmem:[#allocation10 + $0x158] sm:$0xff] }
 0x16a   :  { %3022 = vpow2.f32 %v2408_v32  ;;  %v3599_v31 = vpack.c.bf16 %v1091_v28, %v1087_v27  ;;  %v1089_v32 = vld [vmem:[#allocation10 + $0x10] sm:$0xff]  ;;  %v1134_v20 = vld [vmem:[#allocation10 + $0x178] sm:$0xff]  ;;  %v1127_v27 = vld [vmem:[#allocation10 + $0x140] sm:$0xff] }
 0x16b   :  { %3024 = vtanh.f32 %v545_v33  ;;  %v1093_v33 = vld [vmem:[#allocation10 + $0x30] sm:$0xff]  ;;  %v3656_v26 = vpack.c.bf16 %v1134_v20, %v1130_v16  ;;  %v1131_v28 = vld [vmem:[#allocation10 + $0x160] sm:$0xff]  ;;  %v827_v16 = vld [vmem:[#allocation4 + $0x8] sm:$0x30] }
 0x172   :  { %v3019_v34 = vpop.eup %3018 }
 0x173   :  { %v3021_v39 = vpop.eup %3020  ;;  %v550_v40 = vadd.f32 1.0, %v3019_v34  ;;  %v3602_v34 = vpack.c.bf16 %v1093_v33, %v1089_v32  ;;  %v1129_v32 = vld [vmem:[#allocation10 + $0x150] sm:$0xff]  ;;  %v3659_v33 = vpack.c.bf16 %v1131_v28, %v1127_v27 }
 0x174   :  { %v556_v41 = vadd.f32 1.0, %v3021_v39  ;;  %v3023_v44 = vpop.eup %3022  ;;  %v1096_v39 = vld [vmem:[#allocation10 + $0x48] sm:$0xff] }
 0x175   :  { %3026 = vrcp.f32 %v550_v40  ;;  %v3025_v45 = vpop.eup %3024  ;;  %v563_v48 = vadd.f32 1.0, %v3023_v44  ;;  %v1100_v40 = vld [vmem:[#allocation10 + $0x68] sm:$0xff] }
 0x176   :  { %3028 = vrcp.f32 %v556_v41  ;;  %v1098_v41 = vld [vmem:[#allocation10 + $0x58] sm:$0xff]  ;;  %v3607_v44 = vpack.c.bf16 %v1100_v40, %v1096_v39  ;;  %v1133_v39 = vld [vmem:[#allocation10 + $0x170] sm:$0xff]  ;;  %v1136_v40 = vld [vmem:[#allocation10 + $0x188] sm:$0xff] }
 0x177   :  { %3030 = vrcp.f32 %v563_v48  ;;  %v1097_v48 = vld [vmem:[#allocation10 + $0x50] sm:$0xff] }
 0x17f   :  { %v3027_v47 = vpop.eup %3026 }
 0x180   :  { %v3029_v38 = vpop.eup %3028  ;;  %v567_v42 = vmul.f32 %v3027_v47, %v3025_v45  ;;  %v1102_v45 = vld [vmem:[#allocation10 + $0x78] sm:$0xff]  ;;  %v1099_v47 = vld [vmem:[#allocation10 + $0x60] sm:$0xff] }
 0x181   :  { %v566_v56 = vmul.f32 %v3029_v38, %v332_v46  ;;  %v3031_v58 = vpop.eup %3030  ;;  %v1095_v46 = vld [vmem:[#allocation10 + $0x40] sm:$0xff]  ;;  %v3609_v38 = vpack.c.bf16 %v1102_v45, %v1098_v41  ;;  %v1140_v41 = vld [vmem:[#allocation10 + $0x1a8] sm:$0xff]  ;;  %v3663_v45 = vpack.c.bf16 %v1133_v39, %v1129_v32 }
 0x182   :  { %v829_v39 = vld [vmem:[#allocation4 + $0x18] sm:$0x30] }
 0x183   :  { %v3554_v57 = vadd.f32 %v567_v42, %v566_v56  ;;  %v3611_v42 = vpack.c.bf16 %v1099_v47, %v1095_v46  ;;  %v1101_v56 = vld [vmem:[#allocation10 + $0x70] sm:$0xff]  ;;  %v3665_v46 = vpack.c.bf16 %v1140_v41, %v1136_v40  ;;  %v1138_v47 = vld [vmem:[#allocation10 + $0x198] sm:$0xff] }
 0x185   :  { %3032 = vtanh.f32 %v3554_v57 }
 0x18f   :  { %v3033_v60 = vpop.eup %3032 }
 0x190   :  { %v570_v1 = vmul.f32 %v3033_v60, %v3031_v58  ;;  %v1104_v58 = vld [vmem:[#allocation10 + $0x88] sm:$0xff] }
 0x191   :  { %v1108_v60 = vld [vmem:[#allocation10 + $0xa8] sm:$0xff] }
 0x192   :  { %571 = vst [vmem:[#allocation13] sm:$0x3] %v570_v1  ;;  %705 = vmatmul.mubr.f32.vlgmr.msra.gmra.mrb[6].mxu0 %v570_v1  ;;  %776 = vmatmul.mubr.f32.vlgmr.msra.gmra.mrb[6].mxu1 %v570_v1  ;;  %v1106_v1 = vld [vmem:[#allocation10 + $0x98] sm:$0xff] }
 0x193   :  { %2625 = vmatpush1.bf16.msra.mxu0 %v3422_v49  ;;  %2657 = vmatpush1.bf16.msra.mxu1 %v3425_v50 }
 0x194   :  { %2627 = vmatprep.subr.bf16.mxu0 %v3427_v51  ;;  %2659 = vmatprep.subr.bf16.mxu1 %v3430_v55 }
 0x195   :  { %961 = vmatprep.mubr.f32.mxu0 %v3318_v0  ;;  %1032 = vmatprep.mubr.f32.mxu1 %v3318_v0 }
 0x197   :  { %2629 = vmatpush1.bf16.msra.mxu0 %v3433_v61  ;;  %2661 = vmatpush1.bf16.msra.mxu1 %v3437_v62  ;;  %v572_v62 = vld [vmem:[#allocation4] sm:$0xc] }
 0x198   :  { %2631 = vmatprep.subr.bf16.mxu0 %v3439_v63  ;;  %2663 = vmatprep.subr.bf16.mxu1 %v3442_v4 }
 0x19b   :  { %2633 = vmatpush1.bf16.msra.mxu0 %v3447_v10  ;;  %2665 = vmatpush1.bf16.msra.mxu1 %v3451_v12  ;;  %v573_v10 = vld [vmem:[#allocation4 + $0x8] sm:$0xc] }
 0x19c   :  { %2635 = vmatprep.subr.bf16.mxu0 %v3453_v13  ;;  %2667 = vmatprep.subr.bf16.mxu1 %v3456_v17 }
 0x19f   :  { %2637 = vmatpush1.bf16.msra.mxu0 %v3460_v23  ;;  %2669 = vmatpush1.bf16.msra.mxu1 %v3465_v24  ;;  %v575_v24 = vld [vmem:[#allocation4 + $0x18] sm:$0xc] }
 0x1a0   :  { %2639 = vmatprep.subr.bf16.mxu0 %v3467_v25  ;;  %2671 = vmatprep.subr.bf16.mxu1 %v3470_v29 }
 0x1a3   :  { %2641 = vmatpush1.bf16.msra.mxu0 %v3473_v35  ;;  %2673 = vmatpush1.bf16.msra.mxu1 %v3477_v36  ;;  %v574_v35 = vld [vmem:[#allocation4 + $0x10] sm:$0xc] }
 0x1a4   :  { %2643 = vmatprep.subr.bf16.mxu0 %v3479_v37  ;;  %2675 = vmatprep.subr.bf16.mxu1 %v3482_v43 }
 0x1a7   :  { %2645 = vmatpush1.bf16.msra.mxu0 %v3485_v52  ;;  %2677 = vmatpush1.bf16.msra.mxu1 %v3489_v53 }
 0x1a8   :  { %2647 = vmatprep.subr.bf16.mxu0 %v3491_v54  ;;  %2679 = vmatprep.subr.bf16.mxu1 %v3494_v59 }
 0x1ab   :  { %2649 = vmatpush1.bf16.msra.mxu0 %v3497_v6  ;;  %2681 = vmatpush1.bf16.msra.mxu1 %v3501_v7 }
 0x1ac   :  { %2651 = vmatprep.subr.bf16.mxu0 %v3503_v8  ;;  %2683 = vmatprep.subr.bf16.mxu1 %v3506_v14  ;;  %v818_v8 = vrot.slane %v3554_v57, 6  ;;  %v3614_v57 = vpack.c.bf16 %v1101_v56, %v1097_v48  ;;  %v1142_v48 = vld [vmem:[#allocation10 + $0x1b8] sm:$0xff]  ;;  %v1135_v56 = vld [vmem:[#allocation10 + $0x180] sm:$0xff] }
 0x1af   :  { %2653 = vmatpush1.bf16.msra.mxu0 %v3509_v18  ;;  %2685 = vmatpush1.bf16.msra.mxu1 %v3513_v19 }
 0x1b0   :  { %2687 = vmatprep.subr.bf16.mxu0 %v3595_v22  ;;  %2719 = vmatprep.subr.bf16.mxu1 %v3597_v30 }
 0x265   :  { %v706_v49 = vpop.f32.mrb[6].mxu0  ;;  %v777_v50 = vpop.f32.mrb[6].mxu1 }
 0x266   :  { %v786_v51 = vrot.slane %v706_v49, 6  ;;  %v708_v55 = vpop.f32.mrb[7].mxu0  ;;  %v779_v61 = vpop.f32.mrb[7].mxu1  ;;  %v788_v29 = vrot.slane %v777_v50, 6  ;;  %v3619_v49 = vpack.c.bf16 %v1108_v60, %v1104_v58  ;;  %v1110_v50 = vld [vmem:[#allocation10 + $0xb8] sm:$0xff]  ;;  %v3667_v58 = vpack.c.bf16 %v1142_v48, %v1138_v47  ;;  %v1139_v60 = vld [vmem:[#allocation10 + $0x1a0] sm:$0xff] }
 0x267   :  { %v787_v63 = vrot.slane %v708_v55, 6  ;;  %v789_v23 = vrot.slane %v779_v61, 6  ;;  %v1107_v55 = vld [vmem:[#allocation10 + $0xa0] sm:$0xff]  ;;  %v3621_v61 = vpack.c.bf16 %v1110_v50, %v1106_v1  ;;  %v1137_v1 = vld [vmem:[#allocation10 + $0x190] sm:$0xff] }
 0x268   :  { %v794_v4 = vadd.f32 %v786_v51, %v572_v62  ;;  %v796_v37 = vadd.f32 %v788_v29, %v574_v35  ;;  %v1103_v51 = vld [vmem:[#allocation10 + $0x80] sm:$0xff]  ;;  %v1141_v50 = vld [vmem:[#allocation10 + $0x1b0] sm:$0xff] }
 0x269   :  { %v795_v12 = vadd.f32 %v787_v63, %v573_v10  ;;  %v797_v25 = vadd.f32 %v789_v23, %v575_v24  ;;  %v3623_v62 = vpack.c.bf16 %v1107_v55, %v1103_v51  ;;  %v1105_v63 = vld [vmem:[#allocation10 + $0x90] sm:$0xff]  ;;  %v1118_v24 = vld [vmem:[#allocation10 + $0xf8] sm:$0xff]  ;;  %v1115_v29 = vld [vmem:[#allocation10 + $0xe0] sm:$0xff]  ;;  %v3670_v51 = vpack.c.bf16 %v1139_v60, %v1135_v56 }
 0x26a   :  { %v2409_v13 = vmul.f32 -1.442695, %v794_v4  ;;  %v1109_v4 = vld [vmem:[#allocation10 + $0xb0] sm:$0xff]  ;;  %v1144_v55 = vld [vmem:[#allocation10 + $0x1c8] sm:$0xff]  ;;  %v828_v47 = vld [vmem:[#allocation4 + $0x10] sm:$0x30] }
 0x26b   :  { %v2410_v17 = vmul.f32 -1.442695, %v795_v12  ;;  %v2411_v36 = vmul.f32 -1.442695, %v797_v25  ;;  %v3626_v10 = vpack.c.bf16 %v1109_v4, %v1105_v63  ;;  %v1112_v12 = vld [vmem:[#allocation10 + $0xc8] sm:$0xff]  ;;  %v1111_v25 = vld [vmem:[#allocation10 + $0xc0] sm:$0xff] }
 0x26c   :  { %3034 = vpow2.f32 %v2409_v13  ;;  %v1116_v13 = vld [vmem:[#allocation10 + $0xe8] sm:$0xff]  ;;  %v1146_v4 = vld [vmem:[#allocation10 + $0x1d8] sm:$0xff] }
 0x26d   :  { %3036 = vpow2.f32 %v2410_v17  ;;  %v1114_v17 = vld [vmem:[#allocation10 + $0xd8] sm:$0xff]  ;;  %v3631_v23 = vpack.c.bf16 %v1116_v13, %v1112_v12  ;;  %v1148_v63 = vld [vmem:[#allocation10 + $0x1e8] sm:$0xff]  ;;  %v3674_v12 = vpack.c.bf16 %v1141_v50, %v1137_v1 }
 0x26e   :  { %3038 = vpow2.f32 %v2411_v36  ;;  %v3633_v35 = vpack.c.bf16 %v1118_v24, %v1114_v17  ;;  %v3635_v36 = vpack.c.bf16 %v1115_v29, %v1111_v25  ;;  %v3676_v13 = vpack.c.bf16 %v1148_v63, %v1144_v55  ;;  %v1150_v17 = vld [vmem:[#allocation10 + $0x1f8] sm:$0xff]  ;;  %v1143_v24 = vld [vmem:[#allocation10 + $0x1c0] sm:$0xff] }
 0x26f   :  { %3040 = vtanh.f32 %v796_v37  ;;  %v1113_v37 = vld [vmem:[#allocation10 + $0xd0] sm:$0xff]  ;;  %v1147_v25 = vld [vmem:[#allocation10 + $0x1e0] sm:$0xff]  ;;  %v3679_v29 = vpack.c.bf16 %v1150_v17, %v1146_v4 }
 0x276   :  { %v3035_v43 = vpop.eup %3034 }
 0x277   :  { %v3037_v52 = vpop.eup %3036  ;;  %v801_v53 = vadd.f32 1.0, %v3035_v43  ;;  %v1117_v43 = vld [vmem:[#allocation10 + $0xf0] sm:$0xff] }
 0x278   :  { %v807_v54 = vadd.f32 1.0, %v3037_v52  ;;  %v3039_v59 = vpop.eup %3038  ;;  %v3638_v52 = vpack.c.bf16 %v1117_v43, %v1113_v37  ;;  %v1145_v37 = vld [vmem:[#allocation10 + $0x1d0] sm:$0xff] }
 0x279   :  { %3042 = vrcp.f32 %v801_v53  ;;  %v3041_v6 = vpop.eup %3040  ;;  %v814_v19 = vadd.f32 1.0, %v3039_v59  ;;  %v1120_v53 = vld [vmem:[#allocation10 + $0x108] sm:$0xff]  ;;  %v1122_v59 = vld [vmem:[#allocation10 + $0x118] sm:$0xff]  ;;  %v1149_v43 = vld [vmem:[#allocation10 + $0x1f0] sm:$0xff] }
 0x27a   :  { %3044 = vrcp.f32 %v807_v54  ;;  %v1124_v54 = vld [vmem:[#allocation10 + $0x128] sm:$0xff] }
 0x27b   :  { %3046 = vrcp.f32 %v814_v19 }
 0x283   :  { %v3043_v7 = vpop.eup %3042 }
 0x284   :  { %v3045_v14 = vpop.eup %3044  ;;  %v821_v18 = vmul.f32 %v3043_v7, %v3041_v6  ;;  %v3643_v6 = vpack.c.bf16 %v1124_v54, %v1120_v53  ;;  %v1126_v7 = vld [vmem:[#allocation10 + $0x138] sm:$0xff]  ;;  %v3682_v53 = vpack.c.bf16 %v1147_v25, %v1143_v24  ;;  %v3686_v54 = vpack.c.bf16 %v1149_v43, %v1145_v37 }
 0x285   :  { %v820_v2 = vmul.f32 %v3045_v14, %v818_v8  ;;  %v3047_v5 = vpop.eup %3046  ;;  %v1119_v8 = vld [vmem:[#allocation10 + $0x100] sm:$0xff] }
 0x286   :  { %v1123_v14 = vld [vmem:[#allocation10 + $0x120] sm:$0xff] }
 0x287   :  { %v3590_v3 = vadd.f32 %v821_v18, %v820_v2  ;;  %v3645_v18 = vpack.c.bf16 %v1126_v7, %v1122_v59  ;;  %v3647_v19 = vpack.c.bf16 %v1123_v14, %v1119_v8  ;;  %v1121_v2 = vld [vmem:[#allocation10 + $0x110] sm:$0xff] }
 0x289   :  { %3048 = vtanh.f32 %v3590_v3  ;;  %v1075_v24 = vrot.slane %v3590_v3, 6 }
 0x293   :  { %v3049_v9 = vpop.eup %3048 }
 0x294   :  { %v824_v11 = vmul.f32 %v3049_v9, %v3047_v5  ;;  %v1125_v5 = vld [vmem:[#allocation10 + $0x130] sm:$0xff]  ;;  %v1128_v9 = vld [vmem:[#allocation10 + $0x148] sm:$0xff] }
 0x296   :  { %825 = vst [vmem:[#allocation13] sm:$0xc] %v824_v11  ;;  %v895_v15 = vrot.slane %v824_v11, 2  ;;  %v3650_v11 = vpack.c.bf16 %v1125_v5, %v1121_v2  ;;  %v826_v5 = vld [vmem:[#allocation4] sm:$0x30] }
 0x298   :  { %962 = vmatmul.mubr.f32.vlgmr.msra.gmra.mrb[8].mxu0 %v895_v15  ;;  %1033 = vmatmul.mubr.f32.vlgmr.msra.gmra.mrb[8].mxu1 %v895_v15  ;;  %v1132_v15 = vld [vmem:[#allocation10 + $0x168] sm:$0xff] }
 0x299   :  { %1218 = vmatprep.mubr.f32.mxu0 %v3318_v0  ;;  %1289 = vmatprep.mubr.f32.mxu1 %v3318_v0  ;;  %v3654_v21 = vpack.c.bf16 %v1132_v15, %v1128_v9 }
 0x29a   :  { %2689 = vmatpush1.bf16.msra.mxu0 %v3599_v31  ;;  %2721 = vmatpush1.bf16.msra.mxu1 %v3602_v34 }
 0x29b   :  { %2691 = vmatprep.subr.bf16.mxu0 %v3607_v44  ;;  %2723 = vmatprep.subr.bf16.mxu1 %v3609_v38 }
 0x29e   :  { %2693 = vmatpush1.bf16.msra.mxu0 %v3611_v42  ;;  %2725 = vmatpush1.bf16.msra.mxu1 %v3614_v57 }
 0x29f   :  { %2695 = vmatprep.subr.bf16.mxu0 %v3619_v49  ;;  %2727 = vmatprep.subr.bf16.mxu1 %v3621_v61 }
 0x2a2   :  { %2697 = vmatpush1.bf16.msra.mxu0 %v3623_v62  ;;  %2729 = vmatpush1.bf16.msra.mxu1 %v3626_v10 }
 0x2a3   :  { %2699 = vmatprep.subr.bf16.mxu0 %v3631_v23  ;;  %2731 = vmatprep.subr.bf16.mxu1 %v3633_v35 }
 0x2a6   :  { %2701 = vmatpush1.bf16.msra.mxu0 %v3635_v36  ;;  %2733 = vmatpush1.bf16.msra.mxu1 %v3638_v52 }
 0x2a7   :  { %2703 = vmatprep.subr.bf16.mxu0 %v3643_v6  ;;  %2735 = vmatprep.subr.bf16.mxu1 %v3645_v18 }
 0x2aa   :  { %2705 = vmatpush1.bf16.msra.mxu0 %v3647_v19  ;;  %2737 = vmatpush1.bf16.msra.mxu1 %v3650_v11 }
 0x2ab   :  { %2707 = vmatprep.subr.bf16.mxu0 %v3654_v21  ;;  %2739 = vmatprep.subr.bf16.mxu1 %v3656_v26 }
 0x2ae   :  { %2709 = vmatpush1.bf16.msra.mxu0 %v3659_v33  ;;  %2741 = vmatpush1.bf16.msra.mxu1 %v3663_v45 }
 0x2af   :  { %2711 = vmatprep.subr.bf16.mxu0 %v3665_v46  ;;  %2743 = vmatprep.subr.bf16.mxu1 %v3667_v58 }
 0x2b2   :  { %2713 = vmatpush1.bf16.msra.mxu0 %v3670_v51  ;;  %2745 = vmatpush1.bf16.msra.mxu1 %v3674_v12 }
 0x2b3   :  { %2715 = vmatprep.subr.bf16.mxu0 %v3676_v13  ;;  %2747 = vmatprep.subr.bf16.mxu1 %v3679_v29 }
 0x2b6   :  { %2717 = vmatpush1.bf16.msra.mxu0 %v3682_v53  ;;  %2749 = vmatpush1.bf16.msra.mxu1 %v3686_v54 }
 0x2b7   :  { %2751 = vmatprep.subr.bf16.mxu0 %v3595_v22  ;;  %2783 = vmatprep.subr.bf16.mxu1 %v3597_v30 }
 0x36b   :  { %v963_v59 = vpop.f32.mrb[8].mxu0  ;;  %v1034_v7 = vpop.f32.mrb[8].mxu1 }
 0x36c   :  { %v1043_v8 = vrot.slane %v963_v59, 4  ;;  %v965_v14 = vpop.f32.mrb[9].mxu0  ;;  %v1036_v2 = vpop.f32.mrb[9].mxu1  ;;  %v1045_v41 = vrot.slane %v1034_v7, 4 }
 0x36d   :  { %v1044_v9 = vrot.slane %v965_v14, 4  ;;  %v1046_v32 = vrot.slane %v1036_v2, 4 }
 0x36e   :  { %v1051_v15 = vadd.f32 %v1043_v8, %v826_v5  ;;  %v1053_v56 = vadd.f32 %v1045_v41, %v828_v47 }
 0x36f   :  { %v1052_v20 = vadd.f32 %v1044_v9, %v827_v16  ;;  %v1054_v40 = vadd.f32 %v1046_v32, %v829_v39  ;;  %v1084_v39 = vld [vmem:[#allocation4 + $0x8] sm:$0xc0] }
 0x370   :  { %v2412_v27 = vmul.f32 -1.442695, %v1051_v15 }
 0x371   :  { %v2413_v28 = vmul.f32 -1.442695, %v1052_v20  ;;  %v2414_v48 = vmul.f32 -1.442695, %v1054_v40 }
 0x372   :  { %3050 = vpow2.f32 %v2412_v27  ;;  %v1083_v27 = vld [vmem:[#allocation4] sm:$0xc0] }
 0x373   :  { %3052 = vpow2.f32 %v2413_v28 }
 0x374   :  { %3054 = vpow2.f32 %v2414_v48 }
 0x375   :  { %3056 = vtanh.f32 %v1053_v56  ;;  %v1086_v56 = vld [vmem:[#allocation4 + $0x18] sm:$0xc0] }
 0x37c   :  { %v3051_v60 = vpop.eup %3050 }
 0x37d   :  { %v3053_v1 = vpop.eup %3052  ;;  %v1058_v50 = vadd.f32 1.0, %v3051_v60 }
 0x37e   :  { %v1064_v55 = vadd.f32 1.0, %v3053_v1  ;;  %v3055_v63 = vpop.eup %3054 }
 0x37f   :  { %3058 = vrcp.f32 %v1058_v50  ;;  %v3057_v4 = vpop.eup %3056  ;;  %v1071_v43 = vadd.f32 1.0, %v3055_v63  ;;  %v1085_v50 = vld [vmem:[#allocation4 + $0x10] sm:$0xc0] }
 0x380   :  { %3060 = vrcp.f32 %v1064_v55 }
 0x381   :  { %3062 = vrcp.f32 %v1071_v43 }
 0x389   :  { %v3059_v17 = vpop.eup %3058 }
 0x38a   :  { %v3061_v25 = vpop.eup %3060  ;;  %v1078_v37 = vmul.f32 %v3059_v17, %v3057_v4 }
 0x38b   :  { %v1077_v59 = vmul.f32 %v3061_v25, %v1075_v24  ;;  %v3063_v8 = vpop.eup %3062 }
 0x38d   :  { %v3694_v7 = vadd.f32 %v1078_v37, %v1077_v59 }
 0x38f   :  { %3064 = vtanh.f32 %v3694_v7 }
 0x399   :  { %v3065_v14 = vpop.eup %3064 }
 0x39a   :  { %v1081_v2 = vmul.f32 %v3065_v14, %v3063_v8  ;;  %v1332_v8 = vrot.slane %v3694_v7, 6  ;;  %v1340_v7 = vld [vmem:[#allocation4 + $0x20] sm:$0x3] }
 0x39c   :  { %1082 = vst [vmem:[#allocation13] sm:$0x30] %v1081_v2  ;;  %v1152_v5 = vrot.slane %v1081_v2, 4 }
 0x39e   :  { %1219 = vmatmul.mubr.f32.vlgmr.msra.gmra.mrb[10].mxu0 %v1152_v5  ;;  %1290 = vmatmul.mubr.f32.vlgmr.msra.gmra.mrb[10].mxu1 %v1152_v5 }
 0x39f   :  { %2753 = vmatpush1.bf16.msra.mxu0 %v3599_v31  ;;  %2785 = vmatpush1.bf16.msra.mxu1 %v3602_v34 }
 0x3a0   :  { %2755 = vmatprep.subr.bf16.mxu0 %v3607_v44  ;;  %2787 = vmatprep.subr.bf16.mxu1 %v3609_v38 }
 0x3a1   :  { %1475 = vmatprep.mubr.f32.mxu0 %v3318_v0  ;;  %1546 = vmatprep.mubr.f32.mxu1 %v3318_v0 }
 0x3a3   :  { %2757 = vmatpush1.bf16.msra.mxu0 %v3611_v42  ;;  %2789 = vmatpush1.bf16.msra.mxu1 %v3614_v57 }
 0x3a4   :  { %2759 = vmatprep.subr.bf16.mxu0 %v3619_v49  ;;  %2791 = vmatprep.subr.bf16.mxu1 %v3621_v61 }
 0x3a7   :  { %2761 = vmatpush1.bf16.msra.mxu0 %v3623_v62  ;;  %2793 = vmatpush1.bf16.msra.mxu1 %v3626_v10 }
 0x3a8   :  { %2763 = vmatprep.subr.bf16.mxu0 %v3631_v23  ;;  %2795 = vmatprep.subr.bf16.mxu1 %v3633_v35 }
 0x3ab   :  { %2765 = vmatpush1.bf16.msra.mxu0 %v3635_v36  ;;  %2797 = vmatpush1.bf16.msra.mxu1 %v3638_v52 }
 0x3ac   :  { %2767 = vmatprep.subr.bf16.mxu0 %v3643_v6  ;;  %2799 = vmatprep.subr.bf16.mxu1 %v3645_v18 }
 0x3af   :  { %2769 = vmatpush1.bf16.msra.mxu0 %v3647_v19  ;;  %2801 = vmatpush1.bf16.msra.mxu1 %v3650_v11 }
 0x3b0   :  { %2771 = vmatprep.subr.bf16.mxu0 %v3654_v21  ;;  %2803 = vmatprep.subr.bf16.mxu1 %v3656_v26 }
 0x3b3   :  { %2773 = vmatpush1.bf16.msra.mxu0 %v3659_v33  ;;  %2805 = vmatpush1.bf16.msra.mxu1 %v3663_v45 }
 0x3b4   :  { %2775 = vmatprep.subr.bf16.mxu0 %v3665_v46  ;;  %2807 = vmatprep.subr.bf16.mxu1 %v3667_v58 }
 0x3b7   :  { %2777 = vmatpush1.bf16.msra.mxu0 %v3670_v51  ;;  %2809 = vmatpush1.bf16.msra.mxu1 %v3674_v12 }
 0x3b8   :  { %2779 = vmatprep.subr.bf16.mxu0 %v3676_v13  ;;  %2811 = vmatprep.subr.bf16.mxu1 %v3679_v29 }
 0x3bb   :  { %2781 = vmatpush1.bf16.msra.mxu0 %v3682_v53  ;;  %2813 = vmatpush1.bf16.msra.mxu1 %v3686_v54 }
 0x3bc   :  { %2815 = vmatprep.subr.bf16.mxu0 %v3595_v22  ;;  %2847 = vmatprep.subr.bf16.mxu1 %v3597_v30 }
 0x471   :  { %v1220_v3 = vpop.f32.mrb[10].mxu0  ;;  %v1291_v9 = vpop.f32.mrb[10].mxu1 }
 0x472   :  { %v1300_v15 = vrot.slane %v1220_v3, 2  ;;  %v1222_v16 = vpop.f32.mrb[11].mxu0  ;;  %v1293_v20 = vpop.f32.mrb[11].mxu1  ;;  %v1302_v1 = vrot.slane %v1291_v9, 2 }
 0x473   :  { %v1301_v28 = vrot.slane %v1222_v16, 2  ;;  %v1303_v48 = vrot.slane %v1293_v20, 2 }
 0x474   :  { %v1308_v32 = vadd.f32 %v1300_v15, %v1083_v27  ;;  %v1310_v63 = vadd.f32 %v1302_v1, %v1085_v50  ;;  %v1343_v1 = vld [vmem:[#allocation4 + $0x38] sm:$0x3] }
 0x475   :  { %v1309_v40 = vadd.f32 %v1301_v28, %v1084_v39  ;;  %v1311_v60 = vadd.f32 %v1303_v48, %v1086_v56 }
 0x476   :  { %v2415_v41 = vmul.f32 -1.442695, %v1308_v32 }
 0x477   :  { %v2416_v47 = vmul.f32 -1.442695, %v1309_v40  ;;  %v2417_v55 = vmul.f32 -1.442695, %v1311_v60  ;;  %v1341_v40 = vld [vmem:[#allocation4 + $0x28] sm:$0x3] }
 0x478   :  { %3066 = vpow2.f32 %v2415_v41 }
 0x479   :  { %3068 = vpow2.f32 %v2416_v47 }
 0x47a   :  { %3070 = vpow2.f32 %v2417_v55  ;;  %v1342_v55 = vld [vmem:[#allocation4 + $0x30] sm:$0x3] }
 0x47b   :  { %3072 = vtanh.f32 %v1310_v63 }
 0x482   :  { %v3067_v4 = vpop.eup %3066 }
 0x483   :  { %v3069_v17 = vpop.eup %3068  ;;  %v1315_v24 = vadd.f32 1.0, %v3067_v4 }
 0x484   :  { %v1321_v25 = vadd.f32 1.0, %v3069_v17  ;;  %v3071_v37 = vpop.eup %3070 }
 0x485   :  { %3074 = vrcp.f32 %v1315_v24  ;;  %v3073_v43 = vpop.eup %3072  ;;  %v1328_v5 = vadd.f32 1.0, %v3071_v37 }
 0x486   :  { %3076 = vrcp.f32 %v1321_v25 }
 0x487   :  { %3078 = vrcp.f32 %v1328_v5 }
 0x48f   :  { %v3075_v59 = vpop.eup %3074 }
 0x490   :  { %v3077_v14 = vpop.eup %3076  ;;  %v1335_v2 = vmul.f32 %v3075_v59, %v3073_v43 }
 0x491   :  { %v1334_v3 = vmul.f32 %v3077_v14, %v1332_v8  ;;  %v3079_v15 = vpop.eup %3078 }
 0x493   :  { %v3732_v9 = vadd.f32 %v1335_v2, %v1334_v3 }
 0x495   :  { %3080 = vtanh.f32 %v3732_v9  ;;  %v1577_v59 = vrot.slane %v3732_v9, 6 }
 0x49f   :  { %v3081_v16 = vpop.eup %3080 }
 0x4a0   :  { %v1338_v20 = vmul.f32 %v3081_v16, %v3079_v15 }
 0x4a2   :  { %1339 = vst [vmem:[#allocation13] sm:$0xc0] %v1338_v20  ;;  %v1409_v27 = vrot.slane %v1338_v20, 6 }
 0x4a4   :  { %1476 = vmatmul.mubr.f32.vlgmr.msra.gmra.mrb[12].mxu0 %v1409_v27  ;;  %1547 = vmatmul.mubr.f32.vlgmr.msra.gmra.mrb[12].mxu1 %v1409_v27 }
 0x4a5   :  { %2817 = vmatpush1.bf16.msra.mxu0 %v3599_v31  ;;  %2849 = vmatpush1.bf16.msra.mxu1 %v3602_v34 }
 0x4a6   :  { %2819 = vmatprep.subr.bf16.mxu0 %v3607_v44  ;;  %2851 = vmatprep.subr.bf16.mxu1 %v3609_v38 }
 0x4a7   :  { %1717 = vmatprep.mubr.f32.mxu0 %v3318_v0  ;;  %1788 = vmatprep.mubr.f32.mxu1 %v3318_v0 }
 0x4a9   :  { %2821 = vmatpush1.bf16.msra.mxu0 %v3611_v42  ;;  %2853 = vmatpush1.bf16.msra.mxu1 %v3614_v57 }
 0x4aa   :  { %2823 = vmatprep.subr.bf16.mxu0 %v3619_v49  ;;  %2855 = vmatprep.subr.bf16.mxu1 %v3621_v61 }
 0x4ad   :  { %2825 = vmatpush1.bf16.msra.mxu0 %v3623_v62  ;;  %2857 = vmatpush1.bf16.msra.mxu1 %v3626_v10 }
 0x4ae   :  { %2827 = vmatprep.subr.bf16.mxu0 %v3631_v23  ;;  %2859 = vmatprep.subr.bf16.mxu1 %v3633_v35 }
 0x4b1   :  { %2829 = vmatpush1.bf16.msra.mxu0 %v3635_v36  ;;  %2861 = vmatpush1.bf16.msra.mxu1 %v3638_v52 }
 0x4b2   :  { %2831 = vmatprep.subr.bf16.mxu0 %v3643_v6  ;;  %2863 = vmatprep.subr.bf16.mxu1 %v3645_v18 }
 0x4b5   :  { %2833 = vmatpush1.bf16.msra.mxu0 %v3647_v19  ;;  %2865 = vmatpush1.bf16.msra.mxu1 %v3650_v11 }
 0x4b6   :  { %2835 = vmatprep.subr.bf16.mxu0 %v3654_v21  ;;  %2867 = vmatprep.subr.bf16.mxu1 %v3656_v26 }
 0x4b9   :  { %2837 = vmatpush1.bf16.msra.mxu0 %v3659_v33  ;;  %2869 = vmatpush1.bf16.msra.mxu1 %v3663_v45 }
 0x4ba   :  { %2839 = vmatprep.subr.bf16.mxu0 %v3665_v46  ;;  %2871 = vmatprep.subr.bf16.mxu1 %v3667_v58 }
 0x4bd   :  { %2841 = vmatpush1.bf16.msra.mxu0 %v3670_v51  ;;  %2873 = vmatpush1.bf16.msra.mxu1 %v3674_v12 }
 0x4be   :  { %2843 = vmatprep.subr.bf16.mxu0 %v3676_v13  ;;  %2875 = vmatprep.subr.bf16.mxu1 %v3679_v29 }
 0x4c1   :  { %2845 = vmatpush1.bf16.msra.mxu0 %v3682_v53  ;;  %2877 = vmatpush1.bf16.msra.mxu1 %v3686_v54 }
 0x4c2   :  { %2879 = vmatprep.subr.bf16.mxu0 %v3595_v22  ;;  %2911 = vmatprep.subr.bf16.mxu1 %v3597_v30 }
 0x577   :  { %v1477_v28 = vpop.f32.mrb[12].mxu0  ;;  %v1548_v32 = vpop.f32.mrb[12].mxu1 }
 0x578   :  { %v1553_v39 = vadd.f32 %v1477_v28, %v1340_v7  ;;  %v1479_v41 = vpop.f32.mrb[13].mxu0  ;;  %v1550_v47 = vpop.f32.mrb[13].mxu1  ;;  %v1555_v4 = vadd.f32 %v1548_v32, %v1342_v55 }
 0x579   :  { %v1554_v48 = vadd.f32 %v1479_v41, %v1341_v40  ;;  %v1556_v50 = vadd.f32 %v1550_v47, %v1343_v1  ;;  %v2101_v40 = vld [vmem:[#allocation10 + $0x8] sm:$0xff]  ;;  %v2103_v47 = vld [vmem:[#allocation10 + $0x18] sm:$0xff]  ;;  %v2104_v1 = vld [vmem:[#allocation10 + $0x20] sm:$0xff] }
 0x57a   :  { %v2418_v56 = vmul.f32 -1.442695, %v1553_v39  ;;  %v2105_v41 = vld [vmem:[#allocation10 + $0x28] sm:$0xff] }
 0x57b   :  { %v2419_v60 = vmul.f32 -1.442695, %v1554_v48  ;;  %v2420_v63 = vmul.f32 -1.442695, %v1556_v50  ;;  %v2942_v48 = vpack.c.bf16 %v2105_v41, %v2101_v40  ;;  %v2147_v40 = vld [vmem:[#allocation10 + $0x178] sm:$0xff] }
 0x57c   :  { %3082 = vpow2.f32 %v2418_v56  ;;  %v2107_v56 = vld [vmem:[#allocation10 + $0x38] sm:$0xff] }
 0x57d   :  { %3084 = vpow2.f32 %v2419_v60  ;;  %v2100_v60 = vld [vmem:[#allocation10] sm:$0xff]  ;;  %v2974_v50 = vpack.c.bf16 %v2107_v56, %v2103_v47 }
 0x57e   :  { %3086 = vpow2.f32 %v2420_v63  ;;  %v2944_v55 = vpack.c.bf16 %v2104_v1, %v2100_v60  ;;  %v2102_v63 = vld [vmem:[#allocation10 + $0x10] sm:$0xff]  ;;  %v2144_v56 = vld [vmem:[#allocation10 + $0x160] sm:$0xff] }
 0x57f   :  { %3088 = vtanh.f32 %v1555_v4  ;;  %v2106_v4 = vld [vmem:[#allocation10 + $0x30] sm:$0xff] }
 0x580   :  { %v2142_v60 = vld [vmem:[#allocation10 + $0x150] sm:$0xff] }
 0x586   :  { %v3083_v22 = vpop.eup %3082 }
 0x587   :  { %v3085_v17 = vpop.eup %3084  ;;  %v1560_v30 = vadd.f32 1.0, %v3083_v22  ;;  %v2976_v22 = vpack.c.bf16 %v2106_v4, %v2102_v63  ;;  %v2153_v63 = vld [vmem:[#allocation10 + $0x1a8] sm:$0xff] }
 0x588   :  { %v1566_v24 = vadd.f32 1.0, %v3085_v17  ;;  %v3087_v25 = vpop.eup %3086  ;;  %v2109_v17 = vld [vmem:[#allocation10 + $0x48] sm:$0xff] }
 0x589   :  { %3090 = vrcp.f32 %v1560_v30  ;;  %v3089_v37 = vpop.eup %3088  ;;  %v1573_v2 = vadd.f32 1.0, %v3087_v25  ;;  %v2113_v30 = vld [vmem:[#allocation10 + $0x68] sm:$0xff]  ;;  %v2115_v25 = vld [vmem:[#allocation10 + $0x78] sm:$0xff] }
 0x58a   :  { %3092 = vrcp.f32 %v1566_v24  ;;  %v2111_v24 = vld [vmem:[#allocation10 + $0x58] sm:$0xff] }
 0x58b   :  { %3094 = vrcp.f32 %v1573_v2  ;;  %v2114_v2 = vld [vmem:[#allocation10 + $0x70] sm:$0xff] }
 0x593   :  { %v3091_v43 = vpop.eup %3090 }
 0x594   :  { %v3093_v8 = vpop.eup %3092  ;;  %v1580_v14 = vmul.f32 %v3091_v43, %v3089_v37  ;;  %v2108_v37 = vld [vmem:[#allocation10 + $0x40] sm:$0xff] }
 0x595   :  { %v1579_v5 = vmul.f32 %v3093_v8, %v1577_v59  ;;  %v3095_v15 = vpop.eup %3094  ;;  %v2112_v43 = vld [vmem:[#allocation10 + $0x60] sm:$0xff]  ;;  %v2978_v59 = vpack.c.bf16 %v2115_v25, %v2111_v24 }
 0x596   :  { %v2948_v8 = vpack.c.bf16 %v2112_v43, %v2108_v37  ;;  %v2148_v24 = vld [vmem:[#allocation10 + $0x180] sm:$0xff]  ;;  %v2150_v37 = vld [vmem:[#allocation10 + $0x190] sm:$0xff] }
 0x597   :  { %v3770_v3 = vadd.f32 %v1580_v14, %v1579_v5  ;;  %v2110_v14 = vld [vmem:[#allocation10 + $0x50] sm:$0xff]  ;;  %v2152_v25 = vld [vmem:[#allocation10 + $0x1a0] sm:$0xff] }
 0x598   :  { %v2980_v5 = vpack.c.bf16 %v2114_v2, %v2110_v14  ;;  %v2154_v43 = vld [vmem:[#allocation10 + $0x1b0] sm:$0xff]  ;;  %v2159_v14 = vld [vmem:[#allocation10 + $0x1d8] sm:$0xff]  ;;  %v2968_v2 = vpack.c.bf16 %v2152_v25, %v2148_v24 }
 0x599   :  { %3096 = vtanh.f32 %v3770_v3 }
 0x5a3   :  { %v3097_v16 = vpop.eup %3096 }
 0x5a4   :  { %v1583_v20 = vmul.f32 %v3097_v16, %v3095_v15  ;;  %v2121_v15 = vld [vmem:[#allocation10 + $0xa8] sm:$0xff]  ;;  %v2119_v16 = vld [vmem:[#allocation10 + $0x98] sm:$0xff] }
 0x5a6   :  { %1584 = vst [vmem:[#allocation13 + $0x8] sm:$0x3] %v1583_v20  ;;  %1718 = vmatmul.mubr.f32.vlgmr.msra.gmra.mrb[14].mxu0 %v1583_v20  ;;  %1789 = vmatmul.mubr.f32.vlgmr.msra.gmra.mrb[14].mxu1 %v1583_v20 }
 0x5a7   :  { %2881 = vmatpush1.bf16.msra.mxu0 %v3599_v31  ;;  %2913 = vmatpush1.bf16.msra.mxu1 %v3602_v34 }
 0x5a8   :  { %2883 = vmatprep.subr.bf16.mxu0 %v3607_v44  ;;  %2915 = vmatprep.subr.bf16.mxu1 %v3609_v38 }
 0x5a9   :  { %1974 = vmatprep.mubr.f32.mxu0 %v3318_v0  ;;  %2045 = vmatprep.mubr.f32.mxu1 %v3318_v0 }
 0x5ab   :  { %2885 = vmatpush1.bf16.msra.mxu0 %v3611_v42  ;;  %2917 = vmatpush1.bf16.msra.mxu1 %v3614_v57  ;;  %v1585_v57 = vld [vmem:[#allocation4 + $0x20] sm:$0xc] }
 0x5ac   :  { %2887 = vmatprep.subr.bf16.mxu0 %v3619_v49  ;;  %2919 = vmatprep.subr.bf16.mxu1 %v3621_v61 }
 0x5af   :  { %2889 = vmatpush1.bf16.msra.mxu0 %v3623_v62  ;;  %2921 = vmatpush1.bf16.msra.mxu1 %v3626_v10  ;;  %v1586_v62 = vld [vmem:[#allocation4 + $0x28] sm:$0xc] }
 0x5b0   :  { %2891 = vmatprep.subr.bf16.mxu0 %v3631_v23  ;;  %2923 = vmatprep.subr.bf16.mxu1 %v3633_v35 }
 0x5b3   :  { %2893 = vmatpush1.bf16.msra.mxu0 %v3635_v36  ;;  %2925 = vmatpush1.bf16.msra.mxu1 %v3638_v52  ;;  %v1588_v52 = vld [vmem:[#allocation4 + $0x38] sm:$0xc] }
 0x5b4   :  { %2895 = vmatprep.subr.bf16.mxu0 %v3643_v6  ;;  %2927 = vmatprep.subr.bf16.mxu1 %v3645_v18 }
 0x5b7   :  { %2897 = vmatpush1.bf16.msra.mxu0 %v3647_v19  ;;  %2929 = vmatpush1.bf16.msra.mxu1 %v3650_v11  ;;  %v1587_v19 = vld [vmem:[#allocation4 + $0x30] sm:$0xc] }
 0x5b8   :  { %2899 = vmatprep.subr.bf16.mxu0 %v3654_v21  ;;  %2931 = vmatprep.subr.bf16.mxu1 %v3656_v26 }
 0x5bb   :  { %2901 = vmatpush1.bf16.msra.mxu0 %v3659_v33  ;;  %2933 = vmatpush1.bf16.msra.mxu1 %v3663_v45 }
 0x5bc   :  { %2903 = vmatprep.subr.bf16.mxu0 %v3665_v46  ;;  %2935 = vmatprep.subr.bf16.mxu1 %v3667_v58 }
 0x5bf   :  { %2905 = vmatpush1.bf16.msra.mxu0 %v3670_v51  ;;  %2937 = vmatpush1.bf16.msra.mxu1 %v3674_v12 }
 0x5c0   :  { %2907 = vmatprep.subr.bf16.mxu0 %v3676_v13  ;;  %2939 = vmatprep.subr.bf16.mxu1 %v3679_v29  ;;  %v1831_v13 = vrot.slane %v3770_v3, 6  ;;  %v2117_v3 = vld [vmem:[#allocation10 + $0x88] sm:$0xff] }
 0x5c1   :  { %v2950_v20 = vpack.c.bf16 %v2121_v15, %v2117_v3  ;;  %v3000_v3 = vpack.c.bf16 %v2154_v43, %v2150_v37  ;;  %v2099_v43 = vld [vmem:[#allocation4 + $0x38] sm:$0xc0] }
 0x5c3   :  { %2909 = vmatpush1.bf16.msra.mxu0 %v3682_v53  ;;  %2941 = vmatpush1.bf16.msra.mxu1 %v3686_v54 }
 0x5c4   :  { %2943 = vmatprep.subr.bf16.mxu0 %v2942_v48  ;;  %2975 = vmatprep.subr.bf16.mxu1 %v2974_v50  ;;  %v2140_v48 = vld [vmem:[#allocation10 + $0x140] sm:$0xff]  ;;  %v2146_v50 = vld [vmem:[#allocation10 + $0x170] sm:$0xff] }
 0x5c5   :  { %v2964_v1 = vpack.c.bf16 %v2144_v56, %v2140_v48  ;;  %v2996_v4 = vpack.c.bf16 %v2146_v50, %v2142_v60 }
 0x679   :  { %v1719_v31 = vpop.f32.mrb[14].mxu0  ;;  %v1790_v34 = vpop.f32.mrb[14].mxu1 }
 0x67a   :  { %v1799_v44 = vrot.slane %v1719_v31, 6  ;;  %v1721_v38 = vpop.f32.mrb[15].mxu0  ;;  %v1792_v42 = vpop.f32.mrb[15].mxu1  ;;  %v1801_v18 = vrot.slane %v1790_v34, 6  ;;  %v2123_v31 = vld [vmem:[#allocation10 + $0xb8] sm:$0xff]  ;;  %v2116_v34 = vld [vmem:[#allocation10 + $0x80] sm:$0xff] }
 0x67b   :  { %v1800_v49 = vrot.slane %v1721_v38, 6  ;;  %v1802_v36 = vrot.slane %v1792_v42, 6  ;;  %v2982_v38 = vpack.c.bf16 %v2123_v31, %v2119_v16  ;;  %v2156_v16 = vld [vmem:[#allocation10 + $0x1c0] sm:$0xff] }
 0x67c   :  { %v1807_v61 = vadd.f32 %v1799_v44, %v1585_v57  ;;  %v1809_v21 = vadd.f32 %v1801_v18, %v1587_v19  ;;  %v2120_v44 = vld [vmem:[#allocation10 + $0xa0] sm:$0xff]  ;;  %v2118_v57 = vld [vmem:[#allocation10 + $0x90] sm:$0xff] }
 0x67d   :  { %v1808_v10 = vadd.f32 %v1800_v49, %v1586_v62  ;;  %v1810_v6 = vadd.f32 %v1802_v36, %v1588_v52  ;;  %v2952_v42 = vpack.c.bf16 %v2120_v44, %v2116_v34  ;;  %v2122_v49 = vld [vmem:[#allocation10 + $0xb0] sm:$0xff]  ;;  %v2125_v62 = vld [vmem:[#allocation10 + $0xc8] sm:$0xff]  ;;  %v2131_v36 = vld [vmem:[#allocation10 + $0xf8] sm:$0xff] }
 0x67e   :  { %v2421_v23 = vmul.f32 -1.442695, %v1807_v61  ;;  %v2984_v61 = vpack.c.bf16 %v2122_v49, %v2118_v57  ;;  %v2124_v52 = vld [vmem:[#allocation10 + $0xc0] sm:$0xff]  ;;  %v2158_v34 = vld [vmem:[#allocation10 + $0x1d0] sm:$0xff] }
 0x67f   :  { %v2422_v35 = vmul.f32 -1.442695, %v1808_v10  ;;  %v2423_v11 = vmul.f32 -1.442695, %v1810_v6  ;;  %v2129_v10 = vld [vmem:[#allocation10 + $0xe8] sm:$0xff]  ;;  %v2128_v6 = vld [vmem:[#allocation10 + $0xe0] sm:$0xff] }
 0x680   :  { %3098 = vpow2.f32 %v2421_v23  ;;  %v2127_v23 = vld [vmem:[#allocation10 + $0xd8] sm:$0xff]  ;;  %v2956_v19 = vpack.c.bf16 %v2128_v6, %v2124_v52  ;;  %v2162_v44 = vld [vmem:[#allocation10 + $0x1f0] sm:$0xff] }
 0x681   :  { %3100 = vpow2.f32 %v2422_v35  ;;  %v2954_v35 = vpack.c.bf16 %v2129_v10, %v2125_v62  ;;  %v2986_v18 = vpack.c.bf16 %v2131_v36, %v2127_v23  ;;  %v1839_v23 = vld [vmem:[#allocation4 + $0x20] sm:$0x30]  ;;  %v1840_v52 = vld [vmem:[#allocation4 + $0x28] sm:$0x30] }
 0x682   :  { %3102 = vpow2.f32 %v2423_v11  ;;  %v2126_v11 = vld [vmem:[#allocation10 + $0xd0] sm:$0xff] }
 0x683   :  { %3104 = vtanh.f32 %v1809_v21  ;;  %v2130_v21 = vld [vmem:[#allocation10 + $0xf0] sm:$0xff] }
 0x68a   :  { %v3099_v26 = vpop.eup %3098 }
 0x68b   :  { %v3101_v33 = vpop.eup %3100  ;;  %v1814_v45 = vadd.f32 1.0, %v3099_v26  ;;  %v2988_v26 = vpack.c.bf16 %v2130_v21, %v2126_v11  ;;  %v1842_v21 = vld [vmem:[#allocation4 + $0x38] sm:$0x30] }
 0x68c   :  { %v1820_v46 = vadd.f32 1.0, %v3101_v33  ;;  %v3103_v58 = vpop.eup %3102  ;;  %v2133_v33 = vld [vmem:[#allocation10 + $0x108] sm:$0xff] }
 0x68d   :  { %3106 = vrcp.f32 %v1814_v45  ;;  %v3105_v51 = vpop.eup %3104  ;;  %v1827_v54 = vadd.f32 1.0, %v3103_v58  ;;  %v2137_v45 = vld [vmem:[#allocation10 + $0x128] sm:$0xff] }
 0x68e   :  { %3108 = vrcp.f32 %v1820_v46  ;;  %v2135_v46 = vld [vmem:[#allocation10 + $0x118] sm:$0xff]  ;;  %v2958_v58 = vpack.c.bf16 %v2137_v45, %v2133_v33  ;;  %v1841_v45 = vld [vmem:[#allocation4 + $0x30] sm:$0x30] }
 0x68f   :  { %3110 = vrcp.f32 %v1827_v54  ;;  %v2134_v54 = vld [vmem:[#allocation10 + $0x110] sm:$0xff] }
 0x697   :  { %v3107_v12 = vpop.eup %3106 }
 0x698   :  { %v3109_v29 = vpop.eup %3108  ;;  %v1834_v53 = vmul.f32 %v3107_v12, %v3105_v51  ;;  %v2139_v51 = vld [vmem:[#allocation10 + $0x138] sm:$0xff]  ;;  %v2132_v12 = vld [vmem:[#allocation10 + $0x100] sm:$0xff] }
 0x699   :  { %v1833_v9 = vmul.f32 %v3109_v29, %v1831_v13  ;;  %v3111_v7 = vpop.eup %3110  ;;  %v2136_v13 = vld [vmem:[#allocation10 + $0x120] sm:$0xff]  ;;  %v2990_v29 = vpack.c.bf16 %v2139_v51, %v2135_v46 }
 0x69b   :  { %v3806_v27 = vadd.f32 %v1834_v53, %v1833_v9  ;;  %v2960_v53 = vpack.c.bf16 %v2136_v13, %v2132_v12  ;;  %v2138_v9 = vld [vmem:[#allocation10 + $0x130] sm:$0xff] }
 0x69d   :  { %3112 = vtanh.f32 %v3806_v27 }
 0x6a7   :  { %v3113_v28 = vpop.eup %3112 }
 0x6a8   :  { %v1837_v32 = vmul.f32 %v3113_v28, %v3111_v7  ;;  %v2141_v7 = vld [vmem:[#allocation10 + $0x148] sm:$0xff]  ;;  %v2992_v28 = vpack.c.bf16 %v2138_v9, %v2134_v54 }
 0x6aa   :  { %1838 = vst [vmem:[#allocation13 + $0x8] sm:$0xc] %v1837_v32  ;;  %v1908_v39 = vrot.slane %v1837_v32, 2  ;;  %v2145_v32 = vld [vmem:[#allocation10 + $0x168] sm:$0xff] }
 0x6ab   :  { %v2962_v41 = vpack.c.bf16 %v2145_v32, %v2141_v7  ;;  %v2088_v7 = vrot.slane %v3806_v27, 6  ;;  %v2096_v27 = vld [vmem:[#allocation4 + $0x20] sm:$0xc0] }
 0x6ac   :  { %1975 = vmatmul.mubr.f32.vlgmr.msra.gmra.mrb[16].mxu0 %v1908_v39  ;;  %2046 = vmatmul.mubr.f32.vlgmr.msra.gmra.mrb[16].mxu1 %v1908_v39  ;;  %v2143_v39 = vld [vmem:[#allocation10 + $0x158] sm:$0xff] }
 0x6ad   :  { %2231 = vmatprep.mubr.f32.mxu0 %v3318_v0  ;;  %2302 = vmatprep.mubr.f32.mxu1 %v3318_v0  ;;  %v2946_v0 = vpack.c.bf16 %v2113_v30, %v2109_v17  ;;  %v2994_v47 = vpack.c.bf16 %v2147_v40, %v2143_v39  ;;  %v2151_v17 = vld [vmem:[#allocation10 + $0x198] sm:$0xff] }
 0x6ae   :  { %2945 = vmatpush1.bf16.msra.mxu0 %v2944_v55  ;;  %2977 = vmatpush1.bf16.msra.mxu1 %v2976_v22  ;;  %v2149_v55 = vld [vmem:[#allocation10 + $0x188] sm:$0xff]  ;;  %v2155_v30 = vld [vmem:[#allocation10 + $0x1b8] sm:$0xff] }
 0x6af   :  { %2947 = vmatprep.subr.bf16.mxu0 %v2946_v0  ;;  %2979 = vmatprep.subr.bf16.mxu1 %v2978_v59  ;;  %v2966_v22 = vpack.c.bf16 %v2153_v63, %v2149_v55  ;;  %v2998_v0 = vpack.c.bf16 %v2155_v30, %v2151_v17  ;;  %v2157_v59 = vld [vmem:[#allocation10 + $0x1c8] sm:$0xff]  ;;  %v2097_v30 = vld [vmem:[#allocation4 + $0x28] sm:$0xc0] }
 0x6b2   :  { %2949 = vmatpush1.bf16.msra.mxu0 %v2948_v8  ;;  %2981 = vmatpush1.bf16.msra.mxu1 %v2980_v5  ;;  %v2161_v8 = vld [vmem:[#allocation10 + $0x1e8] sm:$0xff]  ;;  %v2163_v5 = vld [vmem:[#allocation10 + $0x1f8] sm:$0xff] }
 0x6b3   :  { %2951 = vmatprep.subr.bf16.mxu0 %v2950_v20  ;;  %2983 = vmatprep.subr.bf16.mxu1 %v2982_v38  ;;  %v2970_v15 = vpack.c.bf16 %v2161_v8, %v2157_v59  ;;  %v2160_v20 = vld [vmem:[#allocation10 + $0x1e0] sm:$0xff]  ;;  %v3002_v31 = vpack.c.bf16 %v2163_v5, %v2159_v14 }
 0x6b4   :  { %v2972_v38 = vpack.c.bf16 %v2160_v20, %v2156_v16  ;;  %v2098_v14 = vld [vmem:[#allocation4 + $0x30] sm:$0xc0] }
 0x6b6   :  { %2953 = vmatpush1.bf16.msra.mxu0 %v2952_v42  ;;  %2985 = vmatpush1.bf16.msra.mxu1 %v2984_v61  ;;  %v3004_v42 = vpack.c.bf16 %v2162_v44, %v2158_v34 }
 0x6b7   :  { %2955 = vmatprep.subr.bf16.mxu0 %v2954_v35  ;;  %2987 = vmatprep.subr.bf16.mxu1 %v2986_v18 }
 0x6ba   :  { %2957 = vmatpush1.bf16.msra.mxu0 %v2956_v19  ;;  %2989 = vmatpush1.bf16.msra.mxu1 %v2988_v26 }
 0x6bb   :  { %2959 = vmatprep.subr.bf16.mxu0 %v2958_v58  ;;  %2991 = vmatprep.subr.bf16.mxu1 %v2990_v29 }
 0x6be   :  { %2961 = vmatpush1.bf16.msra.mxu0 %v2960_v53  ;;  %2993 = vmatpush1.bf16.msra.mxu1 %v2992_v28 }
 0x6bf   :  { %2963 = vmatprep.subr.bf16.mxu0 %v2962_v41  ;;  %2995 = vmatprep.subr.bf16.mxu1 %v2994_v47 }
 0x6c2   :  { %2965 = vmatpush1.bf16.msra.mxu0 %v2964_v1  ;;  %2997 = vmatpush1.bf16.msra.mxu1 %v2996_v4 }
 0x6c3   :  { %2967 = vmatprep.subr.bf16.mxu0 %v2966_v22  ;;  %2999 = vmatprep.subr.bf16.mxu1 %v2998_v0 }
 0x6c6   :  { %2969 = vmatpush1.bf16.msra.mxu0 %v2968_v2  ;;  %3001 = vmatpush1.bf16.msra.mxu1 %v3000_v3 }
 0x6c7   :  { %2971 = vmatprep.subr.bf16.mxu0 %v2970_v15  ;;  %3003 = vmatprep.subr.bf16.mxu1 %v3002_v31 }
 0x6ca   :  { %2973 = vmatpush1.bf16.msra.mxu0 %v2972_v38  ;;  %3005 = vmatpush1.bf16.msra.mxu1 %v3004_v42 }
 0x77f   :  { %v1976_v57 = vpop.f32.mrb[16].mxu0  ;;  %v2047_v49 = vpop.f32.mrb[16].mxu1 }
 0x780   :  { %v2056_v61 = vrot.slane %v1976_v57, 4  ;;  %v1978_v62 = vpop.f32.mrb[17].mxu0  ;;  %v2049_v10 = vpop.f32.mrb[17].mxu1  ;;  %v2058_v33 = vrot.slane %v2047_v49, 4 }
 0x781   :  { %v2057_v35 = vrot.slane %v1978_v62, 4  ;;  %v2059_v11 = vrot.slane %v2049_v10, 4 }
 0x782   :  { %v2064_v36 = vadd.f32 %v2056_v61, %v1839_v23  ;;  %v2066_v58 = vadd.f32 %v2058_v33, %v1841_v45 }
 0x783   :  { %v2065_v6 = vadd.f32 %v2057_v35, %v1840_v52  ;;  %v2067_v26 = vadd.f32 %v2059_v11, %v1842_v21 }
 0x784   :  { %v2424_v18 = vmul.f32 -1.442695, %v2064_v36 }
 0x785   :  { %v2425_v19 = vmul.f32 -1.442695, %v2065_v6  ;;  %v2426_v46 = vmul.f32 -1.442695, %v2067_v26 }
 0x786   :  { %3114 = vpow2.f32 %v2424_v18 }
 0x787   :  { %3116 = vpow2.f32 %v2425_v19 }
 0x788   :  { %3118 = vpow2.f32 %v2426_v46 }
 0x789   :  { %3120 = vtanh.f32 %v2066_v58 }
 0x790   :  { %v3115_v51 = vpop.eup %3114 }
 0x791   :  { %v3117_v12 = vpop.eup %3116  ;;  %v2071_v13 = vadd.f32 1.0, %v3115_v51 }
 0x792   :  { %v2077_v29 = vadd.f32 1.0, %v3117_v12  ;;  %v3119_v53 = vpop.eup %3118 }
 0x793   :  { %3122 = vrcp.f32 %v2071_v13  ;;  %v3121_v54 = vpop.eup %3120  ;;  %v2084_v39 = vadd.f32 1.0, %v3119_v53 }
 0x794   :  { %3124 = vrcp.f32 %v2077_v29 }
 0x795   :  { %3126 = vrcp.f32 %v2084_v39 }
 0x79d   :  { %v3123_v9 = vpop.eup %3122 }
 0x79e   :  { %v3125_v28 = vpop.eup %3124  ;;  %v2091_v32 = vmul.f32 %v3123_v9, %v3121_v54 }
 0x79f   :  { %v2090_v40 = vmul.f32 %v3125_v28, %v2088_v7  ;;  %v3127_v47 = vpop.eup %3126 }
 0x7a1   :  { %v2092_v41 = vadd.f32 %v2091_v32, %v2090_v40 }
 0x7a3   :  { %3128 = vtanh.f32 %v2092_v41  ;;  %v2345_v38 = vrot.slane %v2092_v41, 6 }
 0x7ad   :  { %v3129_v48 = vpop.eup %3128 }
 0x7ae   :  { %v2094_v56 = vmul.f32 %v3129_v48, %v3127_v47 }
 0x7b0   :  { %2095 = vst [vmem:[#allocation13 + $0x8] sm:$0x30] %v2094_v56  ;;  %v2165_v60 = vrot.slane %v2094_v56, 4 }
 0x7b2   :  { %2232 = vmatmul.mubr.f32.vlgmr.msra.gmra.mrb[18].mxu0 %v2165_v60  ;;  %2303 = vmatmul.mubr.f32.vlgmr.msra.gmra.mrb[18].mxu1 %v2165_v60 }
 0x885   :  { %v2233_v1 = vpop.f32.mrb[18].mxu0  ;;  %v2304_v50 = vpop.f32.mrb[18].mxu1 }
 0x886   :  { %v2313_v55 = vrot.slane %v2233_v1, 2  ;;  %v2235_v63 = vpop.f32.mrb[19].mxu0  ;;  %v2306_v4 = vpop.f32.mrb[19].mxu1  ;;  %v2315_v8 = vrot.slane %v2304_v50, 2 }
 0x887   :  { %v2314_v22 = vrot.slane %v2235_v63, 2  ;;  %v2316_v37 = vrot.slane %v2306_v4, 2 }
 0x888   :  { %v2321_v17 = vadd.f32 %v2313_v55, %v2096_v27  ;;  %v2323_v5 = vadd.f32 %v2315_v8, %v2098_v14 }
 0x889   :  { %v2322_v24 = vadd.f32 %v2314_v22, %v2097_v30  ;;  %v2324_v59 = vadd.f32 %v2316_v37, %v2099_v43 }
 0x88a   :  { %v2427_v0 = vmul.f32 -1.442695, %v2321_v17 }
 0x88b   :  { %v2428_v25 = vmul.f32 -1.442695, %v2322_v24  ;;  %v2429_v2 = vmul.f32 -1.442695, %v2324_v59 }
 0x88c   :  { %3130 = vpow2.f32 %v2427_v0 }
 0x88d   :  { %3132 = vpow2.f32 %v2428_v25 }
 0x88e   :  { %3134 = vpow2.f32 %v2429_v2 }
 0x88f   :  { %3136 = vtanh.f32 %v2323_v5 }
 0x896   :  { %v3131_v3 = vpop.eup %3130 }
 0x897   :  { %v3133_v15 = vpop.eup %3132  ;;  %v2328_v16 = vadd.f32 1.0, %v3131_v3 }
 0x898   :  { %v2334_v20 = vadd.f32 1.0, %v3133_v15  ;;  %v3135_v31 = vpop.eup %3134 }
 0x899   :  { %3138 = vrcp.f32 %v2328_v16  ;;  %v3137_v34 = vpop.eup %3136  ;;  %v2341_v49 = vadd.f32 1.0, %v3135_v31 }
 0x89a   :  { %3140 = vrcp.f32 %v2334_v20 }
 0x89b   :  { %3142 = vrcp.f32 %v2341_v49 }
 0x8a3   :  { %v3139_v44 = vpop.eup %3138 }
 0x8a4   :  { %v3141_v42 = vpop.eup %3140  ;;  %v2348_v57 = vmul.f32 %v3139_v44, %v3137_v34 }
 0x8a5   :  { %v2347_v61 = vmul.f32 %v3141_v42, %v2345_v38  ;;  %v3143_v10 = vpop.eup %3142 }
 0x8a7   :  { %v2349_v62 = vadd.f32 %v2348_v57, %v2347_v61 }
 0x8a9   :  { %2354 = vst [vmem:[#allocation3 - $0x6] sm:$0xc0] %v2349_v62  ;;  %2359 = vst [vmem:[#allocation16 - $0x6] sm:$0xc0] %v2349_v62  ;;  %3144 = vtanh.f32 %v2349_v62 }
 0x8b3   :  { %v3145_v23 = vpop.eup %3144 }
 0x8b4   :  { %v2351_v35 = vmul.f32 %v3145_v23, %v3143_v10 }
 0x8b6   :  { %2352 = vst [vmem:[#allocation13 + $0x8] sm:$0xc0] %v2351_v35  ;;  %2353 = vst [vmem:[#allocation2 - $0x6] sm:$0xc0] %v2351_v35 }
 0x8b7   :  { %2358 = vst [vmem:[#allocation14 - $0x6] sm:$0xc0] %v2351_v35 }
 0x8b8   :  { %3245 = shalt.err (!%p3242_p8)
}
 0x8b9   :  { %s3246_s9 = scalar_lea.hbm %s3870_s5, 32 }
 0x8ba   :  { %p3247_p9 = scmp.ne.s32.totalorder %s3870_s5, %s3246_s9  ;;  %p3250_p10 = scmp.lt.u32.totalorder %s3246_s9, %s3870_s5 }
 0x8bc   :  { %p3252_p11 = pnand %p3250_p10, %p3247_p9 }
 0x8be   :  { %3255 = shalt.err (!%p3252_p11)
}
 0x8bf   :  { %2381 = dma.vmem_to_hbm [thread:$0]  %s2379_s8, 32, %s3870_s5, [#allocation15]  }
 0x8c0   :  { %s3256_s15 = scalar_lea.vmem %s3812_s25, 256  ;;  %p3261_p13 = scmp.lt.s32.totalorder %s3812_s25, %s3812_s25 }
 0x8c1   :  { %p3257_p12 = scmp.ne.s32.totalorder %s3812_s25, %s3256_s15  ;;  %p3262_p0 = scmp.lt.s32.totalorder %s3256_s15, %s3256_s15 }
 0x8c3   :  { %p3263_p1 = por %p3262_p0, %p3261_p13 }
 0x8c5   :  { %p3264_p2 = pnand %p3263_p1, %p3257_p12 }
 0x8c7   :  { %3267 = shalt.err (!%p3264_p2)
}
 0x8c8   :  { %s3268_s18 = scalar_lea.hbm %s3869_s4, 256 }
 0x8c9   :  { %p3269_p3 = scmp.ne.s32.totalorder %s3869_s4, %s3268_s18  ;;  %p3272_p4 = scmp.lt.u32.totalorder %s3268_s18, %s3869_s4 }
 0x8cb   :  { %p3274_p5 = pnand %p3272_p4, %p3269_p3 }
 0x8cd   :  { %3277 = shalt.err (!%p3274_p5)
}
 0x8ce   :  { %2371 = dma.vmem_to_hbm [thread:$0]  %s3812_s25, 256, %s3869_s4, [#allocation7], %s3314_s1, %s3314_s1, %s3315_s21  }
 0x8cf   :  { %s3278_s7 = scalar_lea.vmem %s3814_s27, 32  ;;  %p3283_p7 = scmp.lt.s32.totalorder %s3814_s27, %s3814_s27 }
 0x8d0   :  { %p3279_p6 = scmp.ne.s32.totalorder %s3814_s27, %s3278_s7  ;;  %p3284_p8 = scmp.lt.s32.totalorder %s3278_s7, %s3278_s7 }
 0x8d2   :  { %p3285_p9 = por %p3284_p8, %p3283_p7 }
 0x8d4   :  { %p3286_p10 = pnand %p3285_p9, %p3279_p6 }
 0x8d6   :  { %3289 = shalt.err (!%p3286_p10)
}
 0x8d7   :  { %s3290_s24 = scalar_lea.hbm %s3871_s6, 32 }
 0x8d8   :  { %p3291_p11 = scmp.ne.s32.totalorder %s3871_s6, %s3290_s24  ;;  %p3294_p12 = scmp.lt.u32.totalorder %s3290_s24, %s3871_s6 }
 0x8da   :  { %p3296_p13 = pnand %p3294_p12, %p3291_p11 }
 0x8dc   :  { %3299 = shalt.err (!%p3296_p13)
}
 0x8dd   :  { %2391 = dma.vmem_to_hbm [thread:$0]  %s3814_s27, 32, %s3871_s6, [#allocation15]  }
 0x8de   :  { %3306 = dma.done.wait [#allocation7], 256  }
 0x8df   :  { %3307 = vsyncadd [#allocation7], 4294967040 }
 0x8e0   :  { %3308 = dma.done.wait [#allocation15], 64  }
 0x8e1   :  { %3309 = vsyncadd [#allocation15], 4294967232 }
 0x8e2   :  { %2401 = vsyncpa [#allocation6], 1 }
 0x8e3   :  { %2402 = vsyncpa [#allocation9], 1 }
 0x8e4   :  { %2403 = vsyncpa [#allocation12], 1 }
 0x8e5   :  { %2404 = vsyncpa [#allocation7], 1 }
 0x8e6   :  { %2405 = vsyncpa [#allocation15], 1 }

</bundles_post_ra>
